<compile_context>
chip_gen: v7x
topology: tpu7x:2x2x1
jax: 0.10.0
libtpu: 0.0.40
codegen_flags: <defaults>
</compile_context>

<pallas_src>
import functools

import jax
import jax.numpy as jnp
from jax.experimental import pallas as pl
from jax.experimental.pallas import tpu as pltpu


def _round_up(x, m):
    return ((x + m - 1) // m) * m


def _act(x, nl):
    if nl == "HS":  # h-swish: x * relu6(x + 3) / 6
        return x * (jnp.clip(x + 3.0, 0.0, 6.0) * (1.0 / 6.0))
    return jnp.maximum(x, 0.0)  # ReLU


# ------------------------------ Pallas kernel ---------------------------------

def inverted_residual_kernel(
    x_ref, w1_ref, b1_ref, dw_ref, bdw_ref,
    wse1_ref, bse1_ref, wse2_ref, bse2_ref,
    w2_ref, b2_ref, out_ref, pad_ref,
    *, k, s, use_se, nl, residual,
):
    _, H, W, Cin = x_ref.shape
    E = w1_ref.shape[1]
    _, Hout, Wout, Cout = out_ref.shape
    p = k // 2

    x = x_ref[...]                                   # (1, H, W, Cin) bf16

    # ---- 1x1 expand conv (+ folded BN) + NL: bf16 x bf16 -> f32 on MXU -----
    h = jnp.dot(x.reshape(H * W, Cin), w1_ref[...],
                preferred_element_type=jnp.float32) + b1_ref[...]
    h = _act(h, nl)                                  # (H*W, E) f32

    # ---- depthwise kxk conv (+ folded BN) via padded VMEM scratch ----------
    # Only the p-wide halo strips are zeroed; the interior is overwritten with
    # h on every grid step (no full-buffer zero-fill).
    if p > 0:
        zrow = jnp.zeros((1, p, W + 2 * p, E), pad_ref.dtype)
        pad_ref[:, 0:p, :, :] = zrow
        pad_ref[:, p + H:, :, :] = zrow
        zcol = jnp.zeros((1, H + 2 * p, p, E), pad_ref.dtype)
        pad_ref[:, :, 0:p, :] = zcol
        pad_ref[:, :, p + W:, :] = zcol
    pad_ref[:, p:p + H, p:p + W, :] = h.reshape(1, H, W, E)

    dw = dw_ref[...]                                 # (k*k, E) f32, read once
    acc = jnp.zeros((1, Hout, Wout, E), jnp.float32)
    for kh in range(k):
        for kw in range(k):
            if s == 1:
                win = pad_ref[:, kh:kh + Hout, kw:kw + Wout, :]
            else:
                win = pad_ref[:, pl.ds(kh, Hout, stride=s),
                              pl.ds(kw, Wout, stride=s), :]
            acc = acc + win * dw[kh * k + kw].reshape(1, 1, 1, E)
    acc = acc + bdw_ref[...].reshape(1, 1, 1, E)

    # ---- optional squeeze-and-excite ---------------------------------------
    if use_se:
        se = jnp.mean(acc, axis=(1, 2))              # (1, E)
        se = jnp.dot(se, wse1_ref[...],
                     preferred_element_type=jnp.float32) + bse1_ref[...]
        se = jnp.maximum(se, 0.0)                    # ReLU
        se = jnp.dot(se, wse2_ref[...],
                     preferred_element_type=jnp.float32) + bse2_ref[...]
        se = jnp.clip(se + 3.0, 0.0, 6.0) * (1.0 / 6.0)   # h-sigmoid
        acc = acc * se[:, None, None, :]

    acc = _act(acc, nl)

    # ---- 1x1 project conv (+ folded BN): bf16 x bf16 -> f32 on MXU ---------
    y = jnp.dot(acc.reshape(Hout * Wout, E).astype(jnp.bfloat16), w2_ref[...],
                preferred_element_type=jnp.float32) + b2_ref[...]
    y = y.reshape(1, Hout, Wout, Cout)

    # ---- residual -----------------------------------------------------------
    if residual:
        y = y + x.astype(jnp.float32)

    out_ref[...] = y.astype(out_ref.dtype)


# --------------------------- parameter setup (glue) ---------------------------

def _fold_bn(gamma, beta, mean, var, eps=1e-5):
    scale = gamma / jnp.sqrt(var + eps)
    return scale, beta - mean * scale


def _bn_params(key, c):
    k1, k2, k3, k4 = jax.random.split(key, 4)
    gamma = jax.random.uniform(k1, (c,), jnp.float32, 0.8, 1.2)
    beta = 0.05 * jax.random.normal(k2, (c,), jnp.float32)
    mean = 0.05 * jax.random.normal(k3, (c,), jnp.float32)
    var = jax.random.uniform(k4, (c,), jnp.float32, 0.5, 1.5)
    return gamma, beta, mean, var


def init_block_params(key, cfg):
    cin, k, cout, e, s, use_se, nl = cfg
    er = max(e // 4, 1)
    cin_p, e_p, er_p, cout_p = (_round_up(c, 128) for c in (cin, e, er, cout))
    keys = jax.random.split(key, 10)
    # 1x1 expand conv (PyTorch (e, cin, 1, 1), bias=False) + BN
    w1 = 0.1 * jax.random.normal(keys[0], (cin, e), jnp.float32)
    sc1, bi1 = _fold_bn(*_bn_params(keys[1], e))
    # depthwise kxk conv (PyTorch (e, 1, k, k), bias=False) + BN
    dw = 0.1 * jax.random.normal(keys[2], (k * k, e), jnp.float32)
    sc2, bi2 = _fold_bn(*_bn_params(keys[3], e))
    # SE: Linear(e -> e//4) -> ReLU -> Linear(e//4 -> e) -> h-sigmoid
    wse1 = 0.1 * jax.random.normal(keys[4], (e, er), jnp.float32)
    bse1 = 0.05 * jax.random.normal(keys[5], (1, er), jnp.float32)
    wse2 = 0.1 * jax.random.normal(keys[6], (er, e), jnp.float32)
    bse2 = 0.05 * jax.random.normal(keys[7], (1, e), jnp.float32)
    # 1x1 project conv (PyTorch (cout, e, 1, 1), bias=False) + BN
    w2 = 0.1 * jax.random.normal(keys[8], (e, cout), jnp.float32)
    sc3, bi3 = _fold_bn(*_bn_params(keys[9], cout))

    def pad2(a, r, c):
        return jnp.pad(a, ((0, r - a.shape[0]), (0, c - a.shape[1])))

    prm = dict(
        w1=pad2(w1 * sc1[None, :], cin_p, e_p).astype(jnp.bfloat16),
        b1=pad2(bi1[None, :], 1, e_p),
        dw=pad2(dw * sc2[None, :], k * k, e_p),
        bdw=pad2(bi2[None, :], 1, e_p),
        wse1=pad2(wse1, e_p, er_p), bse1=pad2(bse1, 1, er_p),
        wse2=pad2(wse2, er_p, e_p), bse2=pad2(bse2, 1, e_p),
        w2=pad2(w2 * sc3[None, :], e_p, cout_p).astype(jnp.bfloat16),
        b2=pad2(bi3[None, :], 1, cout_p),
    )
    return prm, (cin_p, e_p, er_p, cout_p)


# ------------------------------ pallas_call glue -------------------------------

def run_block(x_nhwc_p, cfg, prm, pads):
    cin, k, cout, e, s, use_se, nl = cfg
    cin_p, e_p, er_p, cout_p = pads
    N, H, W, _ = x_nhwc_p.shape
    p = k // 2
    Hout = (H + 2 * p - k) // s + 1
    Wout = (W + 2 * p - k) // s + 1
    residual = (s == 1 and cin == cout)

    kern = functools.partial(inverted_residual_kernel,
                             k=k, s=s, use_se=use_se, nl=nl, residual=residual)

    def full(shape):
        nd = len(shape)
        return pl.BlockSpec(shape, lambda n, _nd=nd: (0,) * _nd)

    in_specs = [
        pl.BlockSpec((1, H, W, cin_p), lambda n: (n, 0, 0, 0)),     # x
        full((cin_p, e_p)), full((1, e_p)),                          # w1, b1
        full((k * k, e_p)), full((1, e_p)),                          # dw, bdw
        full((e_p, er_p)), full((1, er_p)),                          # wse1, bse1
        full((er_p, e_p)), full((1, e_p)),                           # wse2, bse2
        full((e_p, cout_p)), full((1, cout_p)),                      # w2, b2
    ]

    return pl.pallas_call(
        kern,
        out_shape=jax.ShapeDtypeStruct((N, Hout, Wout, cout_p), jnp.bfloat16),
        grid=(N,),
        in_specs=in_specs,
        out_specs=pl.BlockSpec((1, Hout, Wout, cout_p), lambda n: (n, 0, 0, 0)),
        scratch_shapes=[pltpu.VMEM((1, H + 2 * p, W + 2 * p, e_p), jnp.float32)],
        compiler_params=pltpu.CompilerParams(
            dimension_semantics=("parallel",),
            vmem_limit_bytes=48 * 1024 * 1024,
        ),
    )(x_nhwc_p, prm["w1"], prm["b1"], prm["dw"], prm["bdw"],
      prm["wse1"], prm["bse1"], prm["wse2"], prm["bse2"],
      prm["w2"], prm["b2"])


class MakeLayersPallas:
    """Pallas equivalent of `Make_Layers`: a sequence of inverted residual blocks."""

    def __init__(self, layers_configs, key):
        self.configs = list(layers_configs)
        keys = jax.random.split(key, len(self.configs))
        self.params, self.pads = [], []
        for kk, cfg in zip(keys, self.configs):
            prm, pads = init_block_params(kk, cfg)
            self.params.append(prm)
            self.pads.append(pads)

    def __call__(self, x_nchw):
        # NCHW -> NHWC, pad channels to a 128-multiple (lane-dense), bf16.
        x = jnp.transpose(x_nchw, (0, 2, 3, 1))
        cin0 = self.configs[0][0]
        cin0_p = self.pads[0][0]
        x = jnp.pad(x, ((0, 0), (0, 0), (0, 0), (0, cin0_p - cin0)))
        x = x.astype(jnp.bfloat16)
        for cfg, prm, pads in zip(self.configs, self.params, self.pads):
            x = run_block(x, cfg, prm, pads)
        cout = self.configs[-1][2]
        x = x[..., :cout].astype(jnp.float32)
        return jnp.transpose(x, (0, 3, 1, 2))        # NHWC -> NCHW


if __name__ == "__main__":
    key = jax.random.PRNGKey(0)
    kx, kp = jax.random.split(key)

    # (in_channels, kernel_size, out_channels, exp, stride, SE, NL)
    layers_configs = [
        (4, 3, 8, 16, 1, True, "HS"),
        (8, 3, 8, 16, 1, False, "RE"),   # stride 1, in==out -> residual path
    ]

    model = MakeLayersPallas(layers_configs, kp)

    x = jax.random.normal(kx, (2, 4, 16, 16), jnp.float32)  # NCHW like PyTorch
    y = model(x)
    jax.block_until_ready(y)
    assert y.shape == (2, 8, 16, 16), y.shape
    assert bool(jnp.all(jnp.isfinite(y)))
    print("KERNEL_OK")
</pallas_src>

<mosaic_0001>
module attributes {stable_mosaic.version = 11 : i64} {
  func.func @inverted_residual_kernel(%arg0: i32, %arg1: memref<1x16x16x128xbf16, #tpu.memory_space<vmem>>, %arg2: memref<128x128xbf16, #tpu.memory_space<vmem>>, %arg3: memref<1x128xf32, #tpu.memory_space<vmem>>, %arg4: memref<9x128xf32, #tpu.memory_space<vmem>>, %arg5: memref<1x128xf32, #tpu.memory_space<vmem>>, %arg6: memref<128x128xf32, #tpu.memory_space<vmem>>, %arg7: memref<1x128xf32, #tpu.memory_space<vmem>>, %arg8: memref<128x128xf32, #tpu.memory_space<vmem>>, %arg9: memref<1x128xf32, #tpu.memory_space<vmem>>, %arg10: memref<128x128xbf16, #tpu.memory_space<vmem>>, %arg11: memref<1x128xf32, #tpu.memory_space<vmem>>, %arg12: memref<1x16x16x128xbf16, #tpu.memory_space<vmem>>, %arg13: memref<1x18x18x128xf32, #tpu.memory_space<vmem>>) attributes {dimension_semantics = [#tpu.dimension_semantics<parallel>], iteration_bounds = array<i64: 2>, scalar_prefetch = 0 : i64, scratch_operands = 1 : i64, tpu.core_type = #tpu.core_type<tc>, window_params = [{transform_indices = @transform_0, window_bounds = array<i64: 1, 16, 16, 128>}, {pipeline_mode = #tpu.pipeline_mode<synchronous>, transform_indices = @transform_1, window_bounds = array<i64: 128, 128>}, {pipeline_mode = #tpu.pipeline_mode<synchronous>, transform_indices = @transform_2, window_bounds = array<i64: 1, 128>}, {pipeline_mode = #tpu.pipeline_mode<synchronous>, transform_indices = @transform_3, window_bounds = array<i64: 9, 128>}, {pipeline_mode = #tpu.pipeline_mode<synchronous>, transform_indices = @transform_4, window_bounds = array<i64: 1, 128>}, {pipeline_mode = #tpu.pipeline_mode<synchronous>, transform_indices = @transform_5, window_bounds = array<i64: 128, 128>}, {pipeline_mode = #tpu.pipeline_mode<synchronous>, transform_indices = @transform_6, window_bounds = array<i64: 1, 128>}, {pipeline_mode = #tpu.pipeline_mode<synchronous>, transform_indices = @transform_7, window_bounds = array<i64: 128, 128>}, {pipeline_mode = #tpu.pipeline_mode<synchronous>, transform_indices = @transform_8, window_bounds = array<i64: 1, 128>}, {pipeline_mode = #tpu.pipeline_mode<synchronous>, transform_indices = @transform_9, window_bounds = array<i64: 128, 128>}, {pipeline_mode = #tpu.pipeline_mode<synchronous>, transform_indices = @transform_10, window_bounds = array<i64: 1, 128>}, {transform_indices = @transform_11, window_bounds = array<i64: 1, 16, 16, 128>}]} {
    %c0 = arith.constant 0 : index
    %c0_0 = arith.constant 0 : index
    %c0_1 = arith.constant 0 : index
    %c0_2 = arith.constant 0 : index
    %0 = vector.load %arg1[%c0, %c0_0, %c0_1, %c0_2] : memref<1x16x16x128xbf16, #tpu.memory_space<vmem>>, vector<1x16x16x128xbf16>
    %1 = vector.shape_cast %0 : vector<1x16x16x128xbf16> to vector<256x128xbf16>
    %c0_3 = arith.constant 0 : index
    %c0_4 = arith.constant 0 : index
    %2 = vector.load %arg2[%c0_3, %c0_4] : memref<128x128xbf16, #tpu.memory_space<vmem>>, vector<128x128xbf16>
    %cst = arith.constant dense<0.000000e+00> : vector<256x128xf32>
    %3 = tpu.matmul %1, %2, %cst {dimension_numbers = #tpu.dot_dimension_numbers<[1], [0], [0], [1], [0, 0, 1, 1], [], []>} : vector<256x128xbf16>, vector<128x128xbf16>, vector<256x128xf32> -> vector<256x128xf32>
    %c0_5 = arith.constant 0 : index
    %c0_6 = arith.constant 0 : index
    %4 = vector.load %arg3[%c0_5, %c0_6] : memref<1x128xf32, #tpu.memory_space<vmem>>, vector<1x128xf32>
    %5 = vector.broadcast %4 : vector<1x128xf32> to vector<256x128xf32>
    %6 = arith.addf %3, %5 : vector<256x128xf32>
    %cst_7 = arith.constant 3.000000e+00 : f32
    %7 = vector.broadcast %cst_7 : f32 to vector<256x128xf32>
    %8 = arith.addf %6, %7 : vector<256x128xf32>
    %cst_8 = arith.constant 0.000000e+00 : f32
    %cst_9 = arith.constant 6.000000e+00 : f32
    %9 = vector.broadcast %cst_8 : f32 to vector<256x128xf32>
    %10 = arith.maximumf %9, %8 : vector<256x128xf32>
    %11 = vector.broadcast %cst_9 : f32 to vector<256x128xf32>
    %12 = arith.minimumf %11, %10 : vector<256x128xf32>
    %cst_10 = arith.constant 0.166666672 : f32
    %13 = vector.broadcast %cst_10 : f32 to vector<256x128xf32>
    %14 = arith.mulf %12, %13 : vector<256x128xf32>
    %15 = arith.mulf %6, %14 : vector<256x128xf32>
    %cst_11 = arith.constant 0.000000e+00 : f32
    %16 = vector.broadcast %cst_11 : f32 to vector<1x1x18x128xf32>
    %c0_12 = arith.constant 0 : index
    %c0_13 = arith.constant 0 : index
    %c0_14 = arith.constant 0 : index
    %c0_15 = arith.constant 0 : index
    %17 = vector.load %arg13[%c0_12, %c0_13, %c0_14, %c0_15] : memref<1x18x18x128xf32, #tpu.memory_space<vmem>>, vector<1x1x18x128xf32>
    tpu.vector_store %arg13[%c0_12, %c0_13, %c0_14, %c0_15], %16 {strides = array<i32>} : memref<1x18x18x128xf32, #tpu.memory_space<vmem>>, vector<1x1x18x128xf32>,
    %c0_16 = arith.constant 0 : index
    %c17 = arith.constant 17 : index
    %c0_17 = arith.constant 0 : index
    %c0_18 = arith.constant 0 : index
    %18 = vector.load %arg13[%c0_16, %c17, %c0_17, %c0_18] : memref<1x18x18x128xf32, #tpu.memory_space<vmem>>, vector<1x1x18x128xf32>
    tpu.vector_store %arg13[%c0_16, %c17, %c0_17, %c0_18], %16 {strides = array<i32>} : memref<1x18x18x128xf32, #tpu.memory_space<vmem>>, vector<1x1x18x128xf32>,
    %cst_19 = arith.constant 0.000000e+00 : f32
    %19 = vector.broadcast %cst_19 : f32 to vector<1x18x1x128xf32>
    %c0_20 = arith.constant 0 : index
    %c0_21 = arith.constant 0 : index
    %c0_22 = arith.constant 0 : index
    %c0_23 = arith.constant 0 : index
    %20 = vector.load %arg13[%c0_20, %c0_21, %c0_22, %c0_23] : memref<1x18x18x128xf32, #tpu.memory_space<vmem>>, vector<1x18x1x128xf32>
    tpu.vector_store %arg13[%c0_20, %c0_21, %c0_22, %c0_23], %19 {strides = array<i32>} : memref<1x18x18x128xf32, #tpu.memory_space<vmem>>, vector<1x18x1x128xf32>,
    %c0_24 = arith.constant 0 : index
    %c0_25 = arith.constant 0 : index
    %c17_26 = arith.constant 17 : index
    %c0_27 = arith.constant 0 : index
    %21 = vector.load %arg13[%c0_24, %c0_25, %c17_26, %c0_27] : memref<1x18x18x128xf32, #tpu.memory_space<vmem>>, vector<1x18x1x128xf32>
    tpu.vector_store %arg13[%c0_24, %c0_25, %c17_26, %c0_27], %19 {strides = array<i32>} : memref<1x18x18x128xf32, #tpu.memory_space<vmem>>, vector<1x18x1x128xf32>,
    %22 = vector.shape_cast %15 : vector<256x128xf32> to vector<1x16x16x128xf32>
    %c0_28 = arith.constant 0 : index
    %c1 = arith.constant 1 : index
    %c1_29 = arith.constant 1 : index
    %c0_30 = arith.constant 0 : index
    %23 = vector.load %arg13[%c0_28, %c1, %c1_29, %c0_30] : memref<1x18x18x128xf32, #tpu.memory_space<vmem>>, vector<1x16x16x128xf32>
    tpu.vector_store %arg13[%c0_28, %c1, %c1_29, %c0_30], %22 {strides = array<i32>} : memref<1x18x18x128xf32, #tpu.memory_space<vmem>>, vector<1x16x16x128xf32>,
    %c0_31 = arith.constant 0 : index
    %c0_32 = arith.constant 0 : index
    %24 = vector.load %arg4[%c0_31, %c0_32] : memref<9x128xf32, #tpu.memory_space<vmem>>, vector<9x128xf32>
    %cst_33 = arith.constant 0.000000e+00 : f32
    %25 = vector.broadcast %cst_33 : f32 to vector<1x16x16x128xf32>
    %c0_34 = arith.constant 0 : index
    %c0_35 = arith.constant 0 : index
    %c0_36 = arith.constant 0 : index
    %c0_37 = arith.constant 0 : index
    %26 = vector.load %arg13[%c0_34, %c0_35, %c0_36, %c0_37] : memref<1x18x18x128xf32, #tpu.memory_space<vmem>>, vector<1x16x16x128xf32>
    %27 = vector.extract_strided_slice %24 {offsets = [0, 0], sizes = [1, 128], strides = [1, 1]} : vector<9x128xf32> to vector<1x128xf32>
    %28 = vector.shape_cast %27 : vector<1x128xf32> to vector<128xf32>
    %29 = vector.shape_cast %28 : vector<128xf32> to vector<1x1x1x128xf32>
    %30 = vector.broadcast %29 : vector<1x1x1x128xf32> to vector<1x16x16x128xf32>
    %31 = arith.mulf %26, %30 : vector<1x16x16x128xf32>
    %32 = arith.addf %25, %31 : vector<1x16x16x128xf32>
    %c0_38 = arith.constant 0 : index
    %c0_39 = arith.constant 0 : index
    %c1_40 = arith.constant 1 : index
    %c0_41 = arith.constant 0 : index
    %33 = vector.load %arg13[%c0_38, %c0_39, %c1_40, %c0_41] : memref<1x18x18x128xf32, #tpu.memory_space<vmem>>, vector<1x16x16x128xf32>
    %34 = vector.extract_strided_slice %24 {offsets = [1, 0], sizes = [1, 128], strides = [1, 1]} : vector<9x128xf32> to vector<1x128xf32>
    %35 = vector.shape_cast %34 : vector<1x128xf32> to vector<128xf32>
    %36 = vector.shape_cast %35 : vector<128xf32> to vector<1x1x1x128xf32>
    %37 = vector.broadcast %36 : vector<1x1x1x128xf32> to vector<1x16x16x128xf32>
    %38 = arith.mulf %33, %37 : vector<1x16x16x128xf32>
    %39 = arith.addf %32, %38 : vector<1x16x16x128xf32>
    %c0_42 = arith.constant 0 : index
    %c0_43 = arith.constant 0 : index
    %c2 = arith.constant 2 : index
    %c0_44 = arith.constant 0 : index
    %40 = vector.load %arg13[%c0_42, %c0_43, %c2, %c0_44] : memref<1x18x18x128xf32, #tpu.memory_space<vmem>>, vector<1x16x16x128xf32>
    %41 = vector.extract_strided_slice %24 {offsets = [2, 0], sizes = [1, 128], strides = [1, 1]} : vector<9x128xf32> to vector<1x128xf32>
    %42 = vector.shape_cast %41 : vector<1x128xf32> to vector<128xf32>
    %43 = vector.shape_cast %42 : vector<128xf32> to vector<1x1x1x128xf32>
    %44 = vector.broadcast %43 : vector<1x1x1x128xf32> to vector<1x16x16x128xf32>
    %45 = arith.mulf %40, %44 : vector<1x16x16x128xf32>
    %46 = arith.addf %39, %45 : vector<1x16x16x128xf32>
    %c0_45 = arith.constant 0 : index
    %c1_46 = arith.constant 1 : index
    %c0_47 = arith.constant 0 : index
    %c0_48 = arith.constant 0 : index
    %47 = vector.load %arg13[%c0_45, %c1_46, %c0_47, %c0_48] : memref<1x18x18x128xf32, #tpu.memory_space<vmem>>, vector<1x16x16x128xf32>
    %48 = vector.extract_strided_slice %24 {offsets = [3, 0], sizes = [1, 128], strides = [1, 1]} : vector<9x128xf32> to vector<1x128xf32>
    %49 = vector.shape_cast %48 : vector<1x128xf32> to vector<128xf32>
    %50 = vector.shape_cast %49 : vector<128xf32> to vector<1x1x1x128xf32>
    %51 = vector.broadcast %50 : vector<1x1x1x128xf32> to vector<1x16x16x128xf32>
    %52 = arith.mulf %47, %51 : vector<1x16x16x128xf32>
    %53 = arith.addf %46, %52 : vector<1x16x16x128xf32>
    %c0_49 = arith.constant 0 : index
    %c1_50 = arith.constant 1 : index
    %c1_51 = arith.constant 1 : index
    %c0_52 = arith.constant 0 : index
    %54 = vector.load %arg13[%c0_49, %c1_50, %c1_51, %c0_52] : memref<1x18x18x128xf32, #tpu.memory_space<vmem>>, vector<1x16x16x128xf32>
    %55 = vector.extract_strided_slice %24 {offsets = [4, 0], sizes = [1, 128], strides = [1, 1]} : vector<9x128xf32> to vector<1x128xf32>
    %56 = vector.shape_cast %55 : vector<1x128xf32> to vector<128xf32>
    %57 = vector.shape_cast %56 : vector<128xf32> to vector<1x1x1x128xf32>
    %58 = vector.broadcast %57 : vector<1x1x1x128xf32> to vector<1x16x16x128xf32>
    %59 = arith.mulf %54, %58 : vector<1x16x16x128xf32>
    %60 = arith.addf %53, %59 : vector<1x16x16x128xf32>
    %c0_53 = arith.constant 0 : index
    %c1_54 = arith.constant 1 : index
    %c2_55 = arith.constant 2 : index
    %c0_56 = arith.constant 0 : index
    %61 = vector.load %arg13[%c0_53, %c1_54, %c2_55, %c0_56] : memref<1x18x18x128xf32, #tpu.memory_space<vmem>>, vector<1x16x16x128xf32>
    %62 = vector.extract_strided_slice %24 {offsets = [5, 0], sizes = [1, 128], strides = [1, 1]} : vector<9x128xf32> to vector<1x128xf32>
    %63 = vector.shape_cast %62 : vector<1x128xf32> to vector<128xf32>
    %64 = vector.shape_cast %63 : vector<128xf32> to vector<1x1x1x128xf32>
    %65 = vector.broadcast %64 : vector<1x1x1x128xf32> to vector<1x16x16x128xf32>
    %66 = arith.mulf %61, %65 : vector<1x16x16x128xf32>
    %67 = arith.addf %60, %66 : vector<1x16x16x128xf32>
    %c0_57 = arith.constant 0 : index
    %c2_58 = arith.constant 2 : index
    %c0_59 = arith.constant 0 : index
    %c0_60 = arith.constant 0 : index
    %68 = vector.load %arg13[%c0_57, %c2_58, %c0_59, %c0_60] : memref<1x18x18x128xf32, #tpu.memory_space<vmem>>, vector<1x16x16x128xf32>
    %69 = vector.extract_strided_slice %24 {offsets = [6, 0], sizes = [1, 128], strides = [1, 1]} : vector<9x128xf32> to vector<1x128xf32>
    %70 = vector.shape_cast %69 : vector<1x128xf32> to vector<128xf32>
    %71 = vector.shape_cast %70 : vector<128xf32> to vector<1x1x1x128xf32>
    %72 = vector.broadcast %71 : vector<1x1x1x128xf32> to vector<1x16x16x128xf32>
    %73 = arith.mulf %68, %72 : vector<1x16x16x128xf32>
    %74 = arith.addf %67, %73 : vector<1x16x16x128xf32>
    %c0_61 = arith.constant 0 : index
    %c2_62 = arith.constant 2 : index
    %c1_63 = arith.constant 1 : index
    %c0_64 = arith.constant 0 : index
    %75 = vector.load %arg13[%c0_61, %c2_62, %c1_63, %c0_64] : memref<1x18x18x128xf32, #tpu.memory_space<vmem>>, vector<1x16x16x128xf32>
    %76 = vector.extract_strided_slice %24 {offsets = [7, 0], sizes = [1, 128], strides = [1, 1]} : vector<9x128xf32> to vector<1x128xf32>
    %77 = vector.shape_cast %76 : vector<1x128xf32> to vector<128xf32>
    %78 = vector.shape_cast %77 : vector<128xf32> to vector<1x1x1x128xf32>
    %79 = vector.broadcast %78 : vector<1x1x1x128xf32> to vector<1x16x16x128xf32>
    %80 = arith.mulf %75, %79 : vector<1x16x16x128xf32>
    %81 = arith.addf %74, %80 : vector<1x16x16x128xf32>
    %c0_65 = arith.constant 0 : index
    %c2_66 = arith.constant 2 : index
    %c2_67 = arith.constant 2 : index
    %c0_68 = arith.constant 0 : index
    %82 = vector.load %arg13[%c0_65, %c2_66, %c2_67, %c0_68] : memref<1x18x18x128xf32, #tpu.memory_space<vmem>>, vector<1x16x16x128xf32>
    %83 = vector.extract_strided_slice %24 {offsets = [8, 0], sizes = [1, 128], strides = [1, 1]} : vector<9x128xf32> to vector<1x128xf32>
    %84 = vector.shape_cast %83 : vector<1x128xf32> to vector<128xf32>
    %85 = vector.shape_cast %84 : vector<128xf32> to vector<1x1x1x128xf32>
    %86 = vector.broadcast %85 : vector<1x1x1x128xf32> to vector<1x16x16x128xf32>
    %87 = arith.mulf %82, %86 : vector<1x16x16x128xf32>
    %88 = arith.addf %81, %87 : vector<1x16x16x128xf32>
    %c0_69 = arith.constant 0 : index
    %c0_70 = arith.constant 0 : index
    %89 = vector.load %arg5[%c0_69, %c0_70] : memref<1x128xf32, #tpu.memory_space<vmem>>, vector<1x128xf32>
    %90 = vector.shape_cast %89 : vector<1x128xf32> to vector<1x1x1x128xf32>
    %91 = vector.broadcast %90 : vector<1x1x1x128xf32> to vector<1x16x16x128xf32>
    %92 = arith.addf %88, %91 : vector<1x16x16x128xf32>
    %cst_71 = arith.constant dense<0.000000e+00> : vector<1x128xf32>
    %93 = vector.multi_reduction <add>, %92, %cst_71 [1, 2] : vector<1x16x16x128xf32> to vector<1x128xf32>
    %cst_72 = arith.constant 2.560000e+02 : f32
    %94 = vector.broadcast %cst_72 : f32 to vector<1x128xf32>
    %95 = arith.divf %93, %94 : vector<1x128xf32>
    %c0_73 = arith.constant 0 : index
    %c0_74 = arith.constant 0 : index
    %96 = vector.load %arg6[%c0_73, %c0_74] : memref<128x128xf32, #tpu.memory_space<vmem>>, vector<128x128xf32>
    %cst_75 = arith.constant dense<0.000000e+00> : vector<1x128xf32>
    %97 = tpu.matmul %95, %96, %cst_75 {dimension_numbers = #tpu.dot_dimension_numbers<[1], [0], [0], [1], [0, 0, 1, 1], [], []>} : vector<1x128xf32>, vector<128x128xf32>, vector<1x128xf32> -> vector<1x128xf32>
    %c0_76 = arith.constant 0 : index
    %c0_77 = arith.constant 0 : index
    %98 = vector.load %arg7[%c0_76, %c0_77] : memref<1x128xf32, #tpu.memory_space<vmem>>, vector<1x128xf32>
    %99 = arith.addf %97, %98 : vector<1x128xf32>
    %cst_78 = arith.constant 0.000000e+00 : f32
    %100 = vector.broadcast %cst_78 : f32 to vector<1x128xf32>
    %101 = arith.maximumf %99, %100 : vector<1x128xf32>
    %c0_79 = arith.constant 0 : index
    %c0_80 = arith.constant 0 : index
    %102 = vector.load %arg8[%c0_79, %c0_80] : memref<128x128xf32, #tpu.memory_space<vmem>>, vector<128x128xf32>
    %cst_81 = arith.constant dense<0.000000e+00> : vector<1x128xf32>
    %103 = tpu.matmul %101, %102, %cst_81 {dimension_numbers = #tpu.dot_dimension_numbers<[1], [0], [0], [1], [0, 0, 1, 1], [], []>} : vector<1x128xf32>, vector<128x128xf32>, vector<1x128xf32> -> vector<1x128xf32>
    %c0_82 = arith.constant 0 : index
    %c0_83 = arith.constant 0 : index
    %104 = vector.load %arg9[%c0_82, %c0_83] : memref<1x128xf32, #tpu.memory_space<vmem>>, vector<1x128xf32>
    %105 = arith.addf %103, %104 : vector<1x128xf32>
    %cst_84 = arith.constant 3.000000e+00 : f32
    %106 = vector.broadcast %cst_84 : f32 to vector<1x128xf32>
    %107 = arith.addf %105, %106 : vector<1x128xf32>
    %cst_85 = arith.constant 0.000000e+00 : f32
    %cst_86 = arith.constant 6.000000e+00 : f32
    %108 = vector.broadcast %cst_85 : f32 to vector<1x128xf32>
    %109 = arith.maximumf %108, %107 : vector<1x128xf32>
    %110 = vector.broadcast %cst_86 : f32 to vector<1x128xf32>
    %111 = arith.minimumf %110, %109 : vector<1x128xf32>
    %cst_87 = arith.constant 0.166666672 : f32
    %112 = vector.broadcast %cst_87 : f32 to vector<1x128xf32>
    %113 = arith.mulf %111, %112 : vector<1x128xf32>
    %114 = vector.shape_cast %113 : vector<1x128xf32> to vector<1x1x1x128xf32>
    %115 = vector.broadcast %114 : vector<1x1x1x128xf32> to vector<1x16x16x128xf32>
    %116 = arith.mulf %92, %115 : vector<1x16x16x128xf32>
    %cst_88 = arith.constant 3.000000e+00 : f32
    %117 = vector.broadcast %cst_88 : f32 to vector<1x16x16x128xf32>
    %118 = arith.addf %116, %117 : vector<1x16x16x128xf32>
    %cst_89 = arith.constant 0.000000e+00 : f32
    %cst_90 = arith.constant 6.000000e+00 : f32
    %119 = vector.broadcast %cst_89 : f32 to vector<1x16x16x128xf32>
    %120 = arith.maximumf %119, %118 : vector<1x16x16x128xf32>
    %121 = vector.broadcast %cst_90 : f32 to vector<1x16x16x128xf32>
    %122 = arith.minimumf %121, %120 : vector<1x16x16x128xf32>
    %cst_91 = arith.constant 0.166666672 : f32
    %123 = vector.broadcast %cst_91 : f32 to vector<1x16x16x128xf32>
    %124 = arith.mulf %122, %123 : vector<1x16x16x128xf32>
    %125 = arith.mulf %116, %124 : vector<1x16x16x128xf32>
    %126 = vector.shape_cast %125 : vector<1x16x16x128xf32> to vector<256x128xf32>
    %127 = arith.truncf %126 : vector<256x128xf32> to vector<256x128xbf16>
    %c0_92 = arith.constant 0 : index
    %c0_93 = arith.constant 0 : index
    %128 = vector.load %arg10[%c0_92, %c0_93] : memref<128x128xbf16, #tpu.memory_space<vmem>>, vector<128x128xbf16>
    %cst_94 = arith.constant dense<0.000000e+00> : vector<256x128xf32>
    %129 = tpu.matmul %127, %128, %cst_94 {dimension_numbers = #tpu.dot_dimension_numbers<[1], [0], [0], [1], [0, 0, 1, 1], [], []>} : vector<256x128xbf16>, vector<128x128xbf16>, vector<256x128xf32> -> vector<256x128xf32>
    %c0_95 = arith.constant 0 : index
    %c0_96 = arith.constant 0 : index
    %130 = vector.load %arg11[%c0_95, %c0_96] : memref<1x128xf32, #tpu.memory_space<vmem>>, vector<1x128xf32>
    %131 = vector.broadcast %130 : vector<1x128xf32> to vector<256x128xf32>
    %132 = arith.addf %129, %131 : vector<256x128xf32>
    %133 = vector.shape_cast %132 : vector<256x128xf32> to vector<1x16x16x128xf32>
    %134 = arith.truncf %133 : vector<1x16x16x128xf32> to vector<1x16x16x128xbf16>
    %c0_97 = arith.constant 0 : index
    %c0_98 = arith.constant 0 : index
    %c0_99 = arith.constant 0 : index
    %c0_100 = arith.constant 0 : index
    %135 = vector.load %arg12[%c0_97, %c0_98, %c0_99, %c0_100] : memref<1x16x16x128xbf16, #tpu.memory_space<vmem>>, vector<1x16x16x128xbf16>
    tpu.vector_store %arg12[%c0_97, %c0_98, %c0_99, %c0_100], %134 {strides = array<i32>} : memref<1x16x16x128xbf16, #tpu.memory_space<vmem>>, vector<1x16x16x128xbf16>,
    return
  }
  func.func @transform_0(%arg0: i32) -> (i32, i32, i32, i32) {
    %c0_i32 = arith.constant 0 : i32
    %c0_i32_0 = arith.constant 0 : i32
    %c0_i32_1 = arith.constant 0 : i32
    %c0_i32_2 = arith.constant 0 : i32
    return %arg0, %c0_i32, %c0_i32_0, %c0_i32_1 : i32, i32, i32, i32
  }
  func.func @transform_1(%arg0: i32) -> (i32, i32) {
    %c0_i32 = arith.constant 0 : i32
    %c0_i32_0 = arith.constant 0 : i32
    %c0_i32_1 = arith.constant 0 : i32
    return %c0_i32, %c0_i32_0 : i32, i32
  }
  func.func @transform_2(%arg0: i32) -> (i32, i32) {
    %c0_i32 = arith.constant 0 : i32
    %c0_i32_0 = arith.constant 0 : i32
    %c0_i32_1 = arith.constant 0 : i32
    return %c0_i32, %c0_i32_0 : i32, i32
  }
  func.func @transform_3(%arg0: i32) -> (i32, i32) {
    %c0_i32 = arith.constant 0 : i32
    %c0_i32_0 = arith.constant 0 : i32
    %c0_i32_1 = arith.constant 0 : i32
    return %c0_i32, %c0_i32_0 : i32, i32
  }
  func.func @transform_4(%arg0: i32) -> (i32, i32) {
    %c0_i32 = arith.constant 0 : i32
    %c0_i32_0 = arith.constant 0 : i32
    %c0_i32_1 = arith.constant 0 : i32
    return %c0_i32, %c0_i32_0 : i32, i32
  }
  func.func @transform_5(%arg0: i32) -> (i32, i32) {
    %c0_i32 = arith.constant 0 : i32
    %c0_i32_0 = arith.constant 0 : i32
    %c0_i32_1 = arith.constant 0 : i32
    return %c0_i32, %c0_i32_0 : i32, i32
  }
  func.func @transform_6(%arg0: i32) -> (i32, i32) {
    %c0_i32 = arith.constant 0 : i32
    %c0_i32_0 = arith.constant 0 : i32
    %c0_i32_1 = arith.constant 0 : i32
    return %c0_i32, %c0_i32_0 : i32, i32
  }
  func.func @transform_7(%arg0: i32) -> (i32, i32) {
    %c0_i32 = arith.constant 0 : i32
    %c0_i32_0 = arith.constant 0 : i32
    %c0_i32_1 = arith.constant 0 : i32
    return %c0_i32, %c0_i32_0 : i32, i32
  }
  func.func @transform_8(%arg0: i32) -> (i32, i32) {
    %c0_i32 = arith.constant 0 : i32
    %c0_i32_0 = arith.constant 0 : i32
    %c0_i32_1 = arith.constant 0 : i32
    return %c0_i32, %c0_i32_0 : i32, i32
  }
  func.func @transform_9(%arg0: i32) -> (i32, i32) {
    %c0_i32 = arith.constant 0 : i32
    %c0_i32_0 = arith.constant 0 : i32
    %c0_i32_1 = arith.constant 0 : i32
    return %c0_i32, %c0_i32_0 : i32, i32
  }
  func.func @transform_10(%arg0: i32) -> (i32, i32) {
    %c0_i32 = arith.constant 0 : i32
    %c0_i32_0 = arith.constant 0 : i32
    %c0_i32_1 = arith.constant 0 : i32
    return %c0_i32, %c0_i32_0 : i32, i32
  }
  func.func @transform_11(%arg0: i32) -> (i32, i32, i32, i32) {
    %c0_i32 = arith.constant 0 : i32
    %c0_i32_0 = arith.constant 0 : i32
    %c0_i32_1 = arith.constant 0 : i32
    %c0_i32_2 = arith.constant 0 : i32
    return %arg0, %c0_i32, %c0_i32_0, %c0_i32_1 : i32, i32, i32, i32
  }
}

</mosaic_0001>

<bundles_post_ra>
// kernel: tpu_custom_call.1
= control target key start
LH: loop header
LB: loop body
LE: loop exit
PB: predicated region body
PF: predicated region fallthrough
CT: control target
= control target key end

     0   :  { %s5659_s0 = inlined_call_operand.hbm [shape: bf16[2,16,16,128], index: 0, kind: input, shape index: {}]   ;;  %s5660_s1 = inlined_call_operand.hbm [shape: bf16[128,128], index: 1, kind: input, shape index: {}]   ;;  %s5661_s2 = inlined_call_operand.vmem [shape: f32[1,128], index: 2, kind: input, shape index: {}]   ;;  %s5662_s3 = inlined_call_operand.hbm [shape: f32[9,128], index: 3, kind: input, shape index: {}]   ;;  %s5663_s4 = inlined_call_operand.vmem [shape: f32[1,128], index: 4, kind: input, shape index: {}]   ;;  %s5664_s5 = inlined_call_operand.hbm [shape: f32[128,128], index: 5, kind: input, shape index: {}]   ;;  %s5665_s6 = inlined_call_operand.vmem [shape: f32[1,128], index: 6, kind: input, shape index: {}]   ;;  %s5666_s7 = inlined_call_operand.hbm [shape: f32[128,128], index: 7, kind: input, shape index: {}]   ;;  %s5667_s8 = inlined_call_operand.vmem [shape: f32[1,128], index: 8, kind: input, shape index: {}]   ;;  %s5668_s9 = inlined_call_operand.hbm [shape: bf16[128,128], index: 9, kind: input, shape index: {}]   ;;  %s5669_s10 = inlined_call_operand.vmem [shape: f32[1,128], index: 10, kind: input, shape index: {}]   ;;  %s5670_s11 = inlined_call_operand.hbm [shape: bf16[2,16,16,128], index: 11, kind: output, shape index: {}]  }
   0x1   :  { %5711 = sst [smem:[#allocation60_spill]] %s5660_s1 }
   0x2   :  { %5712 = sst [smem:[#allocation61_spill]] %s5662_s3 }
   0x3   :  { %5713 = sst [smem:[#allocation62_spill]] %s5667_s8 }
   0x4   :  { %5714 = sst [smem:[#allocation63_spill]] %s5669_s10 }
   0x5   :  { %5715 = sst [smem:[#allocation64_spill]] %s5670_s11 }
   0x6   :  { %16 = vsyncpa [#allocation4], 0 }
   0x7   :  { %18 = vsyncpa [#allocation4 + $0x1], 0 }
   0x8   :  { %19 = vsyncpa [#allocation7], 0 }
   0x9   :  { %20 = vsyncpa [#allocation10], 0 }
   0xa   :  { %21 = vsyncpa [#allocation13], 0 }
   0xb   :  { %22 = vsyncpa [#allocation5], 0 }
   0xc   :  { %24 = vsyncpa [#allocation5 + $0x1], 0  ;;  %s3977_s17 = smov 0   ;;  %s3979_s18 = smov 0  }
   0xd   :  { %s3981_s19 = smov 0   ;;  %s3983_s20 = smov 0  }
   0xe LB: > { %s3901_s21 = smov [#allocation6]   ;;  %s3998_s23 = sadd.s32 4294967295, %s3899_s20   ;;  %s3899_s20 = sphi %s3983_s20, %s5861_s20   ;;  %s3895_s19 = sphi %s3981_s19, %s5860_s19   ;;  %s3891_s18 = sphi %s3979_s18, %s5859_s18   ;;  %s3887_s17 = sphi %s3977_s17, %s5858_s17  }
   0xf   : > { %s309_s22 = sshll.u32 %s3901_s21, 4  ;;  %p2975_p0 = scmp.ge.s32.totalorder %s3899_s20, 1  ;;  %s4003_s22 = int_to_ptr.vmem [resolvable:$true] %s309_s22 }
  0x10   : > { %p5674_p1 = scmp.eq.s32.totalorder %s3998_s23, 0  ;;  %p297_p2 = scmp.lt.s32.totalorder %s3899_s20, 3 }
  0x11   : > { %s3902_s26 = smov [#allocation9]   ;;  %s3903_s28 = smov [#allocation8]  }
  0x12   : > { %p4005_p3 = pnand %p2975_p0, %p297_p2  ;;  %s341_s27 = sshll.u32 %s3902_s26, 4  ;;  %s4018_s27 = int_to_ptr.vmem [resolvable:$true] %s341_s27 }
  0x13   : > { %s4020_s29 = sshll.u32 %s3903_s28, 4  ;;  %s5718_s1 = sld [smem:[#allocation60_spill]]  ;;  %s326_s29 = int_to_ptr.vmem [resolvable:$true] %s4020_s29 }
  0x14   : > { %s5716_s24 = scalar_select %p4005_p3, 1, 0 }
  0x15   : > { %p3531_p5 = pneg %p4005_p3 }
  0x17   : > { %p4014_p6 = pnand %p3531_p5, %p5674_p1 }
  0x19   : > { %s3651_s13 = scalar_lea.hbm %s5718_s1, 1024  ;;  %p4030_p8 = pneg %p4014_p6 }
  0x1a   : > { %p3652_p7 = scmp.ne.s32.totalorder %s5718_s1, %s3651_s13  ;;  %p3658_p11 = scmp.lt.u32.totalorder %s3651_s13, %s5718_s1 }
  0x1c   : > { %p3654_p9 = pnand %p4030_p8, %p3652_p7 }
  0x1e   : > { %p3655_p10 = pneg %p3654_p9 }
  0x20   : > { %p3660_p12 = pnand %p3658_p11, %p3655_p10 }
  0x22   : > { %3663 = shalt.err (!%p3660_p12)
}
  0x23   : > { %s3664_s28 = scalar_lea.vmem %s4003_s22, 1024  ;;  %p3672_p5 = scmp.lt.s32.totalorder %s4003_s22, %s4003_s22 }
  0x24   : > { %p3665_p13 = scmp.ne.s32.totalorder %s4003_s22, %s3664_s28  ;;  %p3673_p4 = scmp.lt.s32.totalorder %s3664_s28, %s3664_s28 }
  0x26   : > { %p3667_p0 = pnand %p3665_p13, %p4030_p8  ;;  %p3674_p7 = por %p3673_p4, %p3672_p5 }
  0x28   : > { %p3668_p2 = pneg %p3667_p0 }
  0x2a   : > { %p3675_p9 = pnand %p3674_p7, %p3668_p2 }
  0x2c   : > { %3678 = shalt.err (!%p3675_p9)
}
  0x2d   : > { %s5672_s30 = smov 64   ;;  %s5676_s12 = smov 4  }
  0x2e   : > { %3534 = dma.hbm_to_vmem [thread:$0]  (!%p4014_p6), %s5718_s1, 1024, %s4003_s22, [#allocation7], %s5672_s30, %s5672_s30, %s5676_s12  }
  0x2f   : > { %s3679_s26 = scalar_lea.hbm %s5664_s5, 2048 }
  0x30   : > { %p3680_p4 = scmp.ne.s32.totalorder %s5664_s5, %s3679_s26  ;;  %p3686_p12 = scmp.lt.u32.totalorder %s3679_s26, %s5664_s5 }
  0x32   : > { %p3682_p10 = pnand %p3680_p4, %p4030_p8 }
  0x34   : > { %p3683_p11 = pneg %p3682_p10 }
  0x36   : > { %p3688_p13 = pnand %p3686_p12, %p3683_p11 }
  0x38   : > { %3691 = shalt.err (!%p3688_p13)
}
  0x39   : > { %s3692_s22 = scalar_lea.vmem %s4018_s27, 2048  ;;  %p3700_p7 = scmp.lt.s32.totalorder %s4018_s27, %s4018_s27 }
  0x3a   : > { %p3693_p0 = scmp.ne.s32.totalorder %s4018_s27, %s3692_s22  ;;  %p3701_p9 = scmp.lt.s32.totalorder %s3692_s22, %s3692_s22 }
  0x3c   : > { %p3695_p2 = pnand %p3693_p0, %p4030_p8  ;;  %p3702_p4 = por %p3701_p9, %p3700_p7 }
  0x3e   : > { %p3696_p5 = pneg %p3695_p2 }
  0x40   : > { %p3703_p10 = pnand %p3702_p4, %p3696_p5 }
  0x42   : > { %3706 = shalt.err (!%p3703_p10)
}
  0x43   : > { %s3906_s11 = smov 128   ;;  %s3907_s8 = smov 8  }
  0x44   : > { %3540 = dma.hbm_to_vmem [thread:$0]  (!%p4014_p6), %s5664_s5, 2048, %s4018_s27, [#allocation10], %s3906_s11, %s3906_s11, %s3907_s8  }
  0x45   : > { %s5720_s3 = sld [smem:[#allocation61_spill]] }
  0x4b   : > { %s3707_s21 = scalar_lea.hbm %s5720_s3, 256 }
  0x4c   : > { %p3708_p11 = scmp.ne.s32.totalorder %s5720_s3, %s3707_s21  ;;  %p3714_p0 = scmp.lt.u32.totalorder %s3707_s21, %s5720_s3 }
  0x4e   : > { %p3710_p12 = pnand %p3708_p11, %p4030_p8 }
  0x50   : > { %p3711_p13 = pneg %p3710_p12 }
  0x52   : > { %p3716_p2 = pnand %p3714_p0, %p3711_p13 }
  0x54   : > { %3719 = shalt.err (!%p3716_p2)
}
  0x55   : > { %s3720_s10 = scalar_lea.vmem %s326_s29, 256  ;;  %p3728_p4 = scmp.lt.s32.totalorder %s326_s29, %s326_s29 }
  0x56   : > { %p3721_p5 = scmp.ne.s32.totalorder %s326_s29, %s3720_s10  ;;  %p3729_p10 = scmp.lt.s32.totalorder %s3720_s10, %s3720_s10 }
  0x58   : > { %p3723_p7 = pnand %p3721_p5, %p4030_p8  ;;  %p3730_p1 = por %p3729_p10, %p3728_p4 }
  0x5a   : > { %p3724_p9 = pneg %p3723_p7 }
  0x5c   : > { %p3731_p3 = pnand %p3730_p1, %p3724_p9 }
  0x5e   : > { %3734 = shalt.err (!%p3731_p3)
}
  0x5f   : > { %3537 = dma.hbm_to_vmem [thread:$0]  (!%p4014_p6), %s5720_s3, 256, %s326_s29, [#allocation7], %s3906_s11, %s3906_s11, %s3907_s8  }
  0x60   : > { %s3908_s13 = smov [#allocation11]   ;;  %s3909_s15 = smov [#allocation12]  }
  0x61   : > { %s357_s14 = sshll.u32 %s3908_s13, 4  ;;  %s373_s21 = sshll.u32 %s3909_s15, 4  ;;  %s358_s14 = int_to_ptr.vmem [resolvable:$true] %s357_s14  ;;  %s374_s21 = int_to_ptr.vmem [resolvable:$true] %s373_s21 }
  0x62   : > { %s3735_s22 = scalar_lea.hbm %s5666_s7, 2048 }
  0x63   : > { %p3736_p1 = scmp.ne.s32.totalorder %s5666_s7, %s3735_s22  ;;  %p3742_p12 = scmp.lt.u32.totalorder %s3735_s22, %s5666_s7 }
  0x65   : > { %p3738_p3 = pnand %p3736_p1, %p4030_p8 }
  0x67   : > { %p3739_p11 = pneg %p3738_p3 }
  0x69   : > { %p3744_p13 = pnand %p3742_p12, %p3739_p11 }
  0x6b   : > { %3747 = shalt.err (!%p3744_p13)
}
  0x6c   : > { %s3748_s29 = scalar_lea.vmem %s358_s14, 2048  ;;  %p3756_p7 = scmp.lt.s32.totalorder %s358_s14, %s358_s14 }
  0x6d   : > { %p3749_p0 = scmp.ne.s32.totalorder %s358_s14, %s3748_s29  ;;  %p3757_p9 = scmp.lt.s32.totalorder %s3748_s29, %s3748_s29 }
  0x6f   : > { %p3751_p2 = pnand %p3749_p0, %p4030_p8  ;;  %p3758_p4 = por %p3757_p9, %p3756_p7 }
  0x71   : > { %p3752_p5 = pneg %p3751_p2 }
  0x73   : > { %p3759_p10 = pnand %p3758_p4, %p3752_p5 }
  0x75   : > { %3762 = shalt.err (!%p3759_p10)
}
  0x76   : > { %3543 = dma.hbm_to_vmem [thread:$0]  (!%p4014_p6), %s5666_s7, 2048, %s358_s14, [#allocation10], %s3906_s11, %s3906_s11, %s3907_s8  }
  0x77   : > { %s3763_s15 = scalar_lea.hbm %s5668_s9, 1024 }
  0x78   : > { %p3764_p1 = scmp.ne.s32.totalorder %s5668_s9, %s3763_s15  ;;  %p3770_p12 = scmp.lt.u32.totalorder %s3763_s15, %s5668_s9 }
  0x7a   : > { %p3766_p3 = pnand %p3764_p1, %p4030_p8 }
  0x7c   : > { %p3767_p11 = pneg %p3766_p3 }
  0x7e   : > { %p3772_p13 = pnand %p3770_p12, %p3767_p11 }
  0x80   : > { %3775 = shalt.err (!%p3772_p13)
}
  0x81   : > { %s3776_s27 = scalar_lea.vmem %s374_s21, 1024  ;;  %p3784_p7 = scmp.lt.s32.totalorder %s374_s21, %s374_s21 }
  0x82   : > { %p3777_p0 = scmp.ne.s32.totalorder %s374_s21, %s3776_s27  ;;  %p3785_p9 = scmp.lt.s32.totalorder %s3776_s27, %s3776_s27 }
  0x84   : > { %p3779_p2 = pnand %p3777_p0, %p4030_p8  ;;  %p3786_p4 = por %p3785_p9, %p3784_p7 }
  0x86   : > { %p3780_p5 = pneg %p3779_p2 }
  0x88   : > { %p3787_p10 = pnand %p3786_p4, %p3780_p5 }
  0x8a   : > { %3790 = shalt.err (!%p3787_p10)
}
  0x8b   : > { %s5721_s11 = smov 4   ;;  %s5722_s8 = smov 64  }
  0x8c   : > { %3546 = dma.hbm_to_vmem [thread:$0]  (!%p4014_p6), %s5668_s9, 1024, %s374_s21, [#allocation13], %s5722_s8, %s5722_s8, %s5721_s11  }
  0x8d   : > { %s2974_s25 = sadd.s32 4294967294, %s3899_s20   ;;  %s4146_s16 = sadd.s32 1, %s3899_s20  }
  0x8e   : > { %s37_s1 = sadd.s32 1, %s3895_s19  ;;  %s34_s12 = ssub.s32 %s3899_s20, %s4146_s16 }
  0x8f   : > { %p44_p8 = scmp.ne.s32.totalorder %s3895_s19, %s3891_s18  ;;  %p35_p1 = scmp.eq.s32.totalorder %s34_s12, 0 }
  0x90   : > { %p45_p3 = scmp.eq.s32.totalorder %s3899_s20, 0  ;;  %p50_p11 = scmp.ne.s32.totalorder %s3891_s18, %s3887_s17 }
  0x91   : > { %p284_p12 = scmp.eq.s32.totalorder %s3998_s23, 1  ;;  %p5723_p0 = scmp.eq.s32.totalorder %s3998_s23, 0 }
  0x92   : > { %s4158_s30 = scalar_select %p35_p1, %s3895_s19, %s37_s1  }
  0x93   : > { %p46_p13 = por %p45_p3, %p44_p8  ;;  %p4162_p2 = por %p5723_p0, %p50_p11 }
  0x94   : > { %p4166_p6 = por %p284_p12, %p44_p8  ;;  %p290_p5 = scmp.eq.s32.totalorder %s2974_s25, 1 }
  0x95   : > { %p3560_p7 = scmp.lt.s32.totalorder %s3899_s20, 2  ;;  %s390_s15 = sand.u32 1, %s3895_s19  }
  0x96   : > { %s5725_s21 = scalar_select %p4166_p6, 1, 0 }
  0x97   : > { %p4172_p9 = por %p290_p5, %p50_p11  ;;  %s2982_s28 = sshll.u32 %s390_s15, 7 }
  0x98   : > { %s3066_s22 = sshll.u32 %s3899_s20, 11  ;;  %s394_s29 = scalar_lea.vmem [#allocation3], %s2982_s28 }
  0x99   : > { %s5726_s26 = scalar_select %p4172_p9, 1, 0 }
  0x9a   : > { %s4180_s14 = scalar_lea.hbm %s5659_s0, %s3066_s22  ;;  %s401_s1 = sshll.u32 %s394_s29, 4  ;;  %s4186_s1 = int_to_ptr.vmem [resolvable:$true] %s401_s1 }
  0x9b   : > { %p4182_p4 = pnand %p3560_p7, %p46_p13  ;;  %s4188_s12 = scalar_lea.sflag [#allocation4], %s390_s15 }
  0x9c   : > { %s3791_s3 = scalar_lea.hbm %s4180_s14, 2048  ;;  %s3796_s10 = scalar_lea.hbm %s5659_s0, 4096 }
  0x9d   : > { %p3792_p10 = scmp.ne.s32.totalorder %s4180_s14, %s3791_s3  ;;  %p3793_p8 = pneg %p4182_p4 }
  0x9e   : > { %p3797_p11 = scmp.lt.u32.totalorder %s4180_s14, %s5659_s0  ;;  %p3798_p12 = scmp.lt.u32.totalorder %s3796_s10, %s3791_s3 }
  0x9f   : > { %p3794_p1 = pnand %p3793_p8, %p3792_p10  ;;  %p3800_p0 = scmp.lt.u32.totalorder %s3791_s3, %s4180_s14 }
  0xa0   : > { %p3799_p13 = por %p3798_p12, %p3797_p11 }
  0xa1   : > { %p3795_p3 = pneg %p3794_p1 }
  0xa2   : > { %p3801_p5 = por %p3800_p0, %p3799_p13 }
  0xa4   : > { %p3802_p7 = pnand %p3801_p5, %p3795_p3 }
  0xa6   : > { %3805 = shalt.err (!%p3802_p7)
}
  0xa7   : > { %s3806_s15 = scalar_lea.vmem %s4186_s1, 2048  ;;  %s3910_s28 = smov [#allocation3]  }
  0xa8   : > { %p3807_p10 = scmp.ne.s32.totalorder %s4186_s1, %s3806_s15  ;;  %s3811_s22 = sshll.u32 %s3910_s28, 4  ;;  %s3812_s22 = int_to_ptr.vmem [resolvable:$false] %s3811_s22 }
  0xa9   : > { %s3813_s27 = scalar_lea.vmem %s3812_s22, 4096  ;;  %p3814_p6 = scmp.lt.s32.totalorder %s4186_s1, %s3812_s22 }
  0xaa   : > { %p3809_p1 = pnand %p3807_p10, %p3793_p8  ;;  %p3815_p11 = scmp.lt.s32.totalorder %s3813_s27, %s3806_s15 }
  0xac   : > { %p3810_p9 = pneg %p3809_p1  ;;  %p3816_p12 = por %p3815_p11, %p3814_p6 }
  0xae   : > { %p3817_p13 = pnand %p3816_p12, %p3810_p9 }
  0xb0   : > { %3820 = shalt.err (!%p3817_p13)
}
  0xb1   : > { %3550 = dma.hbm_to_vmem [thread:$0]  (!%p4182_p4), %s4180_s14, 2048, %s4186_s1, %s4188_s12, %s5722_s8, %s5722_s8, %s5721_s11  }
  0xb2   : > { %p5728_p8 = scmp.ne.s32.totalorder %s5716_s24, 0 }
  0xb4   : > { %413 = sbr.rel (%p5728_p8) target bundleno = 1429 (0x595), region = 64 }
  0xbb   : > { %s4222_s3 = sand.u32 1, %s3891_s18  }
  0xbc   : > { %s2986_s10 = sshll.u32 %s4222_s3, 7  ;;  %s416_s29 = scalar_lea.sflag [#allocation4], %s4222_s3 }
  0xbd   : > { %s4228_s25 = scalar_lea.vmem [#allocation3], %s2986_s10 }
  0xbe   : > { %3866 = dma.done.wait (%p4162_p2), %s416_s29, 2048  }
  0xbf   : > { %3868 = vsyncadd (%p4162_p2), %s416_s29, 4294965248  ;;  %p5729_p6 = scmp.eq.s32.totalorder %s3998_s23, 0 }
  0xc1   : > { %3870 = dma.done.wait (%p5729_p6), [#allocation7], 1280   ;;  %p5730_p9 = pmov %p5729_p6 }
  0xc2   : > { %p5731_p4 = pmov %p5729_p6 }
  0xc3   : > { %3872 = vsyncadd (%p5730_p9), [#allocation7], 4294966016 }
  0xc4   : > { %3874 = dma.done.wait (%p5731_p4), [#allocation10], 4096   ;;  %p5732_p3 = pmov %p5731_p4 }
  0xc6   : > { %3876 = vsyncadd (%p5732_p3), [#allocation10], 4294963200  ;;  %p5733_p0 = pmov %p5732_p3 }
  0xc8   : > { %3878 = dma.done.wait (%p5733_p0), [#allocation13], 1024   ;;  %p5734_p5 = pmov %p5733_p0 }
  0xc9   : > { %v3613_v0 = vld [vmem:[#allocation6] sm:$0xff]   ;;  %v3614_v1 = vld [vmem:[#allocation6 + $0x8] sm:$0xff]   ;;  %v3615_v2 = vld [vmem:[#allocation6 + $0x10] sm:$0xff]   ;;  %v3911_v24 = vmov 0.0   ;;  %v1109_v25 = vlaneseq  ;;  %vm3913_vm0 = vmmov 0   ;;  %s5853_s8 = sld [smem:[#allocation63_spill]] }
  0xca   : > { %3880 = vsyncadd (%p5734_p5), [#allocation13], 4294966272  ;;  %3277 = vmatprep.subr.bf16.mxu0 %v3613_v0  ;;  %3491 = vmatprep.subr.bf16.mxu1 %v3613_v0  ;;  %v3616_v3 = vld [vmem:[#allocation6 + $0x18] sm:$0xff]   ;;  %v3621_v4 = vld [vmem:[%s4228_s25] sm:$0xff]   ;;  %1008 = vst [vmem:[#allocation2 + $0x30] sm:$0x1] %v3911_v24 }
  0xcb   : > { %3278 = vmatpush3.bf16.msra.mxu0 %v3613_v0  ;;  %3499 = vmatpush3.bf16.msra.mxu1 %v3613_v0  ;;  %v3617_v5 = vld [vmem:[#allocation6 + $0x20] sm:$0xff]   ;;  %v3618_v7 = vld [vmem:[#allocation6 + $0x28] sm:$0xff]   ;;  %v3619_v8 = vld [vmem:[#allocation6 + $0x30] sm:$0xff]   ;;  %999 = vst [vmem:[#allocation2] sm:$0xff] %v3911_v24  ;;  %v4262_v26 = vshrl.u32 %v1109_v25, 7  ;;  %s5562_s13 = scalar_lea.vmem [#allocation14], %s2986_s10 }
  0xcc   : > { %3279 = vmatprep.subr.bf16.mxu0 %v3614_v1  ;;  %3492 = vmatprep.subr.bf16.mxu1 %v3614_v1  ;;  %v3625_v6 = vld [vmem:[%s4228_s25 + $0x40] sm:$0xff]   ;;  %v3620_v9 = vld [vmem:[#allocation6 + $0x38] sm:$0xff]   ;;  %v3622_v10 = vld [vmem:[%s4228_s25 + $0x8] sm:$0xff]   ;;  %1000 = vst [vmem:[#allocation2 + $0x8] sm:$0xff] %v3911_v24  ;;  %s3099_s10 = sshll.u32 %s3998_s23, 11  ;;  %s2853_s14 = sshll.u32 %s5562_s13, 4  ;;  %s5613_s14 = int_to_ptr.vmem [resolvable:$true] %s2853_s14 }
  0xcd   : > { %3293 = vmatprep.mubr.bf16.mxu0 %v3621_v4  ;;  %3309 = vmatprep.mubr.bf16.mxu1 %v3625_v6  ;;  %v3626_v11 = vld [vmem:[%s4228_s25 + $0x48] sm:$0xff]   ;;  %v3623_v12 = vld [vmem:[%s4228_s25 + $0x10] sm:$0xff]   ;;  %v3624_v14 = vld [vmem:[%s4228_s25 + $0x18] sm:$0xff]   ;;  %1001 = vst [vmem:[#allocation2 + $0x10] sm:$0x3] %v3911_v24  ;;  %v5679_v28 = vsub.s32 0, %v4262_v26 }
  0xce   : > { %v3629_v13 = vld [vmem:[%s4228_s25 + $0x50] sm:$0xff]   ;;  %v3630_v15 = vld [vmem:[%s4228_s25 + $0x58] sm:$0xff]   ;;  %v3627_v16 = vld [vmem:[%s4228_s25 + $0x20] sm:$0xff]   ;;  %1003 = vst [vmem:[#allocation2 + $0x198] sm:$0xff] %v3911_v24  ;;  %v1211_v32 = vsub.s32 1, %v4262_v26  ;;  %v1511_v47 = vsub.s32 4, %v4262_v26 }
  0xcf   : > { %3280 = vmatpush3.bf16.msra.mxu0 %v3614_v1  ;;  %3500 = vmatpush3.bf16.msra.mxu1 %v3614_v1  ;;  %v3633_v17 = vld [vmem:[%s4228_s25 + $0x60] sm:$0xff]   ;;  %v3628_v18 = vld [vmem:[%s4228_s25 + $0x28] sm:$0xff]   ;;  %v3631_v20 = vld [vmem:[%s4228_s25 + $0x30] sm:$0xff]   ;;  %1004 = vst [vmem:[#allocation2 + $0x1a0] sm:$0xff] %v3911_v24  ;;  %v1311_v58 = vsub.s32 2, %v4262_v26  ;;  %v1812_v62 = vsub.s32 7, %v4262_v26 }
  0xd0   : > { %3281 = vmatprep.subr.bf16.mxu0 %v3615_v2  ;;  %3493 = vmatprep.subr.bf16.mxu1 %v3615_v2  ;;  %v3634_v19 = vld [vmem:[%s4228_s25 + $0x68] sm:$0xff]   ;;  %v3635_v21 = vld [vmem:[%s4228_s25 + $0x70] sm:$0xff]   ;;  %v3632_v22 = vld [vmem:[%s4228_s25 + $0x38] sm:$0xff]   ;;  %1005 = vst [vmem:[#allocation2 + $0x1a8] sm:$0x3] %v3911_v24  ;;  %s5854_s15 = sld [smem:[#allocation64_spill]] }
  0xd1   : > { %v3636_v23 = vld [vmem:[%s4228_s25 + $0x78] sm:$0xff]   ;;  %1007 = vst [vmem:[#allocation2 + $0x18] sm:$0x1] %v3911_v24  ;;  %1009 = vst [vmem:[#allocation2 + $0x48] sm:$0x1] %v3911_v24  ;;  %v4275_v36 = vld [vmem:[#allocation8] sm:$0xff] }
  0xd2   : > { %1010 = vst [vmem:[#allocation2 + $0x60] sm:$0x1] %v3911_v24  ;;  %1011 = vst [vmem:[#allocation2 + $0x78] sm:$0x1] %v3911_v24  ;;  %v4267_v27 = vld [vmem:[%s5661_s2] ss:$0 sm:$0xff]  ;;  %v4286_v42 = vrot.slane %v4275_v36, %v5679_v28  ;;  %v4296_v53 = vrot.slane %v4275_v36, %v1211_v32 }
  0xd3   : > { %3282 = vmatpush3.bf16.msra.mxu0 %v3615_v2  ;;  %3501 = vmatpush3.bf16.msra.mxu1 %v3615_v2  ;;  %1012 = vst [vmem:[#allocation2 + $0x90] sm:$0x1] %v3911_v24  ;;  %1013 = vst [vmem:[#allocation2 + $0xa8] sm:$0x1] %v3911_v24  ;;  %v1177_v54 = vld [vmem:[#allocation2 + $0x1] sm:$0xff]  ;;  %s5839_s25 = sld [smem:[#allocation62_spill]] }
  0xd4   : > { %3283 = vmatprep.subr.bf16.mxu0 %v3616_v3  ;;  %3494 = vmatprep.subr.bf16.mxu1 %v3616_v3  ;;  %1014 = vst [vmem:[#allocation2 + $0xc0] sm:$0x1] %v3911_v24  ;;  %1015 = vst [vmem:[#allocation2 + $0xd8] sm:$0x1] %v3911_v24  ;;  %v1213_v2 = vmul.f32 %v4296_v53, %v1177_v54  ;;  %v1277_v25 = vld [vmem:[#allocation2 + $0x2] sm:$0xff]  ;;  %s2840_s23 = scalar_lea.sflag [#allocation5], %s4222_s3 }
  0xd5   : > { %1016 = vst [vmem:[#allocation2 + $0xf0] sm:$0x1] %v3911_v24  ;;  %1017 = vst [vmem:[#allocation2 + $0x108] sm:$0x1] %v3911_v24  ;;  %s3821_s22 = scalar_lea.vmem %s5613_s14, 2048  ;;  %p5855_p7 = scmp.ne.s32.totalorder %s5725_s21, 0 }
  0xd6   : > { %1018 = vst [vmem:[#allocation2 + $0x120] sm:$0x1] %v3911_v24  ;;  %1019 = vst [vmem:[#allocation2 + $0x138] sm:$0x1] %v3911_v24  ;;  %s5611_s28 = scalar_lea.hbm %s5854_s15, %s3099_s10  ;;  %p3822_p2 = scmp.ne.s32.totalorder %s5613_s14, %s3821_s22 }
  0xd7   : > { %3284 = vmatpush3.bf16.msra.mxu0 %v3616_v3  ;;  %3502 = vmatpush3.bf16.msra.mxu1 %v3616_v3  ;;  %1020 = vst [vmem:[#allocation2 + $0x150] sm:$0x1] %v3911_v24  ;;  %1021 = vst [vmem:[#allocation2 + $0x168] sm:$0x1] %v3911_v24  ;;  %s3914_s27 = smov [#allocation14]  }
  0xd8   : > { %3285 = vmatprep.subr.bf16.mxu0 %v3617_v5  ;;  %3495 = vmatprep.subr.bf16.mxu1 %v3617_v5  ;;  %1022 = vst [vmem:[#allocation2 + $0x180] sm:$0x1] %v3911_v24  ;;  %1025 = vst [vmem:[#allocation2 + $0x29] sm:$0x1] %v3911_v24  ;;  %p3823_p10 = pnand %p3822_p2, %p5855_p7  ;;  %s3825_s29 = sshll.u32 %s3914_s27, 4  ;;  %s3826_s29 = int_to_ptr.vmem [resolvable:$false] %s3825_s29 }
  0xd9   : > { %1026 = vst [vmem:[#allocation2 + $0x41] sm:$0x1] %v3911_v24  ;;  %1027 = vst [vmem:[#allocation2 + $0x59] sm:$0x1] %v3911_v24  ;;  %p3828_p11 = scmp.lt.s32.totalorder %s5613_s14, %s3826_s29 }
  0xda   : > { %1028 = vst [vmem:[#allocation2 + $0x71] sm:$0x1] %v3911_v24  ;;  %1029 = vst [vmem:[#allocation2 + $0x89] sm:$0x1] %v3911_v24  ;;  %p3824_p1 = pneg %p3823_p10 }
  0xdb   : > { %3286 = vmatpush3.bf16.msra.mxu0 %v3617_v5  ;;  %3503 = vmatpush3.bf16.msra.mxu1 %v3617_v5  ;;  %1030 = vst [vmem:[#allocation2 + $0xa1] sm:$0x1] %v3911_v24  ;;  %1031 = vst [vmem:[#allocation2 + $0xb9] sm:$0x1] %v3911_v24 }
  0xdc   : > { %3287 = vmatprep.subr.bf16.mxu0 %v3618_v7  ;;  %3496 = vmatprep.subr.bf16.mxu1 %v3618_v7  ;;  %1032 = vst [vmem:[#allocation2 + $0xd1] sm:$0x1] %v3911_v24  ;;  %1033 = vst [vmem:[#allocation2 + $0xe9] sm:$0x1] %v3911_v24 }
  0xdd   : > { %1034 = vst [vmem:[#allocation2 + $0x101] sm:$0x1] %v3911_v24  ;;  %1035 = vst [vmem:[#allocation2 + $0x119] sm:$0x1] %v3911_v24 }
  0xde   : > { %1036 = vst [vmem:[#allocation2 + $0x131] sm:$0x1] %v3911_v24  ;;  %1037 = vst [vmem:[#allocation2 + $0x149] sm:$0x1] %v3911_v24 }
  0xdf   : > { %3288 = vmatpush3.bf16.msra.mxu0 %v3618_v7  ;;  %3504 = vmatpush3.bf16.msra.mxu1 %v3618_v7  ;;  %1038 = vst [vmem:[#allocation2 + $0x161] sm:$0x1] %v3911_v24  ;;  %1039 = vst [vmem:[#allocation2 + $0x179] sm:$0x1] %v3911_v24 }
  0xe0   : > { %3289 = vmatprep.subr.bf16.mxu0 %v3619_v8  ;;  %3497 = vmatprep.subr.bf16.mxu1 %v3619_v8  ;;  %1040 = vst [vmem:[#allocation2 + $0x191] sm:$0x1] %v3911_v24  ;;  %1006 = vst [vmem:[#allocation2] sm:$0x1] %v3911_v24 }
  0xe1   : > { %1023 = vst [vmem:[#allocation2 + $0x198] sm:$0x1] %v3911_v24  ;;  %1024 = vst [vmem:[#allocation2 + $0x11] sm:$0x1] %v3911_v24 }
  0xe2   : > { %1041 = vst [vmem:[#allocation2 + $0x1a9] sm:$0x1] %v3911_v24  ;;  %5735 = vst [vmem:[#allocation20_spill] sm:$0xff] %v4262_v26 }
  0xe3   : > { %3290 = vmatpush3.bf16.msra.mxu0 %v3619_v8  ;;  %3505 = vmatpush3.bf16.msra.mxu1 %v3619_v8  ;;  %5736 = vst [vmem:[#allocation21_spill] sm:$0xff] %v4296_v53 }
  0xe4   : > { %3291 = vmatprep.subr.bf16.mxu0 %v3620_v9  ;;  %3498 = vmatprep.subr.bf16.mxu1 %v3620_v9 }
  0xe7   : > { %3292 = vmatpush3.bf16.msra.mxu0 %v3620_v9  ;;  %3506 = vmatpush3.bf16.msra.mxu1 %v3620_v9  ;;  %v1077_v49 = vld [vmem:[#allocation2] sm:$0xff]  ;;  %v1178_v9 = vld [vmem:[#allocation2 + $0x9] sm:$0xff] }
  0xe8   : > { %v1113_v63 = vmul.f32 %v4286_v42, %v1077_v49 }
  0xea   : > { %3294 = vmatmul.mubr.bf16.vlgmr.msra.gmra.mrb[0].mxu0 %v3622_v10  ;;  %3310 = vmatmul.mubr.bf16.vlgmr.msra.gmra.mrb[0].mxu1 %v3626_v11 }
  0xeb   : > { %3297 = vmatprep.mubr.bf16.mxu0 %v3623_v12  ;;  %3313 = vmatprep.mubr.bf16.mxu1 %v3629_v13 }
  0xf2   : > { %3298 = vmatmul.mubr.bf16.gmra.mrb[4].mxu0 %v3624_v14  ;;  %3314 = vmatmul.mubr.bf16.gmra.mrb[4].mxu1 %v3630_v15  ;;  %v4308_v14 = vrot.slane %v4275_v36, %v1311_v58 }
  0xf3   : > { %3301 = vmatprep.mubr.bf16.mxu0 %v3627_v16  ;;  %3317 = vmatprep.mubr.bf16.mxu1 %v3633_v17 }
  0xfa   : > { %3302 = vmatmul.mubr.bf16.gmra.mrb[8].mxu0 %v3628_v18  ;;  %3318 = vmatmul.mubr.bf16.gmra.mrb[8].mxu1 %v3634_v19 }
  0xfb   : > { %3305 = vmatprep.mubr.bf16.mxu0 %v3631_v20  ;;  %3321 = vmatprep.mubr.bf16.mxu1 %v3635_v21  ;;  %v1114_v20 = vmul.f32 0.0, %v4286_v42 }
 0x102   : > { %3306 = vmatmul.mubr.bf16.gmra.mrb[12].mxu0 %v3632_v22  ;;  %3322 = vmatmul.mubr.bf16.gmra.mrb[12].mxu1 %v3636_v23 }
 0x1bd   : > { %v3295_v29 = vpop.f32.mrb[0].mxu0  ;;  %v3311_v30 = vpop.f32.mrb[0].mxu1 }
 0x1be   : > { %v721_v31 = vadd.f32 %v3295_v29, %v4267_v27  ;;  %v712_v33 = vpop.f32.mrb[1].mxu0  ;;  %v4273_v34 = vadd.f32 %v3311_v30, %v4267_v27  ;;  %v776_v35 = vpop.f32.mrb[1].mxu1  ;;  %v1214_v30 = vmul.f32 %v4296_v53, %v1178_v9 }
 0x1bf   : > { %v713_v37 = vadd.f32 %v4267_v27, %v712_v33  ;;  %v3296_v38 = vpop.f32.mrb[2].mxu0  ;;  %v4279_v39 = vadd.f32 %v4267_v27, %v776_v35  ;;  %v4281_v40 = vpop.f32.mrb[2].mxu1  ;;  %v1278_v35 = vld [vmem:[#allocation2 + $0xa] sm:$0xff] }
 0x1c0   : > { %v841_v41 = vadd.f32 3.0, %v721_v31  ;;  %v724_v43 = vadd.f32 %v3296_v38, %v4267_v27  ;;  %v715_v44 = vpop.f32.mrb[3].mxu0  ;;  %v857_v45 = vadd.f32 3.0, %v4273_v34  ;;  %v4290_v46 = vpop.f32.mrb[3].mxu1  ;;  %v4336_v49 = vadd.f32 %v4281_v40, %v4267_v27 }
 0x1c1   : > { %v839_v48 = vadd.f32 3.0, %v713_v37  ;;  %v716_v50 = vadd.f32 %v4267_v27, %v715_v44  ;;  %v855_v51 = vadd.f32 3.0, %v4279_v39 }
 0x1c2   : > { %v873_v52 = vmax.f32 %v841_v41, 0.0  ;;  %v842_v55 = vadd.f32 3.0, %v724_v43  ;;  %v889_v56 = vmax.f32 %v857_v45, 0.0 }
 0x1c3   : > { %v871_v57 = vmax.f32 %v839_v48, 0.0  ;;  %v840_v59 = vadd.f32 3.0, %v716_v50  ;;  %v887_v60 = vmax.f32 %v855_v51, 0.0  ;;  %v1712_v51 = vsub.s32 6, %v4262_v26 }
 0x1c4   : > { %v905_v61 = vmin.f32 %v873_v52, 6.0  ;;  %v874_v0 = vmax.f32 %v842_v55, 0.0  ;;  %v921_v5 = vmin.f32 %v889_v56, 6.0  ;;  %v1313_v52 = vmul.f32 %v4308_v14, %v1277_v25 }
 0x1c5   : > { %v903_v1 = vmin.f32 %v871_v57, 6.0  ;;  %v872_v3 = vmax.f32 %v840_v59, 0.0  ;;  %v3299_v4 = vpop.f32.mrb[4].mxu0  ;;  %v4302_v6 = vpop.f32.mrb[4].mxu1  ;;  %v919_v12 = vmin.f32 %v887_v60, 6.0  ;;  %v1611_v55 = vsub.s32 5, %v4262_v26 }
 0x1c6   : > { %v937_v7 = vmul.f32 0.16666667, %v905_v61  ;;  %v906_v8 = vmin.f32 %v874_v0, 6.0  ;;  %v4305_v10 = vadd.f32 %v3299_v4, %v4267_v27  ;;  %v728_v11 = vpop.f32.mrb[5].mxu0  ;;  %v4317_v23 = vpop.f32.mrb[5].mxu1  ;;  %v1246_v56 = vadd.f32 %v1214_v30, %v1114_v20 }
 0x1c7   : > { %v935_v13 = vmul.f32 0.16666667, %v903_v1  ;;  %v904_v15 = vmin.f32 %v872_v3, 6.0  ;;  %v4311_v16 = vadd.f32 %v4267_v27, %v728_v11  ;;  %v3300_v17 = vpop.f32.mrb[6].mxu0  ;;  %v4323_v33 = vpop.f32.mrb[6].mxu1  ;;  %v4365_v4 = vadd.f32 3.0, %v4336_v49 }
 0x1c8   : > { %v4313_v18 = vmul.f32 %v937_v7, %v721_v31  ;;  %v938_v19 = vmul.f32 0.16666667, %v906_v8  ;;  %v845_v21 = vadd.f32 3.0, %v4305_v10  ;;  %v731_v22 = vpop.f32.mrb[7].mxu0  ;;  %5737 = vst [vmem:[#allocation22_spill] sm:$0xff] %v4323_v33  ;;  %v4328_v44 = vpop.f32.mrb[7].mxu1  ;;  %v4349_v60 = vadd.f32 %v3300_v17, %v4267_v27 }
 0x1c9   : > { %v4319_v24 = vmul.f32 %v935_v13, %v713_v37  ;;  %v936_v29 = vmul.f32 0.16666667, %v904_v15  ;;  %v843_v32 = vadd.f32 3.0, %v4311_v16  ;;  %v953_v38 = vmul.f32 0.16666667, %v921_v5  ;;  %5738 = vst [vmem:[#allocation23_spill] sm:$0xff] %v4328_v44 }
 0x1ca   : > { %1045 = vst [vmem:[#allocation2 + $0x31] sm:$0xff] %v4313_v18  ;;  %v4326_v31 = vmul.f32 %v938_v19, %v724_v43  ;;  %v951_v41 = vmul.f32 0.16666667, %v919_v12  ;;  %v1411_v37 = vsub.s32 3, %v4262_v26  ;;  %v877_v48 = vmax.f32 %v845_v21, 0.0 }
 0x1cb   : > { %1043 = vst [vmem:[#allocation2 + $0x19] sm:$0xff] %v4319_v24  ;;  %v4332_v45 = vmul.f32 %v936_v29, %v716_v50  ;;  %v1245_v43 = vadd.f32 %v1213_v2, %v1113_v63  ;;  %v875_v54 = vmax.f32 %v843_v32, 0.0  ;;  %v1314_v50 = vmul.f32 %v4308_v14, %v1278_v35 }
 0x1cc   : > { %1046 = vst [vmem:[#allocation2 + $0x39] sm:$0xff] %v4326_v31  ;;  %v909_v57 = vmin.f32 %v877_v48, 6.0  ;;  %v4352_v61 = vmul.f32 %v953_v38, %v4273_v34  ;;  %v4355_v63 = vmul.f32 %v951_v41, %v4279_v39  ;;  %v4362_v2 = vrot.slane %v4275_v36, %v1411_v37 }
 0x1cd   : > { %1044 = vst [vmem:[#allocation2 + $0x21] sm:$0xff] %v4332_v45  ;;  %v4344_v58 = vpop.f32.mrb[8].mxu0  ;;  %v4346_v40 = vpop.f32.mrb[8].mxu1  ;;  %v907_v59 = vmin.f32 %v875_v54, 6.0  ;;  %v4374_v34 = vrot.slane %v4275_v36, %v1511_v47  ;;  %v4377_v8 = vadd.f32 %v4267_v27, %v731_v22  ;;  %v4386_v13 = vrot.slane %v4275_v36, %v1712_v51 }
 0x1ce   : > { %5739 = vst [vmem:[#allocation24_spill] sm:$0xff] %v4346_v40  ;;  %v4357_v0 = vpop.f32.mrb[9].mxu0  ;;  %v4359_v1 = vpop.f32.mrb[9].mxu1  ;;  %5741 = vst [vmem:[#allocation26_spill] sm:$0xff] %v4362_v2  ;;  %v941_v3 = vmul.f32 0.16666667, %v909_v57  ;;  %v4391_v47 = vrot.slane %v4275_v36, %v1812_v62  ;;  %v1345_v15 = vadd.f32 %v1313_v52, %v1245_v43  ;;  %v4397_v20 = vrot.slane %v4275_v36, %v1611_v55 }
 0x1cf   : > { %5740 = vst [vmem:[#allocation25_spill] sm:$0xff] %v4359_v1  ;;  %v4367_v5 = vpop.f32.mrb[10].mxu0  ;;  %v4369_v7 = vpop.f32.mrb[10].mxu1  ;;  %5743 = vst [vmem:[#allocation28_spill] sm:$0xff] %v4374_v34  ;;  %v939_v39 = vmul.f32 0.16666667, %v907_v59  ;;  %v1346_v21 = vadd.f32 %v1314_v50, %v1246_v56  ;;  %v1215_v32 = vmul.f32 %v4296_v53, %v4319_v24  ;;  %v1515_v41 = vmul.f32 %v4374_v34, %v4313_v18 }
 0x1d0   : > { %5742 = vst [vmem:[#allocation27_spill] sm:$0xff] %v4369_v7  ;;  %1061 = vst [vmem:[#allocation2 + $0xf1] sm:$0xff] %v4352_v61  ;;  %v4381_v9 = vpop.f32.mrb[11].mxu0  ;;  %v4383_v11 = vpop.f32.mrb[11].mxu1  ;;  %v4394_v17 = vmul.f32 %v941_v3, %v4305_v10  ;;  %v846_v25 = vadd.f32 3.0, %v4349_v60  ;;  %v4409_v10 = vadd.f32 %v4267_v27, %v4290_v46  ;;  %v844_v38 = vadd.f32 3.0, %v4377_v8 }
 0x1d1   : > { %1059 = vst [vmem:[#allocation2 + $0xd9] sm:$0xff] %v4355_v63  ;;  %5744 = vst [vmem:[#allocation29_spill] sm:$0xff] %v4383_v11  ;;  %v1081_v12 = vld [vmem:[#allocation2 + $0x30] sm:$0xff]  ;;  %v4400_v22 = vmul.f32 %v939_v39, %v4311_v16  ;;  %v1217_v16 = vmul.f32 %v4296_v53, %v4313_v18  ;;  %v1814_v46 = vmul.f32 %v4391_v47, %v4313_v18 }
 0x1d2   : > { %5745 = vst [vmem:[#allocation30_spill] sm:$0xff] %v4391_v47  ;;  %v1079_v19 = vld [vmem:[#allocation2 + $0x18] sm:$0xff]  ;;  %1049 = vst [vmem:[#allocation2 + $0x61] sm:$0xff] %v4394_v17  ;;  %v1117_v36 = vmul.f32 %v4286_v42, %v1081_v12  ;;  %v1513_v48 = vmul.f32 %v4374_v34, %v4319_v24  ;;  %v1516_v56 = vmul.f32 %v4374_v34, %v4326_v31  ;;  %v878_v18 = vmax.f32 %v846_v25, 0.0 }
 0x1d3   : > { %v1115_v29 = vmul.f32 %v4286_v42, %v1079_v19  ;;  %v1413_v30 = vmul.f32 %v4362_v2, %v1079_v19  ;;  %1047 = vst [vmem:[#allocation2 + $0x49] sm:$0xff] %v4400_v22  ;;  %v4428_v55 = vld [vmem:[#allocation2 + $0x32] sm:$0xff]  ;;  %v1815_v50 = vmul.f32 %v4391_v47, %v4326_v31  ;;  %v1514_v19 = vmul.f32 %v4374_v34, %v4332_v45 }
 0x1d4   : > { %v1080_v35 = vld [vmem:[#allocation2 + $0x20] sm:$0xff]  ;;  %v876_v62 = vmax.f32 %v844_v38, 0.0  ;;  %v910_v7 = vmin.f32 %v878_v18, 6.0 }
 0x1d5   : > { %v1445_v37 = vadd.f32 %v1413_v30, %v1345_v15  ;;  %v1279_v51 = vld [vmem:[#allocation2 + $0x1a] sm:$0xff]  ;;  %v4424_v43 = vpop.f32.mrb[12].mxu0  ;;  %v4426_v52 = vpop.f32.mrb[12].mxu1  ;;  %v1247_v54 = vadd.f32 %v1215_v32, %v1115_v29  ;;  %v1280_v57 = vld [vmem:[#allocation2 + $0x22] sm:$0xff]  ;;  %v1116_v39 = vmul.f32 %v4286_v42, %v1080_v35  ;;  %v1216_v15 = vmul.f32 %v4296_v53, %v4332_v45 }
 0x1d6   : > { %5746 = vst [vmem:[#allocation31_spill] sm:$0xff] %v4424_v43  ;;  %5747 = vst [vmem:[#allocation32_spill] sm:$0xff] %v4426_v52  ;;  %v4434_v59 = vpop.f32.mrb[13].mxu0  ;;  %v4436_v3 = vpop.f32.mrb[13].mxu1  ;;  %v1249_v30 = vadd.f32 %v1217_v16, %v1117_v36  ;;  %v1082_v32 = vld [vmem:[#allocation2 + $0x38] sm:$0xff]  ;;  %v1315_v28 = vmul.f32 %v4308_v14, %v1279_v51  ;;  %v1414_v25 = vmul.f32 %v4362_v2, %v1080_v35 }
 0x1d7   : > { %5748 = vst [vmem:[#allocation33_spill] sm:$0xff] %v4434_v59  ;;  %5749 = vst [vmem:[#allocation34_spill] sm:$0xff] %v4436_v3  ;;  %v1545_v24 = vadd.f32 %v1513_v48, %v1445_v37  ;;  %v4443_v29 = vpop.f32.mrb[14].mxu0  ;;  %v1317_v37 = vmul.f32 %v4308_v14, %v4428_v55  ;;  %v1248_v48 = vadd.f32 %v1216_v15, %v1116_v39  ;;  %v4453_v45 = vpop.f32.mrb[14].mxu1 }
 0x1d8   : > { %5750 = vst [vmem:[#allocation35_spill] sm:$0xff] %v4443_v29  ;;  %v4447_v26 = vpop.f32.mrb[15].mxu0  ;;  %v1316_v3 = vmul.f32 %v4308_v14, %v1280_v57  ;;  %v1613_v52 = vmul.f32 %v4397_v20, %v1279_v51  ;;  %5752 = vst [vmem:[#allocation37_spill] sm:$0xff] %v4453_v45  ;;  %v1415_v36 = vmul.f32 %v4362_v2, %v1081_v12  ;;  %v4456_v1 = vpop.f32.mrb[15].mxu1 }
 0x1d9   : > { %5751 = vst [vmem:[#allocation36_spill] sm:$0xff] %v4447_v26  ;;  %v1347_v16 = vadd.f32 %v1315_v28, %v1247_v54  ;;  %v1446_v11 = vadd.f32 %v1414_v25, %v1346_v21  ;;  %5753 = vst [vmem:[#allocation38_spill] sm:$0xff] %v4456_v1  ;;  %v1714_v35 = vmul.f32 %v4386_v13, %v1081_v12 }
 0x1da   : > { %v1416_v38 = vmul.f32 %v4362_v2, %v1082_v32  ;;  %v1348_v40 = vadd.f32 %v1316_v3, %v1248_v48  ;;  %v1645_v26 = vadd.f32 %v1613_v52, %v1545_v24  ;;  %v1083_v39 = vld [vmem:[#allocation2 + $0x48] sm:$0xff]  ;;  %v1615_v15 = vmul.f32 %v4397_v20, %v4428_v55 }
 0x1db   : > { %v1447_v51 = vadd.f32 %v1415_v36, %v1347_v16  ;;  %v1546_v29 = vadd.f32 %v1514_v19, %v1446_v11  ;;  %v1614_v45 = vmul.f32 %v4397_v20, %v1280_v57  ;;  %v1349_v59 = vadd.f32 %v1317_v37, %v1249_v30 }
 0x1dc   : > { %v1448_v28 = vadd.f32 %v1416_v38, %v1348_v40  ;;  %v1746_v21 = vadd.f32 %v1714_v35, %v1645_v26  ;;  %v1417_v54 = vmul.f32 %v4362_v2, %v1083_v39  ;;  %v1715_v18 = vmul.f32 %v4386_v13, %v1082_v32  ;;  %v1085_v35 = vld [vmem:[#allocation2 + $0x60] sm:$0xff] }
 0x1dd   : > { %v1646_v12 = vadd.f32 %v1614_v45, %v1546_v29  ;;  %v1517_v3 = vmul.f32 %v4374_v34, %v4400_v22  ;;  %v1547_v52 = vadd.f32 %v1515_v41, %v1447_v51  ;;  %v1716_v48 = vmul.f32 %v4386_v13, %v1083_v39  ;;  %v1282_v38 = vld [vmem:[#allocation2 + $0x3a] sm:$0xff] }
 0x1de   : > { %v1846_v24 = vadd.f32 %v1814_v46, %v1746_v21  ;;  %v1449_v25 = vadd.f32 %v1417_v54, %v1349_v59  ;;  %v942_v36 = vmul.f32 0.16666667, %v910_v7  ;;  %v908_v57 = vmin.f32 %v876_v62, 6.0  ;;  %v4477_v7 = vld [vmem:[#allocation8 + $0x8] ss:$0 sm:$0xff] }
 0x1df   : > { %v1747_v11 = vadd.f32 %v1715_v18, %v1646_v12  ;;  %v1647_v19 = vadd.f32 %v1615_v15, %v1547_v52  ;;  %v1548_v30 = vadd.f32 %v1516_v56, %v1448_v28  ;;  %v4472_v37 = vadd.f32 3.0, %v4409_v10 }
 0x1e0   : > { %v4468_v40 = vadd.f32 %v1517_v3, %v1449_v25  ;;  %v974_v26 = vmul.f32 %v942_v36, %v4349_v60  ;;  %v1816_v41 = vmul.f32 %v4391_v47, %v4400_v22  ;;  %v940_v46 = vmul.f32 0.16666667, %v908_v57  ;;  %v4523_v36 = vld [vmem:[%s5663_s4] ss:$0 sm:$0xff] }
 0x1e1   : > { %v1847_v29 = vadd.f32 %v1815_v50, %v1747_v11  ;;  %v1748_v45 = vadd.f32 %v1716_v48, %v1647_v19  ;;  %v1118_v59 = vmul.f32 %v4286_v42, %v1082_v32  ;;  %v5754_v60 = vmax.f32 %v4365_v4, 0.0 }
 0x1e2   : > { %1050 = vst [vmem:[#allocation2 + $0x69] sm:$0xff] %v974_v26  ;;  %v972_v56 = vmul.f32 %v940_v46, %v4377_v8  ;;  %v1218_v50 = vmul.f32 %v4296_v53, %v4326_v31  ;;  %v1233_v15 = vmul.f32 %v4296_v53, %v4352_v61  ;;  %v4490_v32 = vadd.f32 %v4344_v58, %v4267_v27  ;;  %v1097_v58 = vld [vmem:[#allocation2 + $0xf0] sm:$0xff] }
 0x1e3   : > { %v4479_v62 = vadd.f32 %v1816_v41, %v1748_v45  ;;  %v922_v16 = vmin.f32 %v5754_v60, 6.0  ;;  %v888_v51 = vmax.f32 %v4472_v37, 0.0  ;;  %v1914_v4 = vmul.f32 %v4477_v7, %v4428_v55 }
 0x1e4   : > { %1048 = vst [vmem:[#allocation2 + $0x51] sm:$0xff] %v972_v56  ;;  %v1250_v28 = vadd.f32 %v1218_v50, %v1118_v59  ;;  %v4497_v8 = vmul.f32 %v4374_v34, %v4352_v61  ;;  %v4501_v31 = vmul.f32 %v4391_v47, %v4352_v61  ;;  %v1121_v21 = vmul.f32 %v4286_v42, %v1085_v35 }
 0x1e5   : > { %v1119_v54 = vmul.f32 %v4286_v42, %v1083_v39  ;;  %v4507_v18 = vmul.f32 %v4296_v53, %v4355_v63  ;;  %v954_v12 = vmul.f32 0.16666667, %v922_v16  ;;  %v1318_v55 = vmul.f32 %v4308_v14, %v1282_v38 }
 0x1e6   : > { %5755 = vst [vmem:[#allocation39_spill] sm:$0xff] %v4497_v8  ;;  %5756 = vst [vmem:[#allocation40_spill] sm:$0xff] %v4501_v31  ;;  %v1946_v3 = vadd.f32 %v1914_v4, %v1846_v24  ;;  %v1221_v52 = vmul.f32 %v4296_v53, %v4394_v17  ;;  %v4514_v61 = vmul.f32 %v4374_v34, %v4394_v17  ;;  %v1095_v31 = vld [vmem:[#allocation2 + $0xd8] sm:$0xff]  ;;  %v920_v43 = vmin.f32 %v888_v51, 6.0 }
 0x1e7   : > { %v1616_v25 = vmul.f32 %v4397_v20, %v1282_v38  ;;  %v1915_v39 = vmul.f32 %v4477_v7, %v1282_v38  ;;  %v1219_v48 = vmul.f32 %v4296_v53, %v4400_v22  ;;  %v4526_v24 = vmul.f32 %v954_v12, %v4336_v49 }
 0x1e8   : > { %v1350_v11 = vadd.f32 %v1318_v55, %v1250_v28  ;;  %v1419_v19 = vmul.f32 %v4362_v2, %v1085_v35  ;;  %v1818_v57 = vmul.f32 %v4391_v47, %v4394_v17  ;;  %v1133_v37 = vmul.f32 %v4286_v42, %v1097_v58 }
 0x1e9   : > { %v4532_v45 = vadd.f32 %v1221_v52, %v1121_v21  ;;  %v1718_v22 = vmul.f32 %v4386_v13, %v1085_v35  ;;  %v1251_v41 = vadd.f32 %v1219_v48, %v1119_v54  ;;  %v1648_v46 = vadd.f32 %v1616_v25, %v1548_v30  ;;  %1062 = vst [vmem:[#allocation2 + $0xf9] sm:$0xff] %v4526_v24  ;;  %v1086_v25 = vld [vmem:[#allocation2 + $0x68] sm:$0xff] }
 0x1ea   : > { %v4537_v59 = vmul.f32 %v4296_v53, %v974_v26  ;;  %v4540_v49 = vmul.f32 %v4374_v34, %v974_v26  ;;  %v1819_v60 = vmul.f32 %v4391_v47, %v974_v26  ;;  %v4544_v50 = vadd.f32 %v4523_v36, %v1946_v3 }
 0x1eb   : > { %v1084_v16 = vld [vmem:[#allocation2 + $0x50] sm:$0xff]  ;;  %v1947_v38 = vadd.f32 %v1915_v39, %v1847_v29  ;;  %v849_v28 = vadd.f32 3.0, %v4490_v32  ;;  %v4552_v26 = vadd.f32 %v1233_v15, %v1133_v37  ;;  %v1220_v55 = vmul.f32 %v4296_v53, %v972_v56 }
 0x1ec   : > { %v1283_v17 = vld [vmem:[#allocation2 + $0x4a] sm:$0xff]  ;;  %5757 = vst [vmem:[#allocation41_spill] sm:$0xff] %v4544_v50  ;;  %v1120_v35 = vmul.f32 %v4286_v42, %v1084_v16  ;;  %v1418_v30 = vmul.f32 %v4362_v2, %v1084_v16  ;;  %v1284_v4 = vld [vmem:[#allocation2 + $0x52] sm:$0xff]  ;;  %v1717_v12 = vmul.f32 %v4386_v13, %v1084_v16  ;;  %v1518_v29 = vmul.f32 %v4374_v34, %v972_v56 }
 0x1ed   : > { %v1319_v21 = vmul.f32 %v4308_v14, %v1283_v17  ;;  %v1617_v54 = vmul.f32 %v4397_v20, %v1283_v17  ;;  %v4557_v52 = vmul.f32 %v4362_v2, %v1097_v58  ;;  %v1817_v1 = vmul.f32 %v4391_v47, %v972_v56 }
 0x1ee   : > { %v1450_v3 = vadd.f32 %v1418_v30, %v1350_v11  ;;  %v1749_v48 = vadd.f32 %v1717_v12, %v1648_v46  ;;  %v1252_v44 = vadd.f32 %v1220_v55, %v1120_v35  ;;  %v1618_v15 = vmul.f32 %v4397_v20, %v1284_v4 }
 0x1ef   : > { %5758 = vst [vmem:[#allocation42_spill] sm:$0xff] %v4557_v52  ;;  %v1649_v39 = vadd.f32 %v1617_v54, %v4468_v40  ;;  %v881_v37 = vmax.f32 %v849_v28, 0.0  ;;  %v1351_v33 = vadd.f32 %v1319_v21, %v1251_v41  ;;  %v4563_v8 = vmul.f32 %v4386_v13, %v1097_v58 }
 0x1f0   : > { %v1550_v16 = vadd.f32 %v1518_v29, %v1450_v3  ;;  %v1849_v30 = vadd.f32 %v1817_v1, %v1749_v48  ;;  %v1719_v52 = vmul.f32 %v4386_v13, %v1086_v25  ;;  %v1320_v40 = vmul.f32 %v4308_v14, %v1284_v4 }
 0x1f1   : > { %v1750_v11 = vadd.f32 %v1718_v22, %v1649_v39  ;;  %5759 = vst [vmem:[#allocation43_spill] sm:$0xff] %v4563_v8  ;;  %v1131_v56 = vmul.f32 %v4286_v42, %v1095_v31  ;;  %v4569_v51 = vadd.f32 %v4523_v36, %v1947_v38  ;;  %v4572_v35 = vmul.f32 %v4362_v2, %v1095_v31 }
 0x1f2   : > { %v1650_v46 = vadd.f32 %v1618_v15, %v1550_v16  ;;  %v4576_v1 = vadd.f32 %v4267_v27, %v4357_v0  ;;  %v1352_v58 = vadd.f32 %v1320_v40, %v1252_v44  ;;  %v913_v41 = vmin.f32 %v881_v37, 6.0 }
 0x1f3   : > { %v1850_v54 = vadd.f32 %v1818_v57, %v1750_v11  ;;  %5760 = vst [vmem:[#allocation44_spill] sm:$0xff] %v4569_v51  ;;  %v952_v28 = vmul.f32 0.16666667, %v920_v43  ;;  %v1451_v21 = vadd.f32 %v1419_v19, %v1351_v33  ;;  %v1916_v12 = vmul.f32 %v4477_v7, %v1283_v17  ;;  %v1285_v19 = vld [vmem:[#allocation2 + $0x62] sm:$0xff] }
 0x1f4   : > { %v1751_v22 = vadd.f32 %v1719_v52, %v1650_v46  ;;  %v756_v57 = vadd.f32 %v4367_v5, %v4267_v27  ;;  %v748_v38 = vadd.f32 %v4267_v27, %v4381_v9  ;;  %v1420_v55 = vmul.f32 %v4362_v2, %v1086_v25  ;;  %v1286_v52 = vld [vmem:[#allocation2 + $0x6a] sm:$0xff] }
 0x1f5   : > { %v4587_v0 = vadd.f32 %v4507_v18, %v1131_v56  ;;  %v4591_v44 = vmul.f32 %v4374_v34, %v4355_v63  ;;  %v1948_v33 = vadd.f32 %v1916_v12, %v4479_v62  ;;  %v2017_v43 = vadd.f32 %v4569_v51, %v4544_v50  ;;  %v1297_v12 = vld [vmem:[#allocation2 + $0xf2] sm:$0xff] }
 0x1f6   : > { %v4584_v3 = vadd.f32 %v1819_v60, %v1751_v22  ;;  %v4597_v5 = vmul.f32 %v4386_v13, %v1095_v31  ;;  %v4601_v9 = vmul.f32 %v4391_v47, %v4355_v63  ;;  %v1452_v60 = vadd.f32 %v1420_v55, %v1352_v58 }
 0x1f7   : > { %5761 = vst [vmem:[#allocation45_spill] sm:$0xff] %v4591_v44  ;;  %v945_v18 = vmul.f32 0.16666667, %v913_v41  ;;  %v4604_v17 = vmul.f32 %v952_v28, %v4409_v10  ;;  %v847_v29 = vadd.f32 3.0, %v4576_v1  ;;  %v4608_v62 = vadd.f32 %v4514_v61, %v1451_v21 }
 0x1f8   : > { %5762 = vst [vmem:[#allocation46_spill] sm:$0xff] %v4597_v5  ;;  %5763 = vst [vmem:[#allocation47_spill] sm:$0xff] %v4601_v9  ;;  %v850_v39 = vadd.f32 3.0, %v756_v57  ;;  %v848_v48 = vadd.f32 3.0, %v748_v38  ;;  %v4612_v31 = vadd.f32 %v4302_v6, %v4267_v27  ;;  %v1122_v63 = vmul.f32 %v4286_v42, %v1086_v25 }
 0x1f9   : > { %v1917_v16 = vmul.f32 %v4477_v7, %v1284_v4  ;;  %v4617_v15 = vmul.f32 %v945_v18, %v4490_v32  ;;  %1060 = vst [vmem:[#allocation2 + $0xe1] sm:$0xff] %v4604_v17  ;;  %v4622_v10 = vadd.f32 %v4267_v27, %v4317_v23  ;;  %v1321_v61 = vmul.f32 %v4308_v14, %v1285_v19  ;;  %v1098_v4 = vld [vmem:[#allocation2 + $0xf8] sm:$0xff] }
 0x1fa   : > { %v879_v37 = vmax.f32 %v847_v29, 0.0  ;;  %v882_v11 = vmax.f32 %v850_v39, 0.0  ;;  %v880_v40 = vmax.f32 %v848_v48, 0.0  ;;  %v1322_v6 = vmul.f32 %v4308_v14, %v1286_v52  ;;  %v1298_v39 = vld [vmem:[#allocation2 + $0xfa] sm:$0xff] }
 0x1fb   : > { %v1949_v46 = vadd.f32 %v1917_v16, %v1849_v30  ;;  %v4627_v25 = vadd.f32 %v4523_v36, %v1948_v33  ;;  %1053 = vst [vmem:[#allocation2 + $0x91] sm:$0xff] %v4617_v15  ;;  %v4631_v32 = vadd.f32 %v4540_v49, %v1452_v60  ;;  %v1619_v23 = vmul.f32 %v4397_v20, %v1285_v19 }
 0x1fc   : > { %v911_v56 = vmin.f32 %v879_v37, 6.0  ;;  %v914_v58 = vmin.f32 %v882_v11, 6.0  ;;  %v912_v22 = vmin.f32 %v880_v40, 6.0  ;;  %v1254_v41 = vadd.f32 %v4537_v59, %v1122_v63 }
 0x1fd   : > { %5764 = vst [vmem:[#allocation48_spill] sm:$0xff] %v4627_v25  ;;  %v4636_v28 = vmul.f32 %v4397_v20, %v1286_v52  ;;  %v1918_v30 = vmul.f32 %v4477_v7, %v1285_v19  ;;  %v1234_v21 = vmul.f32 %v4296_v53, %v4526_v24  ;;  %v1134_v55 = vmul.f32 %v4286_v42, %v1098_v4 }
 0x1fe   : > { %v943_v49 = vmul.f32 0.16666667, %v911_v56  ;;  %v946_v33 = vmul.f32 0.16666667, %v914_v58  ;;  %v944_v60 = vmul.f32 0.16666667, %v912_v22  ;;  %v4643_v29 = vadd.f32 %v4523_v36, %v1949_v46 }
 0x1ff   : > { %v1950_v18 = vadd.f32 %v1918_v30, %v1850_v54  ;;  %v2018_v59 = vadd.f32 %v2017_v43, %v4627_v25  ;;  %v1232_v48 = vmul.f32 %v4296_v53, %v4604_v17  ;;  %v1919_v19 = vmul.f32 %v4477_v7, %v1286_v52 }
 0x200   : > { %5765 = vst [vmem:[#allocation49_spill] sm:$0xff] %v4643_v29  ;;  %v4649_v63 = vld [vmem:[#allocation2 + $0xe0] sm:$0xff]  ;;  %v4656_v11 = vmul.f32 %v943_v49, %v4576_v1  ;;  %v4658_v54 = vmul.f32 %v946_v33, %v756_v57  ;;  %v4660_v40 = vmul.f32 %v944_v60, %v748_v38  ;;  %v1333_v43 = vmul.f32 %v4308_v14, %v1297_v12 }
 0x201   : > { %v4651_v16 = vld [vmem:[#allocation2 + $0xda] sm:$0xff]  ;;  %v4653_v37 = vld [vmem:[#allocation2 + $0xe2] sm:$0xff]  ;;  %v1132_v46 = vmul.f32 %v4286_v42, %v4649_v63  ;;  %v1266_v58 = vadd.f32 %v1234_v21, %v1134_v55  ;;  %v1334_v22 = vmul.f32 %v4308_v14, %v1298_v39  ;;  %v1432_v1 = vmul.f32 %v4362_v2, %v1098_v4 }
 0x202   : > { %5766 = vst [vmem:[#allocation50_spill] sm:$0xff] %v4651_v16  ;;  %5767 = vst [vmem:[#allocation51_spill] sm:$0xff] %v4653_v37  ;;  %v1331_v52 = vmul.f32 %v4308_v14, %v4651_v16  ;;  %v1332_v56 = vmul.f32 %v4308_v14, %v4653_v37  ;;  %v861_v57 = vadd.f32 3.0, %v4612_v31  ;;  %v1951_v38 = vadd.f32 %v1919_v19, %v4584_v3 }
 0x203   : > { %1051 = vst [vmem:[#allocation2 + $0x79] sm:$0xff] %v4656_v11  ;;  %1054 = vst [vmem:[#allocation2 + $0x99] sm:$0xff] %v4658_v54  ;;  %v4677_v30 = vadd.f32 %v4523_v36, %v1950_v18  ;;  %v2019_v49 = vadd.f32 %v2018_v59, %v4643_v29  ;;  %v1264_v21 = vadd.f32 %v1232_v48, %v1132_v46 }
 0x204   : > { %1052 = vst [vmem:[#allocation2 + $0x81] sm:$0xff] %v4660_v40  ;;  %v1353_v55 = vadd.f32 %v1321_v61, %v4532_v45  ;;  %v1354_v33 = vadd.f32 %v1322_v6, %v1254_v41  ;;  %v1532_v60 = vmul.f32 %v4374_v34, %v4526_v24  ;;  %v1363_v25 = vadd.f32 %v1331_v52, %v4587_v0  ;;  %v5770_v61 = vld [vmem:[#allocation42_spill] sm:$0xff] }
 0x205   : > { %5768 = vst [vmem:[#allocation52_spill] sm:$0xff] %v4677_v30  ;;  %v4685_v51 = vadd.f32 %v1333_v43, %v4552_v26  ;;  %v4688_v50 = vmul.f32 %v4397_v20, %v1297_v12  ;;  %v4692_v3 = vmul.f32 %v4391_v47, %v4526_v24  ;;  %v1364_v18 = vadd.f32 %v1332_v56, %v1264_v21  ;;  %v5774_v43 = vld [vmem:[#allocation39_spill] sm:$0xff] }
 0x206   : > { %v4694_v59 = vadd.f32 %v1334_v22, %v1266_v58  ;;  %v4697_v45 = vmul.f32 %v4397_v20, %v1298_v39  ;;  %v1463_v6 = vadd.f32 %v5770_v61, %v1363_v25  ;;  %v893_v41 = vmax.f32 %v861_v57, 0.0 }
 0x207   : > { %5769 = vst [vmem:[#allocation53_spill] sm:$0xff] %v4692_v3  ;;  %v2020_v0 = vadd.f32 %v2019_v49, %v4677_v30  ;;  %v1464_v26 = vadd.f32 %v1432_v1, %v1364_v18  ;;  %v4702_v48 = vadd.f32 %v4523_v36, %v1951_v38  ;;  %v859_v12 = vadd.f32 3.0, %v4622_v10 }
 0x208   : > { %v4706_v24 = vmul.f32 %v4386_v13, %v1098_v4  ;;  %v4710_v19 = vmul.f32 %v4374_v34, %v4604_v17  ;;  %v1651_v39 = vadd.f32 %v1619_v23, %v4608_v62  ;;  %v4714_v25 = vadd.f32 %v5774_v43, %v1463_v6  ;;  %v5776_v4 = vld [vmem:[#allocation22_spill] sm:$0xff] }
 0x209   : > { %5771 = vst [vmem:[#allocation42_spill] sm:$0xff] %v4702_v48  ;;  %v4718_v46 = vmul.f32 %v4296_v53, %v4617_v15  ;;  %v4722_v52 = vmul.f32 %v4391_v47, %v4604_v17  ;;  %v4726_v58 = vadd.f32 %v5776_v4, %v4267_v27  ;;  %v4728_v22 = vadd.f32 %v1532_v60, %v1464_v26  ;;  %v1089_v60 = vld [vmem:[#allocation2 + $0x90] sm:$0xff] }
 0x20a   : > { %5772 = vst [vmem:[#allocation54_spill] sm:$0xff] %v4706_v24  ;;  %5773 = vst [vmem:[#allocation55_spill] sm:$0xff] %v4710_v19  ;;  %v1087_v56 = vld [vmem:[#allocation2 + $0x78] sm:$0xff]  ;;  %v4732_v62 = vmul.f32 %v4374_v34, %v4617_v15  ;;  %v925_v57 = vmin.f32 %v893_v41, 6.0  ;;  %v1822_v17 = vmul.f32 %v4391_v47, %v4617_v15  ;;  %v1652_v38 = vadd.f32 %v4636_v28, %v4631_v32 }
 0x20b   : > { %5775 = vst [vmem:[#allocation39_spill] sm:$0xff] %v4722_v52  ;;  %v1421_v23 = vmul.f32 %v4362_v2, %v1087_v56  ;;  %v1720_v1 = vmul.f32 %v4386_v13, %v1087_v56  ;;  %v4741_v49 = vadd.f32 %v2020_v0, %v4702_v48  ;;  %v891_v21 = vmax.f32 %v859_v12, 0.0  ;;  %v1088_v41 = vld [vmem:[#allocation2 + $0x80] sm:$0xff]  ;;  %v5777_v32 = vld [vmem:[#allocation23_spill] sm:$0xff] }
 0x20c   : > { %v1521_v61 = vmul.f32 %v4374_v34, %v4656_v11  ;;  %v1820_v26 = vmul.f32 %v4391_v47, %v4656_v11  ;;  %v1123_v43 = vmul.f32 %v4286_v42, %v1087_v56  ;;  %v1287_v15 = vld [vmem:[#allocation2 + $0x7a] sm:$0xff]  ;;  %v862_v4 = vadd.f32 3.0, %v4726_v58  ;;  %v4765_v29 = vld [vmem:[#allocation2 + $0x82] sm:$0xff] }
 0x20d   : > { %v1453_v18 = vadd.f32 %v1421_v23, %v1353_v55  ;;  %v1752_v6 = vadd.f32 %v1720_v1, %v1651_v39  ;;  %v4751_v28 = vadd.f32 %v4267_v27, %v5777_v32  ;;  %v5778_v0 = vld [vmem:[#allocation31_spill] sm:$0xff]  ;;  %v4759_v12 = vmul.f32 %v4362_v2, %v4649_v63 }
 0x20e   : > { %v4755_v55 = vadd.f32 %v5778_v0, %v4267_v27  ;;  %v957_v1 = vmul.f32 0.16666667, %v925_v57  ;;  %v1722_v56 = vmul.f32 %v4386_v13, %v1089_v60  ;;  %v1223_v48 = vmul.f32 %v4296_v53, %v4656_v11 }
 0x20f   : > { %5779 = vst [vmem:[#allocation22_spill] sm:$0xff] %v4759_v12  ;;  %v1553_v39 = vadd.f32 %v1521_v61, %v1453_v18  ;;  %v1852_v23 = vadd.f32 %v1820_v26, %v1752_v6  ;;  %v1422_v30 = vmul.f32 %v4362_v2, %v1088_v41  ;;  %v923_v32 = vmin.f32 %v891_v21, 6.0  ;;  %v1090_v26 = vld [vmem:[#allocation2 + $0x98] sm:$0xff] }
 0x210   : > { %v1522_v0 = vmul.f32 %v4374_v34, %v4660_v40  ;;  %v1621_v52 = vmul.f32 %v4397_v20, %v1287_v15  ;;  %v1721_v9 = vmul.f32 %v4386_v13, %v1088_v41  ;;  %v1821_v57 = vmul.f32 %v4391_v47, %v4660_v40 }
 0x211   : > { %v1255_v18 = vadd.f32 %v1223_v48, %v1123_v43  ;;  %v1454_v61 = vadd.f32 %v1422_v30, %v1354_v33  ;;  %v894_v6 = vmax.f32 %v862_v4, 0.0  ;;  %v860_v11 = vadd.f32 3.0, %v4751_v28 }
 0x212   : > { %v1323_v21 = vmul.f32 %v4308_v14, %v1287_v15  ;;  %v1653_v3 = vadd.f32 %v1621_v52, %v1553_v39  ;;  %v1753_v5 = vadd.f32 %v1721_v9, %v1652_v38  ;;  %v4776_v24 = vmul.f32 %v957_v1, %v4612_v31 }
 0x213   : > { %v1124_v8 = vmul.f32 %v4286_v42, %v1088_v41  ;;  %v1554_v19 = vadd.f32 %v1522_v0, %v1454_v61  ;;  %v1622_v44 = vmul.f32 %v4397_v20, %v4765_v29  ;;  %v955_v12 = vmul.f32 0.16666667, %v923_v32 }
 0x214   : > { %v1125_v30 = vmul.f32 %v4286_v42, %v1089_v60  ;;  %v4784_v33 = vmul.f32 %v4397_v20, %v4651_v16  ;;  %v1754_v48 = vadd.f32 %v1722_v56, %v1653_v3  ;;  %v1853_v43 = vadd.f32 %v1821_v57, %v1753_v5  ;;  %1065 = vst [vmem:[#allocation2 + $0x121] sm:$0xff] %v4776_v24 }
 0x215   : > { %v1723_v9 = vmul.f32 %v4386_v13, %v1090_v26  ;;  %v1823_v31 = vmul.f32 %v4391_v47, %v4658_v54  ;;  %v1224_v52 = vmul.f32 %v4296_v53, %v4660_v40  ;;  %v1654_v38 = vadd.f32 %v1622_v44, %v1554_v19  ;;  %v5780_v40 = vld [vmem:[#allocation33_spill] sm:$0xff] }
 0x216   : > { %v1355_v41 = vadd.f32 %v1323_v21, %v1255_v18  ;;  %v4792_v4 = vadd.f32 %v1822_v17, %v1754_v48  ;;  %v987_v39 = vmul.f32 %v955_v12, %v4622_v10  ;;  %v853_v1 = vadd.f32 3.0, %v4755_v55  ;;  %v1289_v10 = vld [vmem:[#allocation2 + $0x92] sm:$0xff] }
 0x217   : > { %v1256_v3 = vadd.f32 %v1224_v52, %v1124_v8  ;;  %v1755_v5 = vadd.f32 %v1723_v9, %v1654_v38  ;;  %v926_v56 = vmin.f32 %v894_v6, 6.0  ;;  %v892_v32 = vmax.f32 %v860_v11, 0.0  ;;  %v4815_v6 = vld [vmem:[#allocation2 + $0x9a] sm:$0xff] }
 0x218   : > { %v1423_v0 = vmul.f32 %v4362_v2, %v1089_v60  ;;  %v4799_v57 = vmul.f32 %v4397_v20, %v4653_v37  ;;  %v1324_v44 = vmul.f32 %v4308_v14, %v4765_v29  ;;  %1063 = vst [vmem:[#allocation2 + $0x109] sm:$0xff] %v987_v39  ;;  %v4805_v19 = vadd.f32 %v4267_v27, %v5780_v40 }
 0x219   : > { %v4807_v17 = vadd.f32 %v1823_v31, %v1755_v5  ;;  %v1920_v8 = vmul.f32 %v4477_v7, %v1287_v15  ;;  %v958_v12 = vmul.f32 0.16666667, %v926_v56  ;;  %v924_v18 = vmin.f32 %v892_v32, 6.0 }
 0x21a   : > { %v1257_v60 = vadd.f32 %v4718_v46, %v1125_v30  ;;  %v4813_v61 = vmul.f32 %v4386_v13, %v4649_v63  ;;  %v1455_v11 = vadd.f32 %v1423_v0, %v1355_v41  ;;  %v885_v21 = vmax.f32 %v853_v1, 0.0 }
 0x21b   : > { %v1356_v48 = vadd.f32 %v1324_v44, %v1256_v3  ;;  %v1952_v9 = vadd.f32 %v1920_v8, %v1852_v23  ;;  %v4818_v52 = vmul.f32 %v958_v12, %v4726_v58  ;;  %v956_v31 = vmul.f32 0.16666667, %v924_v18 }
 0x21c   : > { %v1126_v15 = vmul.f32 %v4286_v42, %v1090_v26  ;;  %v1226_v38 = vmul.f32 %v4296_v53, %v4658_v54  ;;  %v1325_v46 = vmul.f32 %v4308_v14, %v1289_v10  ;;  %v1524_v63 = vmul.f32 %v4374_v34, %v4658_v54 }
 0x21d   : > { %v4828_v30 = vmul.f32 %v4308_v14, %v4815_v6  ;;  %v1424_v23 = vmul.f32 %v4362_v2, %v1090_v26  ;;  %1066 = vst [vmem:[#allocation2 + $0x129] sm:$0xff] %v4818_v52  ;;  %v988_v58 = vmul.f32 %v956_v31, %v4751_v28  ;;  %v851_v41 = vadd.f32 3.0, %v4805_v19 }
 0x21e   : > { %v4835_v1 = vmul.f32 %v4397_v20, %v1289_v10  ;;  %v1663_v3 = vadd.f32 %v4688_v50, %v4714_v25  ;;  %v917_v5 = vmin.f32 %v885_v21, 6.0  ;;  %v4840_v54 = vadd.f32 %v4732_v62, %v1455_v11 }
 0x21f   : > { %v1456_v56 = vadd.f32 %v1424_v23, %v1356_v48  ;;  %v1921_v26 = vmul.f32 %v4477_v7, %v4765_v29  ;;  %v4845_v32 = vadd.f32 %v4523_v36, %v1952_v9  ;;  %v1099_v28 = vld [vmem:[#allocation2 + $0x108] sm:$0xff]  ;;  %v1533_v0 = vmul.f32 %v4374_v34, %v987_v39  ;;  %1064 = vst [vmem:[#allocation2 + $0x111] sm:$0xff] %v988_v58  ;;  %v5782_v48 = vld [vmem:[#allocation35_spill] sm:$0xff] }
 0x220   : > { %v1433_v44 = vmul.f32 %v4362_v2, %v1099_v28  ;;  %v1732_v40 = vmul.f32 %v4386_v13, %v1099_v28  ;;  %v1832_v50 = vmul.f32 %v4391_v47, %v987_v39  ;;  %v949_v25 = vmul.f32 0.16666667, %v917_v5 }
 0x221   : > { %5781 = vst [vmem:[#allocation23_spill] sm:$0xff] %v4845_v32  ;;  %v4851_v62 = vadd.f32 %v1226_v38, %v1126_v15  ;;  %v4853_v8 = vadd.f32 %v1325_v46, %v1257_v60  ;;  %v1953_v12 = vadd.f32 %v1921_v26, %v1853_v43  ;;  %v883_v29 = vmax.f32 %v851_v41, 0.0  ;;  %v1101_v46 = vld [vmem:[#allocation2 + $0x120] sm:$0xff] }
 0x222   : > { %v1465_v18 = vadd.f32 %v1433_v44, %v4685_v51  ;;  %v1764_v11 = vadd.f32 %v1732_v40, %v1663_v3  ;;  %v4857_v21 = vmul.f32 %v949_v25, %v4755_v55  ;;  %v4861_v9 = vadd.f32 %v5782_v48, %v4267_v27  ;;  %v4894_v40 = vld [vmem:[%s5661_s2] ss:$0 sm:$0xff] }
 0x223   : > { %v1922_v31 = vmul.f32 %v4477_v7, %v1289_v10  ;;  %v1135_v23 = vmul.f32 %v4286_v42, %v1099_v28  ;;  %v1235_v15 = vmul.f32 %v4296_v53, %v987_v39  ;;  %v4866_v60 = vadd.f32 %v1524_v63, %v1456_v56 }
 0x224   : > { %v2022_v43 = vadd.f32 %v4741_v49, %v4845_v32  ;;  %v1834_v51 = vmul.f32 %v4391_v47, %v4776_v24  ;;  %v1565_v55 = vadd.f32 %v1533_v0, %v1465_v18  ;;  %v4872_v38 = vadd.f32 %v1832_v50, %v1764_v11  ;;  %1057 = vst [vmem:[#allocation2 + $0xc1] sm:$0xff] %v4857_v21  ;;  %v5787_v50 = vld [vmem:[#allocation36_spill] sm:$0xff] }
 0x225   : > { %v1954_v27 = vadd.f32 %v1922_v31, %v4792_v4  ;;  %v4877_v10 = vadd.f32 %v4523_v36, %v1953_v12  ;;  %v1236_v39 = vmul.f32 %v4296_v53, %v988_v58  ;;  %v915_v63 = vmin.f32 %v883_v29, 6.0 }
 0x226   : > { %5783 = vst [vmem:[#allocation31_spill] sm:$0xff] %v4872_v38  ;;  %v1435_v41 = vmul.f32 %v4362_v2, %v1101_v46  ;;  %v1734_v49 = vmul.f32 %v4386_v13, %v1101_v46  ;;  %v1100_v3 = vld [vmem:[#allocation2 + $0x110] sm:$0xff]  ;;  %v1664_v26 = vadd.f32 %v4697_v45, %v4728_v22  ;;  %v854_v4 = vadd.f32 3.0, %v4861_v9 }
 0x227   : > { %5784 = vst [vmem:[#allocation33_spill] sm:$0xff] %v4877_v10  ;;  %v4882_v5 = vld [vmem:[#allocation2 + $0x10a] sm:$0xff]  ;;  %v4884_v56 = vld [vmem:[#allocation2 + $0x112] sm:$0xff]  ;;  %v1267_v28 = vadd.f32 %v1235_v15, %v1135_v23  ;;  %v1136_v0 = vmul.f32 %v4286_v42, %v1100_v3  ;;  %v1534_v44 = vmul.f32 %v4374_v34, %v988_v58  ;;  %v764_v25 = vadd.f32 %v4894_v40, %v5787_v50 }
 0x228   : > { %5785 = vst [vmem:[#allocation35_spill] sm:$0xff] %v4882_v5  ;;  %5786 = vst [vmem:[#allocation56_spill] sm:$0xff] %v4884_v56  ;;  %v1335_v12 = vmul.f32 %v4308_v14, %v4882_v5  ;;  %v1336_v45 = vmul.f32 %v4308_v14, %v4884_v56  ;;  %v1434_v22 = vmul.f32 %v4362_v2, %v1100_v3  ;;  %v947_v31 = vmul.f32 0.16666667, %v915_v63  ;;  %v4907_v23 = vld [vmem:[#allocation2 + $0x128] sm:$0xff] }
 0x229   : > { %v1633_v29 = vmul.f32 %v4397_v20, %v4882_v5  ;;  %v1268_v18 = vadd.f32 %v1236_v39, %v1136_v0  ;;  %v1733_v11 = vmul.f32 %v4386_v13, %v1100_v3  ;;  %v1833_v48 = vmul.f32 %v4391_v47, %v988_v58 }
 0x22a   : > { %v1466_v15 = vadd.f32 %v1434_v22, %v4694_v59  ;;  %v1634_v50 = vmul.f32 %v4397_v20, %v4884_v56  ;;  %v886_v38 = vmax.f32 %v854_v4, 0.0  ;;  %v1436_v37 = vmul.f32 %v4362_v2, %v4907_v23 }
 0x22b   : > { %v1665_v32 = vadd.f32 %v1633_v29, %v1565_v55  ;;  %v1367_v16 = vadd.f32 %v1335_v12, %v1267_v28  ;;  %v1765_v5 = vadd.f32 %v1733_v11, %v1664_v26  ;;  %v852_v39 = vadd.f32 3.0, %v764_v25 }
 0x22c   : > { %v1735_v3 = vmul.f32 %v4386_v13, %v4907_v23  ;;  %v1368_v58 = vadd.f32 %v1336_v45, %v1268_v18  ;;  %v1566_v63 = vadd.f32 %v1534_v44, %v1466_v15  ;;  %v1624_v59 = vmul.f32 %v4397_v20, %v4815_v6  ;;  %v5794_v15 = vld [vmem:[#allocation27_spill] sm:$0xff] }
 0x22d   : > { %v1766_v0 = vadd.f32 %v1734_v49, %v1665_v32  ;;  %v1923_v22 = vmul.f32 %v4477_v7, %v4815_v6  ;;  %v4921_v55 = vadd.f32 %v4523_v36, %v1954_v27  ;;  %v4923_v4 = vadd.f32 %v1833_v48, %v1765_v5 }
 0x22e   : > { %v2023_v26 = vadd.f32 %v2022_v43, %v4877_v10  ;;  %v1835_v28 = vmul.f32 %v4391_v47, %v4818_v52  ;;  %v1666_v12 = vadd.f32 %v1634_v50, %v1566_v63  ;;  %v1535_v32 = vmul.f32 %v4374_v34, %v4776_v24 }
 0x22f   : > { %5788 = vst [vmem:[#allocation36_spill] sm:$0xff] %v4921_v55  ;;  %5789 = vst [vmem:[#allocation57_spill] sm:$0xff] %v4923_v4  ;;  %v4928_v45 = vadd.f32 %v1834_v51, %v1766_v0  ;;  %v1467_v49 = vadd.f32 %v1435_v41, %v1367_v16  ;;  %v979_v44 = vmul.f32 %v947_v31, %v4805_v19  ;;  %v918_v6 = vmin.f32 %v886_v38, 6.0  ;;  %v1093_v19 = vld [vmem:[#allocation2 + $0xc0] sm:$0xff] }
 0x230   : > { %v1536_v27 = vmul.f32 %v4374_v34, %v4818_v52  ;;  %v1468_v5 = vadd.f32 %v1436_v37, %v1368_v58  ;;  %v1767_v29 = vadd.f32 %v1735_v3, %v1666_v12  ;;  %v884_v18 = vmax.f32 %v852_v39, 0.0  ;;  %v5792_v31 = vld [vmem:[#allocation24_spill] sm:$0xff] }
 0x231   : > { %5790 = vst [vmem:[#allocation58_spill] sm:$0xff] %v4928_v45  ;;  %v4937_v43 = vadd.f32 %v4828_v30, %v4851_v62  ;;  %v4940_v51 = vadd.f32 %v1923_v22, %v4807_v17  ;;  %v1137_v11 = vmul.f32 %v4286_v42, %v1101_v46  ;;  %v1237_v16 = vmul.f32 %v4296_v53, %v4776_v24  ;;  %v5793_v62 = vld [vmem:[#allocation25_spill] sm:$0xff] }
 0x232   : > { %1055 = vst [vmem:[#allocation2 + $0xa9] sm:$0xff] %v979_v44  ;;  %v4946_v38 = vadd.f32 %v2023_v26, %v4921_v55  ;;  %v4948_v37 = vadd.f32 %v1835_v28, %v1767_v29  ;;  %v950_v41 = vmul.f32 0.16666667, %v918_v6  ;;  %v916_v48 = vmin.f32 %v884_v18, 6.0  ;;  %v5796_v29 = vld [vmem:[#allocation29_spill] sm:$0xff] }
 0x233   : > { %v817_v30 = vadd.f32 %v4894_v40, %v5792_v31  ;;  %v4954_v17 = vadd.f32 %v4894_v40, %v5793_v62  ;;  %v4956_v46 = vadd.f32 %v1535_v32, %v1467_v49  ;;  %v4960_v24 = vadd.f32 %v4894_v40, %v5794_v15 }
 0x234   : > { %5791 = vst [vmem:[#allocation59_spill] sm:$0xff] %v4948_v37  ;;  %v1129_v50 = vmul.f32 %v4286_v42, %v1093_v19  ;;  %v982_v39 = vmul.f32 %v950_v41, %v4861_v9  ;;  %v948_v3 = vmul.f32 0.16666667, %v916_v48  ;;  %v4964_v58 = vadd.f32 %v1536_v27, %v1468_v5 }
 0x235   : > { %v4966_v63 = vadd.f32 %v1237_v16, %v1137_v11  ;;  %v4970_v0 = vmul.f32 %v4296_v53, %v4818_v52  ;;  %v1655_v22 = vadd.f32 %v4835_v1, %v4840_v54  ;;  %v865_v26 = vadd.f32 3.0, %v817_v30 }
 0x236   : > { %5795 = vst [vmem:[#allocation24_spill] sm:$0xff] %v4964_v58  ;;  %v1229_v28 = vmul.f32 %v4296_v53, %v4857_v21  ;;  %1058 = vst [vmem:[#allocation2 + $0xc9] sm:$0xff] %v982_v39  ;;  %v980_v12 = vmul.f32 %v948_v3, %v764_v25  ;;  %v863_v9 = vadd.f32 3.0, %v4954_v17  ;;  %v866_v32 = vadd.f32 3.0, %v4960_v24  ;;  %v5800_v58 = vld [vmem:[#allocation45_spill] sm:$0xff] }
 0x237   : > { %v4979_v49 = vmul.f32 %v4362_v2, %v1093_v19  ;;  %v4983_v52 = vmul.f32 %v4374_v34, %v4857_v21  ;;  %v4987_v1 = vmul.f32 %v4391_v47, %v4857_v21  ;;  %v897_v54 = vmax.f32 %v865_v26, 0.0 }
 0x238   : > { %v1261_v6 = vadd.f32 %v1229_v28, %v1129_v50  ;;  %v4990_v27 = vmul.f32 %v4386_v13, %v1093_v19  ;;  %1056 = vst [vmem:[#allocation2 + $0xb1] sm:$0xff] %v980_v12  ;;  %v1656_v5 = vadd.f32 %v1624_v59, %v4866_v60  ;;  %v4995_v18 = vadd.f32 %v4894_v40, %v5796_v29 }
 0x239   : > { %v1091_v25 = vld [vmem:[#allocation2 + $0xa8] sm:$0xff]  ;;  %v1227_v11 = vmul.f32 %v4296_v53, %v979_v44  ;;  %v929_v41 = vmin.f32 %v897_v54, 6.0  ;;  %v1525_v48 = vmul.f32 %v4374_v34, %v979_v44  ;;  %v1824_v19 = vmul.f32 %v4391_v47, %v979_v44 }
 0x23a   : > { %5797 = vst [vmem:[#allocation25_spill] sm:$0xff] %v4995_v18  ;;  %v1425_v16 = vmul.f32 %v4362_v2, %v1091_v25  ;;  %v1724_v21 = vmul.f32 %v4386_v13, %v1091_v25  ;;  %v895_v31 = vmax.f32 %v863_v9, 0.0  ;;  %v898_v62 = vmax.f32 %v866_v32, 0.0 }
 0x23b   : > { %v1127_v15 = vmul.f32 %v4286_v42, %v1091_v25  ;;  %v961_v50 = vmul.f32 0.16666667, %v929_v41  ;;  %v1230_v3 = vmul.f32 %v4296_v53, %v982_v39  ;;  %v1528_v26 = vmul.f32 %v4374_v34, %v982_v39 }
 0x23c   : > { %v1457_v60 = vadd.f32 %v1425_v16, %v4853_v8  ;;  %v1756_v59 = vadd.f32 %v1724_v21, %v1655_v22  ;;  %v5007_v28 = vmul.f32 %v4391_v47, %v982_v39  ;;  %v5010_v54 = vadd.f32 3.0, %v4995_v18 }
 0x23d   : > { %v1094_v9 = vld [vmem:[#allocation2 + $0xc8] sm:$0xff]  ;;  %v1228_v8 = vmul.f32 %v4296_v53, %v980_v12  ;;  %v5019_v22 = vmul.f32 %v961_v50, %v817_v30  ;;  %v1526_v21 = vmul.f32 %v4374_v34, %v980_v12  ;;  %v1825_v41 = vmul.f32 %v4391_v47, %v980_v12  ;;  %v5799_v53 = vld [vmem:[#allocation22_spill] sm:$0xff] }
 0x23e   : > { %v1557_v29 = vadd.f32 %v1525_v48, %v1457_v60  ;;  %v5012_v44 = vadd.f32 %v1824_v19, %v1756_v59  ;;  %v5014_v32 = vld [vmem:[#allocation2 + $0xc2] sm:$0xff]  ;;  %v5016_v25 = vld [vmem:[#allocation2 + $0xca] sm:$0xff]  ;;  %v1130_v16 = vmul.f32 %v4286_v42, %v1094_v9  ;;  %v1259_v48 = vadd.f32 %v1227_v11, %v1127_v15 }
 0x23f   : > { %5798 = vst [vmem:[#allocation27_spill] sm:$0xff] %v5019_v22  ;;  %v1329_v39 = vmul.f32 %v4308_v14, %v5014_v32  ;;  %v1330_v19 = vmul.f32 %v4308_v14, %v5016_v25  ;;  %v1092_v60 = vld [vmem:[#allocation2 + $0xb0] sm:$0xff]  ;;  %1069 = vst [vmem:[#allocation2 + $0x151] sm:$0xff] %v5019_v22  ;;  %v927_v30 = vmin.f32 %v895_v31, 6.0  ;;  %v930_v50 = vmin.f32 %v898_v62, 6.0 }
 0x240   : > { %v1291_v59 = vld [vmem:[#allocation2 + $0xaa] sm:$0xff]  ;;  %v5028_v55 = vld [vmem:[#allocation2 + $0xb2] sm:$0xff]  ;;  %v1262_v10 = vadd.f32 %v1230_v3, %v1130_v16  ;;  %v1428_v45 = vmul.f32 %v4362_v2, %v1094_v9  ;;  %v1128_v4 = vmul.f32 %v4286_v42, %v1092_v60  ;;  %v1627_v12 = vmul.f32 %v4397_v20, %v5014_v32 }
 0x241   : > { %v1361_v37 = vadd.f32 %v1329_v39, %v1261_v6  ;;  %v1327_v11 = vmul.f32 %v4308_v14, %v1291_v59  ;;  %v1426_v15 = vmul.f32 %v4362_v2, %v1092_v60  ;;  %v1625_v56 = vmul.f32 %v4397_v20, %v1291_v59 }
 0x242   : > { %v1362_v47 = vadd.f32 %v1330_v19, %v1262_v10  ;;  %v1260_v31 = vadd.f32 %v1228_v8, %v1128_v4  ;;  %v1328_v6 = vmul.f32 %v4308_v14, %v5028_v55  ;;  %v1725_v39 = vmul.f32 %v4386_v13, %v1092_v60  ;;  %v5054_v60 = vld [vmem:[#allocation2 + $0x122] sm:$0xff] }
 0x243   : > { %v1461_v34 = vadd.f32 %v4572_v35, %v1361_v37  ;;  %v1359_v62 = vadd.f32 %v1327_v11, %v1259_v48  ;;  %v1458_v3 = vadd.f32 %v1426_v15, %v4937_v43  ;;  %v1657_v16 = vadd.f32 %v1625_v56, %v1557_v29  ;;  %v5801_v48 = vld [vmem:[#allocation55_spill] sm:$0xff]  ;;  %5802 = vst [vmem:[#allocation29_spill] sm:$0xff] %v5054_v60  ;;  %v5807_v15 = vld [vmem:[#allocation40_spill] sm:$0xff] }
 0x244   : > { %v1462_v22 = vadd.f32 %v5799_v53, %v1362_v47  ;;  %v1360_v2 = vadd.f32 %v1328_v6, %v1260_v31  ;;  %v1626_v10 = vmul.f32 %v4397_v20, %v5028_v55  ;;  %v1757_v37 = vadd.f32 %v1725_v39, %v1656_v5 }
 0x245   : > { %v1561_v18 = vadd.f32 %v5800_v58, %v1461_v34  ;;  %v1459_v35 = vadd.f32 %v4979_v49, %v1359_v62  ;;  %v1558_v4 = vadd.f32 %v1526_v21, %v1458_v3  ;;  %v1758_v8 = vadd.f32 %v4990_v27, %v1657_v16  ;;  %v5056_v49 = vld [vmem:[#allocation2 + $0x12a] sm:$0xff] }
 0x246   : > { %v1562_v19 = vadd.f32 %v5801_v48, %v1462_v22  ;;  %v1727_v43 = vmul.f32 %v4386_v13, %v1094_v9  ;;  %v1460_v29 = vadd.f32 %v1428_v45, %v1360_v2  ;;  %v1857_v47 = vadd.f32 %v1825_v41, %v1757_v37  ;;  %5803 = vst [vmem:[#allocation22_spill] sm:$0xff] %v5056_v49  ;;  %v5804_v22 = vld [vmem:[#allocation43_spill] sm:$0xff]  ;;  %v5806_v41 = vld [vmem:[#allocation54_spill] sm:$0xff]  ;;  %v5809_v3 = vld [vmem:[#allocation53_spill] sm:$0xff] }
 0x247   : > { %v1661_v56 = vadd.f32 %v4784_v33, %v1561_v18  ;;  %v1559_v53 = vadd.f32 %v4983_v52, %v1459_v35  ;;  %v1658_v34 = vadd.f32 %v1626_v10, %v1558_v4  ;;  %v1858_v58 = vadd.f32 %v4987_v1, %v1758_v8  ;;  %v5805_v52 = vld [vmem:[#allocation32_spill] sm:$0xff]  ;;  %v5811_v35 = vld [vmem:[#allocation47_spill] sm:$0xff] }
 0x248   : > { %v1628_v27 = vmul.f32 %v4397_v20, %v5016_v25  ;;  %v1662_v5 = vadd.f32 %v4799_v57, %v1562_v19  ;;  %v1560_v18 = vadd.f32 %v1528_v26, %v1460_v29  ;;  %v896_v45 = vmax.f32 %v5010_v54, 0.0  ;;  %v5808_v54 = vld [vmem:[#allocation46_spill] sm:$0xff]  ;;  %v5812_v19 = vld [vmem:[#allocation39_spill] sm:$0xff] }
 0x249   : > { %v1762_v33 = vadd.f32 %v5804_v22, %v1661_v56  ;;  %v1659_v9 = vadd.f32 %v1627_v12, %v1559_v53  ;;  %v1759_v2 = vadd.f32 %v1727_v43, %v1658_v34  ;;  %v5065_v21 = vadd.f32 %v4894_v40, %v5805_v52  ;;  %v5814_v53 = vld [vmem:[#allocation50_spill] sm:$0xff] }
 0x24a   : > { %v1138_v1 = vmul.f32 %v4286_v42, %v4907_v23  ;;  %v1763_v11 = vadd.f32 %v5806_v41, %v1662_v5  ;;  %v1660_v57 = vadd.f32 %v1628_v27, %v1560_v18  ;;  %v1337_v26 = vmul.f32 %v4308_v14, %v5054_v60  ;;  %v1105_v5 = vld [vmem:[#allocation2 + $0x150] sm:$0xff]  ;;  %v5820_v41 = vld [vmem:[#allocation27_spill] sm:$0xff] }
 0x24b   : > { %v5071_v31 = vadd.f32 %v5807_v15, %v1762_v33  ;;  %v1338_v12 = vmul.f32 %v4308_v14, %v5056_v49  ;;  %v1760_v6 = vadd.f32 %v5808_v54, %v1659_v9  ;;  %v1859_v62 = vadd.f32 %v5007_v28, %v1759_v2  ;;  %v5816_v9 = vld [vmem:[#allocation51_spill] sm:$0xff] }
 0x24c   : > { %v5080_v16 = vadd.f32 %v5809_v3, %v1763_v11  ;;  %v1761_v23 = vadd.f32 %v4813_v61, %v1660_v57  ;;  %v1924_v39 = vmul.f32 %v4477_v7, %v1291_v59  ;;  %v959_v10 = vmul.f32 0.16666667, %v927_v30  ;;  %v5821_v11 = vld [vmem:[#allocation21_spill] sm:$0xff]  ;;  %v5139_v54 = vld [vmem:[#allocation8 + $0x8] ss:$0 sm:$0xff] }
 0x24d   : > { %v5085_v4 = vadd.f32 %v5811_v35, %v1760_v6  ;;  %v962_v37 = vmul.f32 0.16666667, %v930_v50  ;;  %v928_v8 = vmin.f32 %v896_v45, 6.0  ;;  %v869_v48 = vadd.f32 3.0, %v5065_v21  ;;  %v5818_v45 = vld [vmem:[#allocation25_spill] sm:$0xff] }
 0x24e   : > { %5810 = vst [vmem:[#allocation45_spill] sm:$0xff] %v5080_v16  ;;  %v5089_v56 = vadd.f32 %v5812_v19, %v1761_v23  ;;  %v1925_v28 = vmul.f32 %v4477_v7, %v5028_v55  ;;  %v1956_v43 = vadd.f32 %v1924_v39, %v5012_v44  ;;  %v5096_v61 = vadd.f32 %v4523_v36, %v4940_v51  ;;  %v5815_v51 = vld [vmem:[#allocation34_spill] sm:$0xff]  ;;  %v5822_v23 = vld [vmem:[#allocation37_spill] sm:$0xff] }
 0x24f   : > { %v1270_v59 = vadd.f32 %v4970_v0, %v1138_v1  ;;  %v1635_v30 = vmul.f32 %v4397_v20, %v5054_v60  ;;  %v1636_v50 = vmul.f32 %v4397_v20, %v5056_v49  ;;  %v1926_v29 = vmul.f32 %v4477_v7, %v5014_v32  ;;  %v5819_v1 = vld [vmem:[#allocation24_spill] sm:$0xff] }
 0x250   : > { %5813 = vst [vmem:[#allocation55_spill] sm:$0xff] %v5096_v61  ;;  %v5107_v55 = vmul.f32 %v4477_v7, %v5814_v53  ;;  %v1957_v44 = vadd.f32 %v1925_v28, %v1857_v47  ;;  %v991_v34 = vmul.f32 %v959_v10, %v4954_v17  ;;  %v5112_v27 = vadd.f32 %v4894_v40, %v5815_v51 }
 0x251   : > { %v1958_v0 = vadd.f32 %v1926_v29, %v1858_v58  ;;  %v5115_v22 = vmul.f32 %v962_v37, %v4960_v24  ;;  %v960_v33 = vmul.f32 0.16666667, %v928_v8  ;;  %v901_v18 = vmax.f32 %v869_v48, 0.0  ;;  %v2058_v8 = vld [vmem:[#allocation9 + $0x10] sm:$0xff]  ;;  %v2059_v48 = vld [vmem:[#allocation9 + $0x18] sm:$0xff]  ;;  %v5825_v29 = vld [vmem:[#allocation28_spill] sm:$0xff] }
 0x252   : > { %v5119_v32 = vmul.f32 %v4477_v7, %v5816_v9  ;;  %v1369_v2 = vadd.f32 %v1337_v26, %v4966_v63  ;;  %v5123_v47 = vadd.f32 %v4523_v36, %v1956_v43  ;;  %v2025_v17 = vadd.f32 %v4946_v38, %v5096_v61  ;;  %1067 = vst [vmem:[#allocation2 + $0x139] sm:$0xff] %v991_v34  ;;  %v2056_v26 = vld [vmem:[#allocation9] sm:$0xff]  ;;  %v5824_v43 = vld [vmem:[#allocation38_spill] sm:$0xff] }
 0x253   : > { %v5127_v58 = vadd.f32 %v1338_v12, %v1270_v59  ;;  %v1667_v24 = vadd.f32 %v1635_v30, %v4956_v46  ;;  %1070 = vst [vmem:[#allocation2 + $0x159] sm:$0xff] %v5115_v22  ;;  %v992_v52 = vmul.f32 %v960_v33, %v5818_v45  ;;  %v5133_v7 = vadd.f32 %v1636_v50, %v5819_v1  ;;  %v2057_v12 = vld [vmem:[#allocation9 + $0x8] sm:$0xff]  ;;  %v5203_v61 = vld [vmem:[#allocation9 + $0x40] sm:$0xff] }
 0x254   : > { %5817 = vst [vmem:[#allocation43_spill] sm:$0xff] %v5123_v47  ;;  %v1141_v63 = vmul.f32 %v4286_v42, %v1105_v5  ;;  %v1241_v15 = vmul.f32 %v5821_v11, %v5820_v41  ;;  %v933_v57 = vmin.f32 %v901_v18, 6.0  ;;  %v867_v38 = vadd.f32 3.0, %v5112_v27 }
 0x255   : > { %v1927_v46 = vmul.f32 %v5139_v54, %v5016_v25  ;;  %v5144_v6 = vadd.f32 %v4523_v36, %v1957_v44  ;;  %v5147_v3 = vadd.f32 %v4523_v36, %v1958_v0  ;;  %1068 = vst [vmem:[#allocation2 + $0x141] sm:$0xff] %v992_v52  ;;  %v5151_v39 = vadd.f32 %v4894_v40, %v5822_v23  ;;  %v5823_v25 = vld [vmem:[#allocation26_spill] sm:$0xff] }
 0x256   : > { %v5154_v10 = vadd.f32 %v2025_v17, %v5123_v47  ;;  %v965_v35 = vmul.f32 0.16666667, %v933_v57  ;;  %v899_v37 = vmax.f32 %v867_v38, 0.0  ;;  %v5159_v28 = vmul.f32 %v5823_v25, %v1105_v5  ;;  %v2063_v47 = vld [vmem:[#allocation9 + $0x38] sm:$0xff] }
 0x257   : > { %v5156_v19 = vadd.f32 %v1927_v46, %v1859_v62  ;;  %v5163_v36 = vadd.f32 %v4894_v40, %v5824_v43  ;;  %v5705_v59 = vmov 0.0|0.0   ;;  %v3444_v30 = vpack.c.bf16 %v2057_v12, %v2056_v26  ;;  %v5826_v40 = vld [vmem:[#allocation30_spill] sm:$0xff] }
 0x258   : > { %3443 = vmatprep.subr.bf16.mxu1 %v5705_v59  ;;  %v5166_v50 = vadd.f32 %v1241_v15, %v1141_v63  ;;  %v5170_v53 = vmul.f32 %v5825_v29, %v5820_v41  ;;  %v1239_v62 = vmul.f32 %v5821_v11, %v991_v34  ;;  %v5174_v44 = vmul.f32 %v965_v35, %v5065_v21  ;;  %v2060_v21 = vld [vmem:[#allocation9 + $0x20] sm:$0xff]  ;;  %v2061_v15 = vld [vmem:[#allocation9 + $0x28] sm:$0xff]  ;;  %v2062_v12 = vld [vmem:[#allocation9 + $0x30] sm:$0xff] }
 0x259   : > { %v1103_v51 = vld [vmem:[#allocation2 + $0x138] sm:$0xff]  ;;  %v1537_v0 = vmul.f32 %v5825_v29, %v991_v34  ;;  %v1836_v33 = vmul.f32 %v5826_v40, %v991_v34  ;;  %v870_v18 = vadd.f32 3.0, %v5151_v39  ;;  %3445 = vmatpush3.bf16.msra.mxu1 %v3444_v30  ;;  %v3447_v9 = vpack.c.bf16 %v2059_v48, %v2058_v8 }
 0x25a   : > { %v1139_v17 = vmul.f32 %v4286_v42, %v1103_v51  ;;  %v1437_v45 = vmul.f32 %v5823_v25, %v1103_v51  ;;  %v1736_v1 = vmul.f32 %v4386_v13, %v1103_v51  ;;  %1073 = vst [vmem:[#allocation2 + $0x181] sm:$0xff] %v5174_v44  ;;  %v931_v63 = vmin.f32 %v899_v37, 6.0  ;;  %3446 = vmatprep.subr.bf16.mxu1 %v5705_v59 }
 0x25b   : > { %v5185_v57 = vmul.f32 %v4386_v13, %v1105_v5  ;;  %v5189_v34 = vmul.f32 %v5821_v11, %v5115_v22  ;;  %v5193_v38 = vmul.f32 %v5825_v29, %v5115_v22  ;;  %v868_v26 = vadd.f32 3.0, %v5163_v36 }
 0x25c   : > { %v1469_v46 = vadd.f32 %v1437_v45, %v1369_v2  ;;  %v1768_v23 = vadd.f32 %v1736_v1, %v1667_v24  ;;  %v1104_v35 = vld [vmem:[#allocation2 + $0x140] sm:$0xff]  ;;  %v1240_v37 = vmul.f32 %v5821_v11, %v992_v52  ;;  %v1538_v48 = vmul.f32 %v5825_v29, %v992_v52  ;;  %v5205_v2 = vld [vmem:[#allocation9 + $0x48] sm:$0xff] }
 0x25d   : > { %v5197_v8 = vld [vmem:[#allocation2 + $0x13a] sm:$0xff]  ;;  %v5199_v5 = vld [vmem:[#allocation2 + $0x142] sm:$0xff]  ;;  %v1271_v43 = vadd.f32 %v1239_v62, %v1139_v17  ;;  %v1837_v30 = vmul.f32 %v5826_v40, %v992_v52  ;;  %v902_v51 = vmax.f32 %v870_v18, 0.0  ;;  %3448 = vmatpush3.bf16.msra.mxu1 %v3447_v9  ;;  %v3450_v59 = vpack.c.bf16 %v2061_v15, %v2060_v21 }
 0x25e   : > { %v1569_v24 = vadd.f32 %v1537_v0, %v1469_v46  ;;  %v5207_v45 = vadd.f32 %v1836_v33, %v1768_v23  ;;  %v1140_v1 = vmul.f32 %v4286_v42, %v1104_v35  ;;  %v963_v49 = vmul.f32 0.16666667, %v931_v63  ;;  %v1106_v17 = vld [vmem:[#allocation2 + $0x158] sm:$0xff] }
 0x25f   : > { %v5828_v60 = vmov 0.0|0.0   ;;  %v1339_v62 = vmul.f32 %v4308_v14, %v5197_v8  ;;  %v1340_v52 = vmul.f32 %v4308_v14, %v5199_v5  ;;  %v1438_v18 = vmul.f32 %v5823_v25, %v1104_v35  ;;  %v5219_v63 = vld [vmem:[#allocation2 + $0x152] sm:$0xff] }
 0x260   : > { %5827 = vst [vmem:[#allocation32_spill] sm:$0xff] %v5207_v45  ;;  %3449 = vmatprep.subr.bf16.mxu1 %v5828_v60  ;;  %v900_v9 = vmax.f32 %v868_v26, 0.0  ;;  %v1272_v21 = vadd.f32 %v1240_v37, %v1140_v1  ;;  %v1737_v0 = vmul.f32 %v4386_v13, %v1104_v35  ;;  %v3453_v33 = vpack.c.bf16 %v2063_v47, %v2062_v12 }
 0x261   : > { %v3456_v15 = vpack.c.bf16 %v5205_v2, %v5203_v61  ;;  %v1440_v46 = vmul.f32 %v5823_v25, %v1106_v17  ;;  %v1371_v23 = vadd.f32 %v1339_v62, %v1271_v43  ;;  %v1470_v45 = vadd.f32 %v1438_v18, %v5127_v58  ;;  %3451 = vmatpush3.bf16.msra.mxu1 %v3450_v59  ;;  %v5242_v18 = vld [vmem:[#allocation2 + $0x8] sm:$0xff] }
 0x262   : > { %v1637_v16 = vmul.f32 %v4397_v20, %v5197_v8  ;;  %v1372_v26 = vadd.f32 %v1340_v52, %v1272_v21  ;;  %v1638_v37 = vmul.f32 %v4397_v20, %v5199_v5  ;;  %v1769_v47 = vadd.f32 %v1737_v0, %v5133_v7  ;;  %3452 = vmatprep.subr.bf16.mxu1 %v5828_v60  ;;  %v2067_v52 = vld [vmem:[#allocation9 + $0x58] sm:$0xff]  ;;  %v5262_v0 = vld [vmem:[%s5663_s4] ss:$0 sm:$0xff] }
 0x263   : > { %v995_v12 = vmul.f32 %v963_v49, %v5112_v27  ;;  %v1471_v61 = vadd.f32 %v5159_v28, %v1371_v23  ;;  %v1570_v35 = vadd.f32 %v1538_v48, %v1470_v45  ;;  %v934_v43 = vmin.f32 %v902_v51, 6.0  ;;  %v5239_v28 = vld [vmem:[#allocation2 + $0x15a] sm:$0xff]  ;;  %v2066_v45 = vld [vmem:[#allocation9 + $0x50] sm:$0xff]  ;;  %3357 = vmatprep.mubr.msk.f32.mxu1 %vm3913_vm0, %v5242_v18 }
 0x264   : > { %v932_v2 = vmin.f32 %v900_v9, 6.0  ;;  %v1142_v58 = vmul.f32 %v4286_v42, %v1106_v17  ;;  %v1341_v59 = vmul.f32 %v4308_v14, %v5219_v63  ;;  %v1639_v1 = vmul.f32 %v4397_v20, %v5219_v63 }
 0x265   : > { %v5236_v62 = vadd.f32 %v1837_v30, %v1769_v47  ;;  %1071 = vst [vmem:[#allocation2 + $0x169] sm:$0xff] %v995_v12  ;;  %v1739_v49 = vmul.f32 %v4386_v13, %v1106_v17  ;;  %v966_v27 = vmul.f32 0.16666667, %v934_v43  ;;  %3454 = vmatpush3.bf16.msra.mxu1 %v3453_v33  ;;  %v1669_v48 = vadd.f32 %v1637_v16, %v1569_v24 }
 0x266   : > { %v964_v7 = vmul.f32 0.16666667, %v932_v2  ;;  %v1670_v51 = vadd.f32 %v1638_v37, %v1570_v35  ;;  %3455 = vmatprep.subr.bf16.mxu1 %v5828_v60  ;;  %v1472_v30 = vadd.f32 %v1440_v46, %v1372_v26  ;;  %v2027_v9 = vadd.f32 %v5154_v10, %v5144_v6  ;;  %v1407_v35 = vld [vmem:[#allocation2 + $0x180] sm:$0xff] }
 0x267   : > { %v5249_v17 = vmul.f32 %v966_v27, %v5151_v39  ;;  %v1571_v24 = vadd.f32 %v5170_v53, %v1471_v61  ;;  %v5257_v21 = vadd.f32 %v5107_v55, %v5085_v4  ;;  %v5266_v10 = vadd.f32 %v5262_v0, %v5156_v19  ;;  %v2071_v61 = vld [vmem:[#allocation9 + $0x78] sm:$0xff] }
 0x268   : > { %v5252_v16 = vmul.f32 %v964_v7, %v5163_v36  ;;  %v1838_v39 = vmul.f32 %v5826_v40, %v5820_v41  ;;  %v1572_v36 = vadd.f32 %v5193_v38, %v1472_v30  ;;  %v1274_v53 = vadd.f32 %v5189_v34, %v1142_v58  ;;  %v2068_v41 = vld [vmem:[#allocation9 + $0x60] sm:$0xff]  ;;  %v2069_v38 = vld [vmem:[#allocation9 + $0x68] sm:$0xff] }
 0x269   : > { %v1342_v4 = vmul.f32 %v4308_v14, %v5239_v28  ;;  %v1839_v55 = vmul.f32 %v5826_v40, %v5115_v22  ;;  %1074 = vst [vmem:[#allocation2 + $0x189] sm:$0xff] %v5249_v17  ;;  %3457 = vmatpush3.bf16.msra.mxu1 %v3456_v15  ;;  %v3459_v19 = vpack.c.bf16 %v2067_v52, %v2066_v45 }
 0x26a   : > { %1072 = vst [vmem:[#allocation2 + $0x171] sm:$0xff] %v5252_v16  ;;  %v1373_v33 = vadd.f32 %v1341_v59, %v5166_v50  ;;  %3458 = vmatprep.subr.bf16.mxu1 %v5828_v60  ;;  %v1671_v46 = vadd.f32 %v1639_v1, %v1571_v24  ;;  %v1770_v34 = vadd.f32 %v5185_v57, %v1669_v48  ;;  %v2070_v50 = vld [vmem:[#allocation9 + $0x70] sm:$0xff] }
 0x26b   : > { %v1771_v23 = vadd.f32 %v1739_v49, %v1670_v51  ;;  %v5283_v26 = vadd.f32 %v5119_v32, %v5089_v56  ;;  %v2028_v22 = vadd.f32 %v2027_v9, %v5147_v3  ;;  %v1243_v15 = vmul.f32 %v5821_v11, %v995_v12 }
 0x26c   : > { %v1107_v37 = vld [vmem:[#allocation2 + $0x168] sm:$0xff]  ;;  %v1541_v47 = vmul.f32 %v5825_v29, %v995_v12  ;;  %v1840_v58 = vmul.f32 %v5826_v40, %v995_v12  ;;  %v1640_v56 = vmul.f32 %v4397_v20, %v5239_v28  ;;  %v3462_v32 = vpack.c.bf16 %v2069_v38, %v2068_v41 }
 0x26d   : > { %v1143_v43 = vmul.f32 %v4286_v42, %v1107_v37  ;;  %v1441_v2 = vmul.f32 %v5823_v25, %v1107_v37  ;;  %v1740_v57 = vmul.f32 %v4386_v13, %v1107_v37  ;;  %3460 = vmatpush3.bf16.msra.mxu1 %v3459_v19  ;;  %v5294_v59 = vadd.f32 %v1838_v39, %v1770_v34 }
 0x26e   : > { %v5296_v1 = vadd.f32 %v1839_v55, %v1771_v23  ;;  %3461 = vmatprep.subr.bf16.mxu1 %v5828_v60  ;;  %v3465_v49 = vpack.c.bf16 %v2071_v61, %v2070_v50  ;;  %v1374_v27 = vadd.f32 %v1342_v4, %v1274_v53  ;;  %v1244_v51 = vmul.f32 %v5821_v11, %v5252_v16 }
 0x26f   : > { %v1473_v7 = vadd.f32 %v1441_v2, %v1373_v33  ;;  %v1772_v48 = vadd.f32 %v1740_v57, %v1671_v46  ;;  %v1275_v45 = vadd.f32 %v1243_v15, %v1143_v43  ;;  %v1443_v12 = vmul.f32 %v5823_v25, %v1407_v35 }
 0x270   : > { %v1543_v52 = vmul.f32 %v5825_v29, %v5174_v44  ;;  %v1542_v39 = vmul.f32 %v5825_v29, %v5252_v16  ;;  %v1742_v4 = vmul.f32 %v4386_v13, %v1407_v35  ;;  %v1408_v38 = vld [vmem:[#allocation2 + $0x188] sm:$0xff]  ;;  %v1544_v34 = vmul.f32 %v5825_v29, %v5249_v17 }
 0x271   : > { %v1108_v30 = vld [vmem:[#allocation2 + $0x170] sm:$0xff]  ;;  %v1573_v53 = vadd.f32 %v1541_v47, %v1473_v7  ;;  %v5311_v55 = vadd.f32 %v1840_v58, %v1772_v48  ;;  %3463 = vmatpush3.bf16.msra.mxu1 %v3462_v32  ;;  %v1444_v46 = vmul.f32 %v5823_v25, %v1408_v38  ;;  %v1672_v23 = vadd.f32 %v1640_v56, %v1572_v36 }
 0x272   : > { %v5304_v9 = vld [vmem:[#allocation2 + $0x16a] sm:$0xff]  ;;  %v5306_v24 = vld [vmem:[#allocation2 + $0x172] sm:$0xff]  ;;  %v1144_v11 = vmul.f32 %v4286_v42, %v1108_v30  ;;  %v1442_v33 = vmul.f32 %v5823_v25, %v1108_v30  ;;  %3464 = vmatprep.subr.bf16.mxu1 %v5828_v60  ;;  %v1841_v35 = vmul.f32 %v5826_v40, %v5252_v16  ;;  %v1842_v25 = vmul.f32 %v5826_v40, %v5174_v44 }
 0x273   : > { %v1343_v19 = vmul.f32 %v4308_v14, %v5304_v9  ;;  %v1344_v41 = vmul.f32 %v4308_v14, %v5306_v24  ;;  %v1641_v42 = vmul.f32 %v4397_v20, %v5304_v9  ;;  %v1642_v50 = vmul.f32 %v4397_v20, %v5306_v24 }
 0x274   : > { %v1276_v37 = vadd.f32 %v1244_v51, %v1144_v11  ;;  %v1474_v47 = vadd.f32 %v1442_v33, %v1374_v27  ;;  %v1741_v14 = vmul.f32 %v4386_v13, %v1108_v30  ;;  %v1743_v36 = vmul.f32 %v4386_v13, %v1408_v38 }
 0x275   : > { %v1375_v15 = vadd.f32 %v1343_v19, %v1275_v45  ;;  %v1673_v61 = vadd.f32 %v1641_v42, %v1573_v53  ;;  %3466 = vmatpush3.bf16.msra.mxu1 %v3465_v49  ;;  %v5335_v57 = vadd.f32 %v5262_v0, %v5257_v21  ;;  %v2029_v58 = vadd.f32 %v2028_v22, %v5266_v10  ;;  %v3649_v49 = vld [vmem:[#allocation2 + $0xf2] sm:$0xff]  ;;  %v3650_v21 = vld [vmem:[#allocation2 + $0xfa] sm:$0xff] }
 0x276   : > { %v1376_v29 = vadd.f32 %v1344_v41, %v1276_v37  ;;  %v1574_v2 = vadd.f32 %v1542_v39, %v1474_v47  ;;  %v1773_v56 = vadd.f32 %v1741_v14, %v1672_v23  ;;  %3467 = vmatprep.subr.bf16.mxu1 %v5828_v60  ;;  %v1843_v44 = vmul.f32 %v5826_v40, %v5249_v17  ;;  %v5829_v39 = vld [vmem:[#allocation35_spill] sm:$0xff]  ;;  %v5830_v19 = vld [vmem:[#allocation56_spill] sm:$0xff]  ;;  %v5831_v41 = vld [vmem:[#allocation45_spill] sm:$0xff] }
 0x277   : > { %v1475_v43 = vadd.f32 %v1443_v12, %v1375_v15  ;;  %v1774_v32 = vadd.f32 %v1742_v4, %v1673_v61  ;;  %v1930_v48 = vmul.f32 %v3649_v49, %v5139_v54  ;;  %v1931_v22 = vmul.f32 %v3650_v21, %v5139_v54  ;;  %v5833_v42 = vld [vmem:[#allocation31_spill] sm:$0xff]  ;;  %v5834_v15 = vld [vmem:[#allocation22_spill] sm:$0xff]  ;;  %v5835_v47 = vld [vmem:[#allocation57_spill] sm:$0xff] }
 0x278   : > { %v1476_v16 = vadd.f32 %v1444_v46, %v1376_v29  ;;  %v1674_v7 = vadd.f32 %v1642_v50, %v1574_v2  ;;  %v5342_v51 = vadd.f32 %v1841_v35, %v1773_v56  ;;  %v1932_v53 = vmul.f32 %v5139_v54, %v5829_v39  ;;  %v5832_v46 = vld [vmem:[#allocation29_spill] sm:$0xff]  ;;  %v5836_v29 = vld [vmem:[#allocation58_spill] sm:$0xff] }
 0x279   : > { %v1575_v27 = vadd.f32 %v1543_v52, %v1475_v43  ;;  %v5344_v45 = vadd.f32 %v1842_v25, %v1774_v32  ;;  %v1962_v52 = vadd.f32 %v1930_v48, %v5071_v31  ;;  %v2030_v4 = vadd.f32 %v2029_v58, %v5335_v57  ;;  %v5837_v32 = vld [vmem:[#allocation59_spill] sm:$0xff]  ;;  %v1608_v49 = vld [vmem:[#allocation2 + $0x18a] sm:$0xff] }
 0x27a   : > { %v1576_v12 = vadd.f32 %v1544_v34, %v1476_v16  ;;  %v1775_v30 = vadd.f32 %v1743_v36, %v1674_v7  ;;  %v5353_v17 = vadd.f32 %v5262_v0, %v5283_v26  ;;  %v1933_v33 = vmul.f32 %v5139_v54, %v5830_v19  ;;  %v1607_v36 = vld [vmem:[#allocation2 + $0x182] sm:$0xff] }
 0x27b   : > { %v1963_v38 = vadd.f32 %v1931_v22, %v5831_v41  ;;  %v1934_v34 = vmul.f32 %v5139_v54, %v5832_v46  ;;  %v1964_v23 = vadd.f32 %v1932_v53, %v5833_v42  ;;  %v5364_v31 = vadd.f32 %v5262_v0, %v1962_v52  ;;  %v1708_v22 = vld [vmem:[#allocation2 + $0x198] sm:$0xff] }
 0x27c   : > { %v5355_v11 = vadd.f32 %v1843_v44, %v1775_v30  ;;  %v2031_v37 = vadd.f32 %v2030_v4, %v5353_v17  ;;  %v1935_v26 = vmul.f32 %v5139_v54, %v5834_v15  ;;  %v1965_v50 = vadd.f32 %v1933_v33, %v5835_v47  ;;  %v1908_v47 = vld [vmem:[#allocation2 + $0x19a] sm:$0xff] }
 0x27d   : > { %v5371_v61 = vadd.f32 %v5262_v0, %v1963_v38  ;;  %v5375_v35 = vadd.f32 %v5262_v0, %v1964_v23  ;;  %v1936_v25 = vmul.f32 %v5139_v54, %v5197_v8  ;;  %v1966_v43 = vadd.f32 %v1934_v34, %v5836_v29  ;;  %v5838_v8 = vld [vmem:[#allocation32_spill] sm:$0xff] }
 0x27e   : > { %v2032_v14 = vadd.f32 %v2031_v37, %v5364_v31  ;;  %v5382_v58 = vadd.f32 %v5262_v0, %v1965_v50  ;;  %v1937_v56 = vmul.f32 %v5139_v54, %v5199_v5  ;;  %v1967_v16 = vadd.f32 %v1935_v26, %v5837_v32  ;;  %v1808_v38 = vld [vmem:[#allocation2 + $0x199] sm:$0xff]  ;;  %v1809_v23 = vld [vmem:[#allocation2 + $0x1a1] sm:$0xff] }
 0x27f   : > { %v1938_v44 = vmul.f32 %v5139_v54, %v5219_v63  ;;  %v1968_v48 = vadd.f32 %v1936_v25, %v5838_v8  ;;  %v1643_v21 = vmul.f32 %v4397_v20, %v1607_v36  ;;  %v5393_v30 = vadd.f32 %v5262_v0, %v1966_v43  ;;  %v1909_v25 = vld [vmem:[#allocation2 + $0x1a2] sm:$0xff] }
 0x280   : > { %v2033_v2 = vadd.f32 %v2032_v14, %v5371_v61  ;;  %v1939_v5 = vmul.f32 %v5139_v54, %v5239_v28  ;;  %v1644_v53 = vmul.f32 %v4397_v20, %v1608_v49  ;;  %v1969_v52 = vadd.f32 %v1937_v56, %v5236_v62 }
 0x281   : > { %v5401_v63 = vadd.f32 %v5262_v0, %v1967_v16  ;;  %v1744_v19 = vmul.f32 %v4386_v13, %v1708_v22  ;;  %v1970_v33 = vadd.f32 %v1938_v44, %v5294_v59  ;;  %v1675_v41 = vadd.f32 %v1643_v21, %v1575_v27 }
 0x282   : > { %v2034_v7 = vadd.f32 %v2033_v2, %v5375_v35  ;;  %v1940_v46 = vmul.f32 %v5139_v54, %v5304_v9  ;;  %v5409_v28 = vadd.f32 %v5262_v0, %v1968_v48  ;;  %v1745_v62 = vmul.f32 %v5242_v18, %v4386_v13 }
 0x283   : > { %v1971_v34 = vadd.f32 %v1939_v5, %v5296_v1  ;;  %v1676_v42 = vadd.f32 %v1644_v53, %v1576_v12  ;;  %v1941_v59 = vmul.f32 %v5139_v54, %v5306_v24  ;;  %v5418_v27 = vadd.f32 %v5262_v0, %v1969_v52 }
 0x284   : > { %v2035_v39 = vadd.f32 %v2034_v7, %v5382_v58  ;;  %v1844_v37 = vmul.f32 %v5826_v40, %v1808_v38  ;;  %v1942_v15 = vmul.f32 %v5139_v54, %v1607_v36  ;;  %v1776_v26 = vadd.f32 %v1744_v19, %v1675_v41 }
 0x285   : > { %v1972_v13 = vadd.f32 %v1940_v46, %v5311_v55  ;;  %v5425_v1 = vadd.f32 %v5262_v0, %v1970_v33  ;;  %v1845_v24 = vmul.f32 %v5826_v40, %v1809_v23  ;;  %v1943_v50 = vmul.f32 %v5139_v54, %v1608_v49  ;;  %v2144_v46 = vld [vmem:[#allocation11] sm:$0xff]  ;;  %v2146_v23 = vld [vmem:[#allocation11 + $0x10] sm:$0xff] }
 0x286   : > { %v2036_v4 = vadd.f32 %v2035_v39, %v5393_v30  ;;  %v1777_v14 = vadd.f32 %v1745_v62, %v1676_v42  ;;  %v1973_v29 = vadd.f32 %v1941_v59, %v5342_v51  ;;  %v5432_v43 = vadd.f32 %v5262_v0, %v1971_v34  ;;  %v2147_v59 = vld [vmem:[#allocation11 + $0x18] sm:$0xff] }
 0x287   : > { %v1944_v55 = vmul.f32 %v5139_v54, %v1908_v47  ;;  %v1876_v36 = vadd.f32 %v1844_v37, %v1776_v26  ;;  %v1974_v56 = vadd.f32 %v1942_v15, %v5344_v45  ;;  %v5438_v32 = vadd.f32 %v5262_v0, %v1972_v13  ;;  %v2149_v37 = vld [vmem:[#allocation11 + $0x28] sm:$0xff]  ;;  %v2150_v26 = vld [vmem:[#allocation11 + $0x30] sm:$0xff]  ;;  %v2151_v47 = vld [vmem:[#allocation11 + $0x38] sm:$0xff] }
 0x288   : > { %v2037_v20 = vadd.f32 %v2036_v4, %v5401_v63  ;;  %v1945_v16 = vmul.f32 %v5139_v54, %v1909_v25  ;;  %v1877_v7 = vadd.f32 %v1845_v24, %v1777_v14  ;;  %v1975_v51 = vadd.f32 %v1943_v50, %v5355_v11  ;;  %v2153_v24 = vld [vmem:[#allocation11 + $0x48] sm:$0xff]  ;;  %v2155_v14 = vld [vmem:[#allocation11 + $0x58] sm:$0xff] }
 0x289   : > { %v5444_v44 = vadd.f32 %v5262_v0, %v1973_v29  ;;  %v1976_v8 = vadd.f32 %v1944_v55, %v1876_v36  ;;  %v5448_v48 = vadd.f32 %v5262_v0, %v1974_v56  ;;  %v3477_v13 = vpack.c.bf16 %v2151_v47, %v2150_v26  ;;  %v2156_v29 = vld [vmem:[#allocation11 + $0x60] sm:$0xff]  ;;  %v2158_v36 = vld [vmem:[#allocation11 + $0x70] sm:$0xff]  ;;  %v2159_v56 = vld [vmem:[#allocation11 + $0x78] sm:$0xff] }
 0x28a   : > { %v2038_v9 = vadd.f32 %v2037_v20, %v5409_v28  ;;  %v1977_v21 = vadd.f32 %v1945_v16, %v1877_v7  ;;  %v5452_v22 = vadd.f32 %v5262_v0, %v1975_v51  ;;  %v2145_v20 = vld [vmem:[#allocation11 + $0x8] sm:$0xff]  ;;  %v3637_v16 = vld [vmem:[#allocation12] sm:$0xff]  }
 0x28b   : > { %v5456_v39 = vadd.f32 %v5262_v0, %v1976_v8  ;;  %v3468_v34 = vpack.c.bf16 %v2145_v20, %v2144_v46  ;;  %v3638_v7 = vld [vmem:[#allocation12 + $0x8] sm:$0xff]   ;;  %3395 = vmatprep.subr.bf16.mxu0 %v3637_v16  ;;  %v2072_v51 = vld [vmem:[%s5665_s6] sm:$0x1] }
 0x28c   : > { %v2039_v12 = vadd.f32 %v2038_v9, %v5418_v27  ;;  %v5460_v5 = vadd.f32 %v5262_v0, %v1977_v21  ;;  %v3471_v0 = vpack.c.bf16 %v2147_v59, %v2146_v23  ;;  %v2148_v9 = vld [vmem:[#allocation11 + $0x20] sm:$0xff]  ;;  %3396 = vmatpush3.bf16.msra.mxu0 %v3637_v16 }
 0x28d   : > { %v3474_v15 = vpack.c.bf16 %v2149_v37, %v2148_v9  ;;  %3397 = vmatprep.subr.bf16.mxu0 %v3638_v7  ;;  %v5843_v37 = vld [vmem:[#allocation44_spill] sm:$0xff] }
 0x28e   : > { %v2040_v2 = vadd.f32 %v2039_v12, %v5425_v1  ;;  %v2152_v12 = vld [vmem:[#allocation11 + $0x40] sm:$0xff] }
 0x28f   : > { %v3480_v50 = vpack.c.bf16 %v2153_v24, %v2152_v12  ;;  %v5844_v26 = vld [vmem:[#allocation48_spill] sm:$0xff] }
 0x290   : > { %v2041_v40 = vadd.f32 %v2040_v2, %v5432_v43  ;;  %v2157_v2 = vld [vmem:[#allocation11 + $0x68] sm:$0xff]  ;;  %3398 = vmatpush3.bf16.msra.mxu0 %v3638_v7  ;;  %v5846_v24 = vld [vmem:[#allocation52_spill] sm:$0xff] }
 0x291   : > { %v3486_v55 = vpack.c.bf16 %v2157_v2, %v2156_v29  ;;  %v5849_v2 = vld [vmem:[#allocation33_spill] sm:$0xff] }
 0x292   : > { %v2042_v49 = vadd.f32 %v2041_v40, %v5438_v32  ;;  %v3489_v40 = vpack.c.bf16 %v2159_v56, %v2158_v36 }
 0x294   : > { %v2043_v45 = vadd.f32 %v2042_v49, %v5444_v44 }
 0x296   : > { %v2044_v54 = vadd.f32 %v2043_v45, %v5448_v48 }
 0x298   : > { %v2045_v11 = vadd.f32 %v2044_v54, %v5452_v22  ;;  %v3640_v54 = vld [vmem:[#allocation12 + $0x18] sm:$0xff]  }
 0x29a   : > { %v2046_v53 = vadd.f32 %v2045_v11, %v5456_v39  ;;  %v3641_v11 = vld [vmem:[#allocation12 + $0x20] sm:$0xff]  }
 0x29c   : > { %v2047_v52 = vadd.f32 %v2046_v53, %v5460_v5  ;;  %v3642_v53 = vld [vmem:[#allocation12 + $0x28] sm:$0xff]  }
 0x29e   : > { %v2048_v4 = vrot.slane %v2047_v52, 4 }
 0x2a0   : > { %v2049_v19 = vadd.f32 %v2048_v4, %v2047_v52  ;;  %v3643_v52 = vld [vmem:[#allocation12 + $0x30] sm:$0xff]   ;;  %v3644_v4 = vld [vmem:[#allocation12 + $0x38] sm:$0xff]  }
 0x2a2   : > { %v2050_v33 = vrot.slane %v2049_v19, 2 }
 0x2a4   : > { %v2051_v41 = vadd.f32 %v2050_v33, %v2049_v19  ;;  %v2160_v19 = vld [vmem:[%s5839_s25] sm:$0x1]  ;;  %s3827_s25 = scalar_lea.vmem %s3826_s29, 4096 }
 0x2a5   : > { %p3829_p12 = scmp.lt.s32.totalorder %s3827_s25, %s3821_s22 }
 0x2a6   : > { %v2052_v38 = vrot.slane %v2051_v41, 1 }
 0x2a7   : > { %p3830_p13 = por %p3829_p12, %p3828_p11 }
 0x2a8   : > { %v2053_v62 = vadd.f32 %v2052_v38, %v2051_v41 }
 0x2a9   : > { %p3831_p8 = pnand %p3830_p13, %p3824_p1 }
 0x2aa   : > { %v2055_v42 = vmul.f32 0.00390625, %v2053_v62 }
 0x2ac   : > { %3358 = vmatmul.mubr.f32.vlgmr.msra.gmra.mrb[16].mxu1 %v2055_v42  ;;  %v5840_v42 = vld [vmem:[#allocation20_spill] sm:$0xff] }
 0x2ad   : > { %3469 = vmatpush3.bf16.msra.mxu1 %v3468_v34  ;;  %3392 = vmatprep.mubr.msk.f32.mxu1 %vm3913_vm0, %v5242_v18  ;;  %v2154_v18 = vld [vmem:[#allocation11 + $0x50] sm:$0xff]  ;;  %v5841_v23 = vsub.s32 0, %v5840_v42 }
 0x2ae   : > { %3470 = vmatprep.subr.bf16.mxu1 %v5828_v60  ;;  %v3483_v25 = vpack.c.bf16 %v2155_v14, %v2154_v18  ;;  %v5847_v18 = vld [vmem:[#allocation42_spill] sm:$0xff] }
 0x2b1   : > { %3472 = vmatpush3.bf16.msra.mxu1 %v3471_v0  ;;  %v5842_v0 = vld [vmem:[#allocation41_spill] sm:$0xff] }
 0x2b2   : > { %3473 = vmatprep.subr.bf16.mxu1 %v5828_v60 }
 0x2b5   : > { %3475 = vmatpush3.bf16.msra.mxu1 %v3474_v15 }
 0x2b6   : > { %3476 = vmatprep.subr.bf16.mxu1 %v5828_v60 }
 0x2b9   : > { %3478 = vmatpush3.bf16.msra.mxu1 %v3477_v13  ;;  %v5845_v13 = vld [vmem:[#allocation49_spill] sm:$0xff] }
 0x2ba   : > { %3479 = vmatprep.subr.bf16.mxu1 %v5828_v60 }
 0x2bd   : > { %3481 = vmatpush3.bf16.msra.mxu1 %v3480_v50 }
 0x2be   : > { %3482 = vmatprep.subr.bf16.mxu1 %v5828_v60 }
 0x2c1   : > { %3484 = vmatpush3.bf16.msra.mxu1 %v3483_v25  ;;  %v5848_v25 = vld [vmem:[#allocation23_spill] sm:$0xff] }
 0x2c2   : > { %3485 = vmatprep.subr.bf16.mxu1 %v5828_v60 }
 0x2c5   : > { %3487 = vmatpush3.bf16.msra.mxu1 %v3486_v55 }
 0x2c6   : > { %3488 = vmatprep.subr.bf16.mxu1 %v5828_v60  ;;  %v3639_v60 = vld [vmem:[#allocation12 + $0x10] sm:$0xff]  }
 0x2c7   : > { %3399 = vmatprep.subr.bf16.mxu0 %v3639_v60 }
 0x2c8   : > { %3400 = vmatpush3.bf16.msra.mxu0 %v3639_v60 }
 0x2c9   : > { %3490 = vmatpush3.bf16.msra.mxu1 %v3489_v40  ;;  %3401 = vmatprep.subr.bf16.mxu0 %v3640_v54 }
 0x2cc   : > { %3402 = vmatpush3.bf16.msra.mxu0 %v3640_v54 }
 0x2cd   : > { %3403 = vmatprep.subr.bf16.mxu0 %v3641_v11 }
 0x2d0   : > { %3404 = vmatpush3.bf16.msra.mxu0 %v3641_v11 }
 0x2d1   : > { %3405 = vmatprep.subr.bf16.mxu0 %v3642_v53 }
 0x2d4   : > { %3406 = vmatpush3.bf16.msra.mxu0 %v3642_v53 }
 0x2d5   : > { %3407 = vmatprep.subr.bf16.mxu0 %v3643_v52 }
 0x2d8   : > { %3408 = vmatpush3.bf16.msra.mxu0 %v3643_v52 }
 0x2d9   : > { %3409 = vmatprep.subr.bf16.mxu0 %v3644_v4 }
 0x2dc   : > { %3410 = vmatpush3.bf16.msra.mxu0 %v3644_v4 }
 0x37f   : > { %v2139_v49 = vpop.f32.mrb[16].mxu1 }
 0x380   : > { %v2140_v8 = vadd.f32 %v2139_v49, %v2072_v51  ;;  %v3359_v45 = vpop.f32.mrb[17].mxu1 }
 0x382   : > { %v2143_v21 = vmax.f32 %v2140_v8, 0.0 }
 0x384   : > { %3393 = vmatmul.mubr.f32.vlgmr.msra.gmra.mrb[18].mxu1 %v2143_v21 }
 0x457   : > { %v2227_v33 = vpop.f32.mrb[18].mxu1 }
 0x458   : > { %v2228_v41 = vadd.f32 %v2227_v33, %v2160_v19  ;;  %v3394_v38 = vpop.f32.mrb[19].mxu1 }
 0x45a   : > { %v2231_v46 = vadd.f32 3.0, %v2228_v41 }
 0x45c   : > { %v2232_v20 = vmax.f32 %v2231_v46, 0.0 }
 0x45e   : > { %v2233_v62 = vmin.f32 %v2232_v20, 6.0 }
 0x460   : > { %v2234_v34 = vmul.f32 0.16666667, %v2233_v62 }
 0x462   : > { %v5481_v59 = vrot.slane %v2234_v34, %v5841_v23 }
 0x464   : > { %v2239_v9 = vmul.f32 %v5481_v59, %v5842_v0  ;;  %v2240_v15 = vmul.f32 %v5481_v59, %v5843_v37  ;;  %v2241_v47 = vmul.f32 %v5481_v59, %v5844_v26  ;;  %v2242_v12 = vmul.f32 %v5481_v59, %v5845_v13  ;;  %v5850_v37 = vld [vmem:[#allocation36_spill] sm:$0xff] }
 0x465   : > { %v2243_v50 = vmul.f32 %v5481_v59, %v5846_v24  ;;  %v2244_v14 = vmul.f32 %v5481_v59, %v5847_v18  ;;  %v2245_v29 = vmul.f32 %v5481_v59, %v5848_v25  ;;  %v2246_v55 = vmul.f32 %v5481_v59, %v5849_v2  ;;  %v5851_v25 = vld [vmem:[#allocation55_spill] sm:$0xff] }
 0x466   : > { %v2271_v36 = vadd.f32 3.0, %v2239_v9  ;;  %v2272_v56 = vadd.f32 3.0, %v2240_v15  ;;  %v2273_v40 = vadd.f32 3.0, %v2241_v47  ;;  %v2274_v16 = vadd.f32 3.0, %v2242_v12 }
 0x467   : > { %v2275_v7 = vadd.f32 3.0, %v2243_v50  ;;  %v2276_v51 = vadd.f32 3.0, %v2244_v14  ;;  %v2277_v49 = vadd.f32 3.0, %v2245_v29  ;;  %v2278_v8 = vadd.f32 3.0, %v2246_v55 }
 0x468   : > { %v2303_v45 = vmax.f32 %v2271_v36, 0.0  ;;  %v2304_v21 = vmax.f32 %v2272_v56, 0.0  ;;  %v2305_v60 = vmax.f32 %v2273_v40, 0.0  ;;  %v2306_v54 = vmax.f32 %v2274_v16, 0.0 }
 0x469   : > { %v2307_v11 = vmax.f32 %v2275_v7, 0.0  ;;  %v2308_v53 = vmax.f32 %v2276_v51, 0.0  ;;  %v2309_v52 = vmax.f32 %v2277_v49, 0.0  ;;  %v2310_v4 = vmax.f32 %v2278_v8, 0.0 }
 0x46a   : > { %v2335_v19 = vmin.f32 %v2303_v45, 6.0  ;;  %v2336_v33 = vmin.f32 %v2304_v21, 6.0  ;;  %v2337_v41 = vmin.f32 %v2305_v60, 6.0  ;;  %v2338_v38 = vmin.f32 %v2306_v54, 6.0 }
 0x46b   : > { %v2339_v46 = vmin.f32 %v2307_v11, 6.0  ;;  %v2340_v20 = vmin.f32 %v2308_v53, 6.0  ;;  %v2341_v62 = vmin.f32 %v2309_v52, 6.0  ;;  %v2342_v34 = vmin.f32 %v2310_v4, 6.0  ;;  %v5852_v4 = vld [vmem:[#allocation43_spill] sm:$0xff] }
 0x46c   : > { %v2367_v42 = vmul.f32 0.16666667, %v2335_v19  ;;  %v2368_v23 = vmul.f32 0.16666667, %v2336_v33  ;;  %v2369_v0 = vmul.f32 0.16666667, %v2337_v41  ;;  %v2247_v26 = vmul.f32 %v5481_v59, %v5850_v37 }
 0x46d   : > { %v2370_v13 = vmul.f32 0.16666667, %v2338_v38  ;;  %v2371_v24 = vmul.f32 0.16666667, %v2339_v46  ;;  %v2372_v18 = vmul.f32 0.16666667, %v2340_v20  ;;  %v2248_v2 = vmul.f32 %v5481_v59, %v5851_v25 }
 0x46e   : > { %v2399_v36 = vmul.f32 %v2367_v42, %v2239_v9  ;;  %v2400_v56 = vmul.f32 %v2368_v23, %v2240_v15  ;;  %v2401_v40 = vmul.f32 %v2369_v0, %v2241_v47  ;;  %v2373_v16 = vmul.f32 0.16666667, %v2341_v62 }
 0x46f   : > { %v2402_v7 = vmul.f32 %v2370_v13, %v2242_v12  ;;  %v2403_v51 = vmul.f32 %v2371_v24, %v2243_v50  ;;  %v2404_v49 = vmul.f32 %v2372_v18, %v2244_v14  ;;  %v2374_v8 = vmul.f32 0.16666667, %v2342_v34 }
 0x470   : > { %v2431_v45 = vpack.c.bf16 %v2400_v56, %v2399_v36  ;;  %v2405_v21 = vmul.f32 %v2373_v16, %v2245_v29  ;;  %v2279_v60 = vadd.f32 3.0, %v2247_v26  ;;  %v2280_v54 = vadd.f32 3.0, %v2248_v2 }
 0x471   : > { %v2432_v11 = vpack.c.bf16 %v2402_v7, %v2401_v40  ;;  %v2433_v53 = vpack.c.bf16 %v2404_v49, %v2403_v51  ;;  %v2406_v52 = vmul.f32 %v2374_v8, %v2246_v55  ;;  %v2249_v19 = vmul.f32 %v5481_v59, %v5852_v4 }
 0x472   : > { %3411 = vmatprep.mubr.bf16.mxu0 %v2431_v45  ;;  %v2311_v33 = vmax.f32 %v2279_v60, 0.0  ;;  %v2312_v9 = vmax.f32 %v2280_v54, 0.0  ;;  %v2250_v15 = vmul.f32 %v5481_v59, %v5144_v6  ;;  %v2251_v47 = vmul.f32 %v5481_v59, %v5147_v3 }
 0x473   : > { %3412 = vmatmul.mubr.bf16.vlgmr.msra.gmra.mrb[16].mxu0 %v2432_v11  ;;  %v2434_v12 = vpack.c.bf16 %v2406_v52, %v2405_v21  ;;  %v2281_v50 = vadd.f32 3.0, %v2249_v19  ;;  %v2252_v14 = vmul.f32 %v5481_v59, %v5266_v10  ;;  %v2253_v29 = vmul.f32 %v5481_v59, %v5335_v57 }
 0x474   : > { %3415 = vmatprep.mubr.bf16.mxu0 %v2433_v53  ;;  %v2343_v55 = vmin.f32 %v2311_v33, 6.0  ;;  %v2344_v41 = vmin.f32 %v2312_v9, 6.0  ;;  %v2282_v38 = vadd.f32 3.0, %v2250_v15  ;;  %v2283_v46 = vadd.f32 3.0, %v2251_v47 }
 0x475   : > { %v2313_v20 = vmax.f32 %v2281_v50, 0.0  ;;  %v2284_v62 = vadd.f32 3.0, %v2252_v14  ;;  %v2254_v6 = vmul.f32 %v5481_v59, %v5353_v17  ;;  %v2285_v3 = vadd.f32 3.0, %v2253_v29 }
 0x476   : > { %v2375_v34 = vmul.f32 0.16666667, %v2343_v55  ;;  %v2376_v42 = vmul.f32 0.16666667, %v2344_v41  ;;  %v2314_v23 = vmax.f32 %v2282_v38, 0.0  ;;  %v2315_v0 = vmax.f32 %v2283_v46, 0.0 }
 0x477   : > { %v2345_v37 = vmin.f32 %v2313_v20, 6.0  ;;  %v2316_v10 = vmax.f32 %v2284_v62, 0.0  ;;  %v2286_v13 = vadd.f32 3.0, %v2254_v6  ;;  %v2317_v24 = vmax.f32 %v2285_v3, 0.0 }
 0x478   : > { %v2407_v57 = vmul.f32 %v2375_v34, %v2247_v26  ;;  %v2408_v18 = vmul.f32 %v2376_v42, %v2248_v2  ;;  %v2346_v25 = vmin.f32 %v2314_v23, 6.0  ;;  %v2347_v36 = vmin.f32 %v2315_v0, 6.0 }
 0x479   : > { %v2377_v56 = vmul.f32 0.16666667, %v2345_v37  ;;  %v2348_v40 = vmin.f32 %v2316_v10, 6.0  ;;  %v2318_v16 = vmax.f32 %v2286_v13, 0.0  ;;  %v2349_v7 = vmin.f32 %v2317_v24, 6.0 }
 0x47a   : > { %v2435_v51 = vpack.c.bf16 %v2408_v18, %v2407_v57  ;;  %v2378_v49 = vmul.f32 0.16666667, %v2346_v25  ;;  %v2379_v17 = vmul.f32 0.16666667, %v2347_v36  ;;  %v2255_v8 = vmul.f32 %v5481_v59, %v5364_v31 }
 0x47b   : > { %3416 = vmatmul.mubr.bf16.gmra.mrb[20].mxu0 %v2434_v12  ;;  %v2409_v45 = vmul.f32 %v2377_v56, %v2249_v19  ;;  %v2380_v21 = vmul.f32 0.16666667, %v2348_v40  ;;  %v2350_v60 = vmin.f32 %v2318_v16, 6.0  ;;  %v2381_v54 = vmul.f32 0.16666667, %v2349_v7 }
 0x47c   : > { %3419 = vmatprep.mubr.bf16.mxu0 %v2435_v51  ;;  %v2410_v26 = vmul.f32 %v2378_v49, %v2250_v15  ;;  %v2256_v2 = vmul.f32 %v5481_v59, %v5371_v61  ;;  %v2287_v11 = vadd.f32 3.0, %v2255_v8  ;;  %v2411_v53 = vmul.f32 %v2379_v17, %v2251_v47 }
 0x47d   : > { %v2412_v52 = vmul.f32 %v2380_v21, %v2252_v14  ;;  %v2257_v4 = vmul.f32 %v5481_v59, %v5375_v35  ;;  %v2382_v33 = vmul.f32 0.16666667, %v2350_v60  ;;  %v2258_v31 = vmul.f32 %v5481_v59, %v5382_v58 }
 0x47e   : > { %v2288_v9 = vadd.f32 3.0, %v2256_v2  ;;  %v2319_v50 = vmax.f32 %v2287_v11, 0.0  ;;  %v2436_v19 = vpack.c.bf16 %v2410_v26, %v2409_v45  ;;  %v2413_v12 = vmul.f32 %v2381_v54, %v2253_v29 }
 0x47f   : > { %v2289_v55 = vadd.f32 3.0, %v2257_v4  ;;  %v2259_v15 = vmul.f32 %v5481_v59, %v5393_v30  ;;  %v2290_v38 = vadd.f32 3.0, %v2258_v31  ;;  %v2260_v47 = vmul.f32 %v5481_v59, %v5401_v63 }
 0x480   : > { %v2320_v41 = vmax.f32 %v2288_v9, 0.0  ;;  %v2351_v61 = vmin.f32 %v2319_v50, 6.0  ;;  %v2437_v14 = vpack.c.bf16 %v2412_v52, %v2411_v53  ;;  %v5529_v20 = vmul.f32 %v5481_v59, %v5409_v28 }
 0x481   : > { %v2321_v35 = vmax.f32 %v2289_v55, 0.0  ;;  %v2291_v46 = vadd.f32 3.0, %v2259_v15  ;;  %v2322_v29 = vmax.f32 %v2290_v38, 0.0  ;;  %v2292_v3 = vadd.f32 3.0, %v2260_v47 }
 0x482   : > { %v2352_v58 = vmin.f32 %v2320_v41, 6.0  ;;  %v2383_v62 = vmul.f32 0.16666667, %v2351_v61  ;;  %v2262_v42 = vmul.f32 %v5481_v59, %v5418_v27  ;;  %v2293_v23 = vadd.f32 3.0, %v5529_v20 }
 0x483   : > { %3420 = vmatmul.mubr.bf16.gmra.mrb[24].mxu0 %v2436_v19  ;;  %v2353_v34 = vmin.f32 %v2321_v35, 6.0  ;;  %v2323_v30 = vmax.f32 %v2291_v46, 0.0  ;;  %v2414_v63 = vmul.f32 %v2382_v33, %v2254_v6  ;;  %v2354_v37 = vmin.f32 %v2322_v29, 6.0 }
 0x484   : > { %3423 = vmatprep.mubr.bf16.mxu0 %v2437_v14  ;;  %v2384_v0 = vmul.f32 0.16666667, %v2352_v58  ;;  %v2324_v10 = vmax.f32 %v2292_v3, 0.0  ;;  %v2415_v13 = vmul.f32 %v2383_v62, %v2255_v8  ;;  %v2294_v57 = vadd.f32 3.0, %v2262_v42 }
 0x485   : > { %v2385_v28 = vmul.f32 0.16666667, %v2353_v34  ;;  %v2355_v24 = vmin.f32 %v2323_v30, 6.0  ;;  %v2325_v36 = vmax.f32 %v2293_v23, 0.0  ;;  %v2263_v56 = vmul.f32 %v5481_v59, %v5425_v1 }
 0x486   : > { %v2416_v18 = vmul.f32 %v2384_v0, %v2256_v2  ;;  %v2356_v25 = vmin.f32 %v2324_v10, 6.0  ;;  %v2386_v40 = vmul.f32 0.16666667, %v2354_v37  ;;  %v2326_v7 = vmax.f32 %v2294_v57, 0.0 }
 0x487   : > { %v2387_v16 = vmul.f32 0.16666667, %v2355_v24  ;;  %v2264_v6 = vmul.f32 %v5481_v59, %v5432_v43  ;;  %v2438_v51 = vpack.c.bf16 %v2414_v63, %v2413_v12  ;;  %v2417_v49 = vmul.f32 %v2385_v28, %v2257_v4 }
 0x488   : > { %v2388_v27 = vmul.f32 0.16666667, %v2356_v25  ;;  %v2295_v17 = vadd.f32 3.0, %v2263_v56  ;;  %v2439_v8 = vpack.c.bf16 %v2416_v18, %v2415_v13  ;;  %v2357_v45 = vmin.f32 %v2325_v36, 6.0 }
 0x489   : > { %v2296_v21 = vadd.f32 3.0, %v2264_v6  ;;  %v2265_v60 = vmul.f32 %v5481_v59, %v5438_v32  ;;  %v2418_v54 = vmul.f32 %v2386_v40, %v2258_v31  ;;  %v2419_v26 = vmul.f32 %v2387_v16, %v2259_v15 }
 0x48a   : > { %v2327_v1 = vmax.f32 %v2295_v17, 0.0  ;;  %v2266_v2 = vmul.f32 %v5481_v59, %v5444_v44  ;;  %v2420_v11 = vmul.f32 %v2388_v27, %v2260_v47  ;;  %v2358_v53 = vmin.f32 %v2326_v7, 6.0  ;;  %v5554_v17 = vld [vmem:[%s5853_s8] ss:$0 sm:$0xff] }
 0x48b   : > { %3424 = vmatmul.mubr.bf16.gmra.mrb[28].mxu0 %v2438_v51  ;;  %v2328_v43 = vmax.f32 %v2296_v21, 0.0  ;;  %v2267_v52 = vmul.f32 %v5481_v59, %v5448_v48  ;;  %v2297_v4 = vadd.f32 3.0, %v2265_v60  ;;  %v2268_v9 = vmul.f32 %v5481_v59, %v5452_v22 }
 0x48c   : > { %3427 = vmatprep.mubr.bf16.mxu0 %v2439_v8  ;;  %v2298_v33 = vadd.f32 3.0, %v2266_v2  ;;  %v2359_v32 = vmin.f32 %v2327_v1, 6.0  ;;  %v2440_v12 = vpack.c.bf16 %v2418_v54, %v2417_v49  ;;  %v2441_v55 = vpack.c.bf16 %v2420_v11, %v2419_v26 }
 0x48d   : > { %v2360_v50 = vmin.f32 %v2328_v43, 6.0  ;;  %v2299_v31 = vadd.f32 3.0, %v2267_v52  ;;  %v2300_v19 = vadd.f32 3.0, %v2268_v9  ;;  %v2389_v15 = vmul.f32 0.16666667, %v2357_v45 }
 0x48e   : > { %v2390_v44 = vmul.f32 0.16666667, %v2358_v53  ;;  %v2329_v41 = vmax.f32 %v2297_v4, 0.0  ;;  %v2330_v61 = vmax.f32 %v2298_v33, 0.0  ;;  %v2269_v38 = vmul.f32 %v5481_v59, %v5456_v39 }
 0x48f   : > { %v2270_v48 = vmul.f32 %v5481_v59, %v5460_v5  ;;  %v2391_v47 = vmul.f32 0.16666667, %v2359_v32  ;;  %v2392_v14 = vmul.f32 0.16666667, %v2360_v50  ;;  %v2331_v35 = vmax.f32 %v2299_v31, 0.0 }
 0x490   : > { %v2332_v22 = vmax.f32 %v2300_v19, 0.0  ;;  %v2421_v46 = vmul.f32 %v2389_v15, %v5529_v20  ;;  %v2422_v58 = vmul.f32 %v2390_v44, %v2262_v42  ;;  %v2361_v62 = vmin.f32 %v2329_v41, 6.0 }
 0x491   : > { %v2362_v29 = vmin.f32 %v2330_v61, 6.0  ;;  %v2301_v3 = vadd.f32 3.0, %v2269_v38  ;;  %v2302_v34 = vadd.f32 3.0, %v2270_v48  ;;  %v2423_v30 = vmul.f32 %v2391_v47, %v2263_v56 }
 0x492   : > { %v2424_v23 = vmul.f32 %v2392_v14, %v2264_v6  ;;  %v2363_v63 = vmin.f32 %v2331_v35, 6.0  ;;  %v2364_v39 = vmin.f32 %v2332_v22, 6.0  ;;  %v2442_v0 = vpack.c.bf16 %v2422_v58, %v2421_v46 }
 0x493   : > { %3428 = vmatmul.mubr.bf16.gmra.mrb[32].mxu0 %v2440_v12  ;;  %v2393_v37 = vmul.f32 0.16666667, %v2361_v62  ;;  %v2394_v5 = vmul.f32 0.16666667, %v2362_v29  ;;  %v2333_v59 = vmax.f32 %v2301_v3, 0.0  ;;  %v2334_v10 = vmax.f32 %v2302_v34, 0.0 }
 0x494   : > { %3431 = vmatprep.mubr.bf16.mxu0 %v2441_v55  ;;  %v2443_v13 = vpack.c.bf16 %v2424_v23, %v2423_v30  ;;  %v2395_v28 = vmul.f32 0.16666667, %v2363_v63  ;;  %v2396_v24 = vmul.f32 0.16666667, %v2364_v39 }
 0x495   : > { %v2425_v20 = vmul.f32 %v2393_v37, %v2265_v60  ;;  %v2426_v42 = vmul.f32 %v2394_v5, %v2266_v2  ;;  %v2365_v57 = vmin.f32 %v2333_v59, 6.0  ;;  %v2366_v18 = vmin.f32 %v2334_v10, 6.0 }
 0x496   : > { %v2427_v25 = vmul.f32 %v2395_v28, %v2267_v52  ;;  %v2428_v36 = vmul.f32 %v2396_v24, %v2268_v9 }
 0x497   : > { %v2444_v56 = vpack.c.bf16 %v2426_v42, %v2425_v20  ;;  %v2397_v40 = vmul.f32 0.16666667, %v2365_v57  ;;  %v2398_v16 = vmul.f32 0.16666667, %v2366_v18 }
 0x498   : > { %v2445_v27 = vpack.c.bf16 %v2428_v36, %v2427_v25 }
 0x499   : > { %v2429_v7 = vmul.f32 %v2397_v40, %v2269_v38  ;;  %v2430_v6 = vmul.f32 %v2398_v16, %v2270_v48 }
 0x49b   : > { %3432 = vmatmul.mubr.bf16.gmra.mrb[36].mxu0 %v2442_v0  ;;  %v2446_v51 = vpack.c.bf16 %v2430_v6, %v2429_v7 }
 0x49c   : > { %3435 = vmatprep.mubr.bf16.mxu0 %v2443_v13 }
 0x4a3   : > { %3436 = vmatmul.mubr.bf16.gmra.mrb[40].mxu0 %v2444_v56 }
 0x4a4   : > { %3439 = vmatprep.mubr.bf16.mxu0 %v2445_v27 }
 0x4ab   : > { %3440 = vmatmul.mubr.bf16.gmra.mrb[44].mxu0 %v2446_v51 }
 0x546   : > { %v3413_v49 = vpop.f32.mrb[16].mxu0 }
 0x547   : > { %v2552_v8 = vpop.f32.mrb[17].mxu0  ;;  %v2561_v21 = vadd.f32 %v3413_v49, %v5554_v17 }
 0x548   : > { %v3414_v45 = vpop.f32.mrb[18].mxu0  ;;  %v2553_v26 = vadd.f32 %v5554_v17, %v2552_v8 }
 0x549   : > { %v2564_v60 = vadd.f32 %v3414_v45, %v5554_v17  ;;  %v2555_v54 = vpop.f32.mrb[19].mxu0 }
 0x54a   : > { %v2556_v1 = vadd.f32 %v5554_v17, %v2555_v54 }
 0x54b   : > { %v3108_v2 = vpack.c.bf16 %v2564_v60, %v2561_v21 }
 0x54c   : > { %v3103_v11 = vpack.c.bf16 %v2556_v1, %v2553_v26 }
 0x54d   : > { %3180 = vst [vmem:[%s5562_s13 + $0x8] sm:$0xff] %v3108_v2  }
 0x54e   : > { %3104 = vst [vmem:[%s5562_s13] sm:$0xff] %v3103_v11   ;;  %v3417_v53 = vpop.f32.mrb[20].mxu0 }
 0x54f   : > { %v2568_v43 = vpop.f32.mrb[21].mxu0  ;;  %v2577_v4 = vadd.f32 %v3417_v53, %v5554_v17 }
 0x550   : > { %v3418_v52 = vpop.f32.mrb[22].mxu0  ;;  %v2569_v32 = vadd.f32 %v5554_v17, %v2568_v43 }
 0x551   : > { %v2580_v33 = vadd.f32 %v3418_v52, %v5554_v17  ;;  %v2571_v9 = vpop.f32.mrb[23].mxu0 }
 0x552   : > { %v2572_v50 = vadd.f32 %v5554_v17, %v2571_v9 }
 0x553   : > { %v3118_v31 = vpack.c.bf16 %v2580_v33, %v2577_v4 }
 0x554   : > { %v3113_v19 = vpack.c.bf16 %v2572_v50, %v2569_v32 }
 0x555   : > { %3182 = vst [vmem:[%s5562_s13 + $0x18] sm:$0xff] %v3118_v31  }
 0x556   : > { %3181 = vst [vmem:[%s5562_s13 + $0x10] sm:$0xff] %v3113_v19   ;;  %v3421_v12 = vpop.f32.mrb[24].mxu0 }
 0x557   : > { %v2584_v55 = vpop.f32.mrb[25].mxu0  ;;  %v2593_v44 = vadd.f32 %v3421_v12, %v5554_v17 }
 0x558   : > { %v3422_v15 = vpop.f32.mrb[26].mxu0  ;;  %v2585_v38 = vadd.f32 %v5554_v17, %v2584_v55 }
 0x559   : > { %v2596_v41 = vadd.f32 %v3422_v15, %v5554_v17  ;;  %v2587_v61 = vpop.f32.mrb[27].mxu0 }
 0x55a   : > { %v2588_v48 = vadd.f32 %v5554_v17, %v2587_v61 }
 0x55b   : > { %v3128_v47 = vpack.c.bf16 %v2596_v41, %v2593_v44 }
 0x55c   : > { %v3123_v14 = vpack.c.bf16 %v2588_v48, %v2585_v38 }
 0x55d   : > { %3184 = vst [vmem:[%s5562_s13 + $0x28] sm:$0xff] %v3128_v47  }
 0x55e   : > { %3183 = vst [vmem:[%s5562_s13 + $0x20] sm:$0xff] %v3123_v14   ;;  %v3425_v35 = vpop.f32.mrb[28].mxu0 }
 0x55f   : > { %v2600_v22 = vpop.f32.mrb[29].mxu0  ;;  %v2609_v58 = vadd.f32 %v3425_v35, %v5554_v17 }
 0x560   : > { %v3426_v46 = vpop.f32.mrb[30].mxu0  ;;  %v2601_v3 = vadd.f32 %v5554_v17, %v2600_v22 }
 0x561   : > { %v2612_v62 = vadd.f32 %v3426_v46, %v5554_v17  ;;  %v2603_v29 = vpop.f32.mrb[31].mxu0 }
 0x562   : > { %v2604_v34 = vadd.f32 %v5554_v17, %v2603_v29 }
 0x563   : > { %v3138_v30 = vpack.c.bf16 %v2612_v62, %v2609_v58 }
 0x564   : > { %v3133_v23 = vpack.c.bf16 %v2604_v34, %v2601_v3 }
 0x565   : > { %3186 = vst [vmem:[%s5562_s13 + $0x38] sm:$0xff] %v3138_v30  }
 0x566   : > { %3185 = vst [vmem:[%s5562_s13 + $0x30] sm:$0xff] %v3133_v23   ;;  %v3429_v63 = vpop.f32.mrb[32].mxu0 }
 0x567   : > { %v2616_v39 = vpop.f32.mrb[33].mxu0  ;;  %v2625_v37 = vadd.f32 %v3429_v63, %v5554_v17 }
 0x568   : > { %v3430_v0 = vpop.f32.mrb[34].mxu0  ;;  %v2617_v10 = vadd.f32 %v5554_v17, %v2616_v39 }
 0x569   : > { %v2628_v5 = vadd.f32 %v3430_v0, %v5554_v17  ;;  %v2619_v59 = vpop.f32.mrb[35].mxu0 }
 0x56a   : > { %v2620_v13 = vadd.f32 %v5554_v17, %v2619_v59 }
 0x56b   : > { %v3148_v28 = vpack.c.bf16 %v2628_v5, %v2625_v37 }
 0x56c   : > { %v3143_v24 = vpack.c.bf16 %v2620_v13, %v2617_v10 }
 0x56d   : > { %3188 = vst [vmem:[%s5562_s13 + $0x48] sm:$0xff] %v3148_v28  }
 0x56e   : > { %3187 = vst [vmem:[%s5562_s13 + $0x40] sm:$0xff] %v3143_v24   ;;  %v3433_v20 = vpop.f32.mrb[36].mxu0 }
 0x56f   : > { %v2632_v42 = vpop.f32.mrb[37].mxu0  ;;  %v2641_v18 = vadd.f32 %v3433_v20, %v5554_v17 }
 0x570   : > { %v3434_v57 = vpop.f32.mrb[38].mxu0  ;;  %v2633_v56 = vadd.f32 %v5554_v17, %v2632_v42 }
 0x571   : > { %v2644_v25 = vadd.f32 %v3434_v57, %v5554_v17  ;;  %v2635_v36 = vpop.f32.mrb[39].mxu0 }
 0x572   : > { %v2636_v40 = vadd.f32 %v5554_v17, %v2635_v36 }
 0x573   : > { %v3158_v16 = vpack.c.bf16 %v2644_v25, %v2641_v18 }
 0x574   : > { %v3153_v27 = vpack.c.bf16 %v2636_v40, %v2633_v56 }
 0x575   : > { %3190 = vst [vmem:[%s5562_s13 + $0x58] sm:$0xff] %v3158_v16  }
 0x576   : > { %3189 = vst [vmem:[%s5562_s13 + $0x50] sm:$0xff] %v3153_v27   ;;  %v3437_v7 = vpop.f32.mrb[40].mxu0 }
 0x577   : > { %v2648_v6 = vpop.f32.mrb[41].mxu0  ;;  %v2657_v49 = vadd.f32 %v3437_v7, %v5554_v17 }
 0x578   : > { %v3438_v51 = vpop.f32.mrb[42].mxu0  ;;  %v2649_v21 = vadd.f32 %v5554_v17, %v2648_v6 }
 0x579   : > { %v2660_v8 = vadd.f32 %v3438_v51, %v5554_v17  ;;  %v2651_v45 = vpop.f32.mrb[43].mxu0 }
 0x57a   : > { %v2652_v60 = vadd.f32 %v5554_v17, %v2651_v45 }
 0x57b   : > { %v3168_v54 = vpack.c.bf16 %v2660_v8, %v2657_v49 }
 0x57c   : > { %v3163_v26 = vpack.c.bf16 %v2652_v60, %v2649_v21 }
 0x57d   : > { %3192 = vst [vmem:[%s5562_s13 + $0x68] sm:$0xff] %v3168_v54  }
 0x57e   : > { %3191 = vst [vmem:[%s5562_s13 + $0x60] sm:$0xff] %v3163_v26   ;;  %v3441_v1 = vpop.f32.mrb[44].mxu0 }
 0x57f   : > { %v2664_v2 = vpop.f32.mrb[45].mxu0  ;;  %v2673_v53 = vadd.f32 %v3441_v1, %v5554_v17 }
 0x580   : > { %v3442_v11 = vpop.f32.mrb[46].mxu0  ;;  %v2665_v4 = vadd.f32 %v5554_v17, %v2664_v2 }
 0x581   : > { %v2676_v43 = vadd.f32 %v3442_v11, %v5554_v17  ;;  %v2667_v52 = vpop.f32.mrb[47].mxu0 }
 0x582   : > { %v2668_v33 = vadd.f32 %v5554_v17, %v2667_v52 }
 0x583   : > { %v3178_v9 = vpack.c.bf16 %v2676_v43, %v2673_v53 }
 0x584   : > { %v3173_v32 = vpack.c.bf16 %v2668_v33, %v2665_v4 }
 0x585   : > { %3194 = vst [vmem:[%s5562_s13 + $0x78] sm:$0xff] %v3178_v9  }
 0x586   : > { %3193 = vst [vmem:[%s5562_s13 + $0x70] sm:$0xff] %v3173_v32  }
 0x587   : > { %3834 = shalt.err (!%p3831_p8)
}
 0x588   : > { %s3835_s24 = scalar_lea.hbm %s5611_s28, 2048  ;;  %s3839_s13 = scalar_lea.hbm %s5854_s15, 4096 }
 0x589   : > { %p3836_p6 = scmp.ne.s32.totalorder %s5611_s28, %s3835_s24  ;;  %p3840_p3 = scmp.lt.u32.totalorder %s5611_s28, %s5854_s15 }
 0x58a   : > { %p3841_p0 = scmp.lt.u32.totalorder %s3839_s13, %s3835_s24  ;;  %p3843_p2 = scmp.lt.u32.totalorder %s3835_s24, %s5611_s28 }
 0x58b   : > { %p3837_p9 = pnand %p3836_p6, %p5855_p7 }
 0x58c   : > { %p3842_p5 = por %p3841_p0, %p3840_p3 }
 0x58d   : > { %p3838_p4 = pneg %p3837_p9 }
 0x58e   : > { %p3844_p10 = por %p3843_p2, %p3842_p5 }
 0x590   : > { %p3845_p1 = pnand %p3844_p10, %p3838_p4 }
 0x592   : > { %3848 = shalt.err (!%p3845_p1)
}
 0x593   : > { %s3915_s12 = smov 64   ;;  %s3916_s22 = smov 4  }
 0x594   : > { %3529 = dma.vmem_to_hbm [thread:$0]  (%p5855_p7), %s5613_s14, 2048, %s5611_s28, %s2840_s23, %s3915_s12, %s3915_s12, %s3916_s22  }
 0x595 PF: > { %s2868_s27 = sand.u32 1, %s3887_s17   ;;  %p5856_p11 = scmp.ne.s32.totalorder %s5726_s26, 0 }
 0x596   : > { %p5857_p12 = scmp.ge.s32.totalorder %s3899_s20, 2  ;;  %s2869_s29 = scalar_lea.sflag [#allocation5], %s2868_s27 }
 0x598   : > { %p3552_p13 = pnand %p5857_p12, %p5856_p11 }
 0x59a   : > { %3882 = dma.done.wait (!%p3552_p13), %s2869_s29, 2048  }
 0x59b   : > { %3884 = vsyncadd (!%p3552_p13), %s2869_s29, 4294965248  ;;  %p27_p8 = scmp.ge.s32.totalorder %s4146_s16, 4   ;;  %s5858_s17 = smov %s3891_s18 }
 0x59c   : > { %s5859_s18 = smov %s3895_s19  ;;  %s5860_s19 = smov %s4158_s30 }
 0x59d   : > { %s5861_s20 = smov %s4146_s16  ;;  %29 = sbr.rel (!%p27_p8) target bundleno = 14 (0xe), region = 132 }
 0x5a4   :  { %2874 = vsyncpa [#allocation4], 1 }
 0x5a5   :  { %2876 = vsyncpa [#allocation4 + $0x1], 1 }
 0x5a6   :  { %2877 = vsyncpa [#allocation7], 1 }
 0x5a7   :  { %2878 = vsyncpa [#allocation10], 1 }
 0x5a8   :  { %2879 = vsyncpa [#allocation13], 1 }
 0x5a9   :  { %2880 = vsyncpa [#allocation5], 1 }
 0x5aa   :  { %2882 = vsyncpa [#allocation5 + $0x1], 1 }

</bundles_post_ra>
